<compile_context>
chip_gen: v7x
topology: tpu7x:2x2x1
jax: 0.10.0
libtpu: 0.0.40
codegen_flags: <defaults>
</compile_context>

<pallas_src>
import jax
import jax.numpy as jnp
from jax import lax
from jax.experimental import pallas as pl
from jax.experimental.pallas import tpu as pltpu


INPUT_DIM = 1
HID_DIM = 15
OUTPUT_DIM = 3

HP = 128           # lane-padded hidden width
GP = 3 * HP        # padded width of the 3 fused GRU gates (r | z | n)


# ----------------------------------------------------------------------------
# Pallas kernel: full controller forward (both recurrences) in one invocation.
# ----------------------------------------------------------------------------
def controller_kernel(
    gi_ref,    # (S, 2*GP)  [enc input proj | dec scalar-input proj], biases folded
    w_ref,     # (HP, 3*GP + HP)  [wh_enc | wic_dec | wh_dec | wfc]
    b_ref,     # (3, HP)    rows: bhn_enc | bhn_dec | bfc
    out_ref,   # (S, HP)    padded logits (cols 0..2 real, row 0 zero)
    gd_ref,    # (S, GP)    scratch: decoder gi with context pre-added
    hs_ref,    # (S, HP)    scratch: decoder hidden states
):
    S = gi_ref.shape[0]

    # Hoist all constant loads out of the recurrent loops (lane-aligned slices).
    wh_e = w_ref[:, 0 * GP:1 * GP]        # (HP, GP)
    wic_d = w_ref[:, 1 * GP:2 * GP]       # (HP, GP)
    wh_d = w_ref[:, 2 * GP:3 * GP]        # (HP, GP)
    wfc = w_ref[:, 3 * GP:3 * GP + HP]    # (HP, HP)
    bhn_e = b_ref[0:1, :]                 # (1, HP)
    bhn_d = b_ref[1:2, :]                 # (1, HP)
    bfc = b_ref[2:3, :]                   # (1, HP)

    def gru_step(gi, h, wh, bhn):
        # PyTorch gate order r | z | n; b_ir+b_hr / b_iz+b_hz / b_in folded
        # into gi, b_hn stays inside the r*(.) term.  One fused sigmoid over
        # the contiguous r|z half (single EUP issue per step).
        gh = jnp.dot(h, wh, preferred_element_type=jnp.float32)       # (1, GP)
        rz = jax.nn.sigmoid(gi[:, :2 * HP] + gh[:, :2 * HP])          # (1, 2HP)
        r = rz[:, :HP]
        z = rz[:, HP:]
        n = jnp.tanh(gi[:, 2 * HP:] + r * (gh[:, 2 * HP:] + bhn))
        return n + z * (h - n)             # == (1 - z) * n + z * h

    # ---------------- Encoder GRU: h carried in registers --------------------
    def enc_body(t, h):
        gi = gi_ref[pl.ds(t, 1), :GP]                                 # (1, GP)
        return gru_step(gi, h, wh_e, bhn_e)

    h_enc = lax.fori_loop(0, S, enc_body, jnp.zeros((1, HP), jnp.float32),
                          unroll=True)

    # ---------------- Attention context (collapses to h_enc) -----------------
    # encoder_hidden has a single key -> softmax weight == 1 -> context is
    # exactly h_enc and constant over t.  Project it through the decoder's
    # context input-weights once and pre-add it to the whole gi slab.
    gi_ctx = jnp.dot(h_enc, wic_d, preferred_element_type=jnp.float32)  # (1, GP)
    gd_ref[...] = gi_ref[:, GP:] + gi_ctx                               # (S, GP)

    # ---------------- Decoder GRU, t = 1 .. S-1 -------------------------------
    hs_ref[pl.ds(0, 1), :] = jnp.zeros((1, HP), jnp.float32)

    def dec_body(t, h):
        gi = gd_ref[pl.ds(t, 1), :]                                   # (1, GP)
        h_new = gru_step(gi, h, wh_d, bhn_d)
        hs_ref[pl.ds(t, 1), :] = h_new                                # lane-dense
        return h_new

    _ = lax.fori_loop(1, S, dec_body, h_enc, unroll=True)

    # ---------------- Batched fc_out + single lane-dense store ----------------
    preds = jnp.dot(hs_ref[...], wfc, preferred_element_type=jnp.float32) + bfc
    row = lax.broadcasted_iota(jnp.int32, preds.shape, 0)
    out_ref[...] = jnp.where(row == 0, jnp.float32(0.0), preds)      # row 0 = 0


# ----------------------------------------------------------------------------
# One-time parameter packing (outside the per-call jit path).
# ----------------------------------------------------------------------------
def pack_params(params):
    H = params["w_hh_e"].shape[1]
    O = params["w_fc"].shape[0]

    def pad_gates_T(w):
        # (3H, I) -> (I, 3*HP), per-gate transpose + zero lane padding, r|z|n.
        blocks = []
        for g in range(3):
            blk = w[g * H:(g + 1) * H].T                       # (I, H)
            blocks.append(jnp.pad(blk, ((0, 0), (0, HP - H)))) # (I, HP)
        return jnp.concatenate(blocks, axis=1)                 # (I, 3*HP)

    def pad_rows(m):
        return jnp.pad(m, ((0, HP - m.shape[0]), (0, 0)))      # rows -> HP

    def fold_bias_pad(b_ih, b_hh):
        parts = [b_ih[:H] + b_hh[:H],
                 b_ih[H:2 * H] + b_hh[H:2 * H],
                 b_ih[2 * H:]]
        return jnp.concatenate(
            [jnp.pad(p, (0, HP - H)) for p in parts])[None]    # (1, 3*HP)

    # Encoder GRU (input_dim = 1)
    wi_e = pad_gates_T(params["w_ih_e"])                       # (1, GP)
    wh_e = pad_rows(pad_gates_T(params["w_hh_e"]))             # (HP, GP)
    bias_e = fold_bias_pad(params["b_ih_e"], params["b_hh_e"]) # (1, GP)
    bhn_e = jnp.pad(params["b_hh_e"][2 * H:], (0, HP - H))[None]   # (1, HP)

    # Decoder GRU (input = [state[t], context]; col 0 = scalar, 1.. = context)
    w_ih_d = params["w_ih_d"]
    wi_d_x = pad_gates_T(w_ih_d[:, :1])                        # (1, GP)
    wic_d = pad_rows(pad_gates_T(w_ih_d[:, 1:]))               # (HP, GP)
    wh_d = pad_rows(pad_gates_T(params["w_hh_d"]))             # (HP, GP)
    bias_d = fold_bias_pad(params["b_ih_d"], params["b_hh_d"]) # (1, GP)
    bhn_d = jnp.pad(params["b_hh_d"][2 * H:], (0, HP - H))[None]   # (1, HP)

    # fc_out, lane/row padded to 128
    wfc = jnp.pad(params["w_fc"].T, ((0, HP - H), (0, HP - O)))    # (HP, HP)
    bfc = jnp.pad(params["b_fc"], (0, HP - O))[None]               # (1, HP)

    return {
        # per-call input-projection weights/biases for BOTH recurrences,
        # fused so the wrapper does a single (S,1)@(1,2*GP) matmul
        "wi_slab": jnp.concatenate([wi_e, wi_d_x], axis=1),        # (1, 2*GP)
        "bias_slab": jnp.concatenate([bias_e, bias_d], axis=1),    # (1, 2*GP)
        # kernel weight / bias slabs (3 DMAs total incl. gi slab)
        "w_slab": jnp.concatenate([wh_e, wic_d, wh_d, wfc], axis=1),  # (HP,3GP+HP)
        "b_slab": jnp.concatenate([bhn_e, bhn_d, bfc], axis=0),       # (3, HP)
    }


# ----------------------------------------------------------------------------
# Per-call wrapper: one fused input projection + one grid-less pallas_call.
# ----------------------------------------------------------------------------
@jax.jit
def controller_forward(state, packed):
    """state: (S,) float32 sequence.  Returns logits: (S, 1, OUTPUT_DIM)."""
    S = state.shape[0]
    x = state.reshape(S, 1).astype(jnp.float32)

    # Input-side GRU projections for both recurrences, biases folded in.
    gi_slab = x @ packed["wi_slab"] + packed["bias_slab"]      # (S, 2*GP)

    vmem = pl.BlockSpec(memory_space=pltpu.MemorySpace.VMEM)
    out_pad = pl.pallas_call(
        controller_kernel,
        out_shape=jax.ShapeDtypeStruct((S, HP), jnp.float32),
        in_specs=[vmem, vmem, vmem],
        out_specs=vmem,
        scratch_shapes=[
            pltpu.VMEM((S, GP), jnp.float32),   # decoder gi (+context)
            pltpu.VMEM((S, HP), jnp.float32),   # decoder hidden states
        ],
    )(gi_slab, packed["w_slab"], packed["b_slab"])

    return out_pad[:, :OUTPUT_DIM].reshape(S, 1, OUTPUT_DIM)


# ----------------------------------------------------------------------------
# Deterministic parameter init (PyTorch defaults: U(-1/sqrt(H), 1/sqrt(H)))
# ----------------------------------------------------------------------------
def init_params(key, input_dim=INPUT_DIM, hid_dim=HID_DIM, output_dim=OUTPUT_DIM):
    H = hid_dim
    k = 1.0 / jnp.sqrt(jnp.float32(H))
    ks = jax.random.split(key, 13)
    u = lambda kk, shape: jax.random.uniform(kk, shape, jnp.float32, -k, k)
    return {
        # Encoder nn.GRU(input_dim, H)
        "w_ih_e": u(ks[0], (3 * H, input_dim)),
        "w_hh_e": u(ks[1], (3 * H, H)),
        "b_ih_e": u(ks[2], (3 * H,)),
        "b_hh_e": u(ks[3], (3 * H,)),
        # Decoder nn.GRU(1 + H, H)
        "w_ih_d": u(ks[4], (3 * H, 1 + H)),
        "w_hh_d": u(ks[5], (3 * H, H)),
        "b_ih_d": u(ks[6], (3 * H,)),
        "b_hh_d": u(ks[7], (3 * H,)),
        # fc_out
        "w_fc": u(ks[8], (output_dim, H)),
        "b_fc": u(ks[9], (output_dim,)),
        # Attention layers (mathematically dead with a single encoder key; used
        # only by the pure-JAX reference to demonstrate exact equivalence).
        "w_q": u(ks[10], (H, H)),
        "w_k": u(ks[11], (H, H)),
        "w_e": u(ks[12], (1, H)),
    }


# ----------------------------------------------------------------------------
# Pure-JAX reference mirroring the PyTorch controller.forward step by step
# (including the full attention computation) for verification.
# ----------------------------------------------------------------------------
def controller_ref(state, p):
    S = state.shape[0]
    H = p["w_hh_e"].shape[1]
    O = p["w_fc"].shape[0]

    def gru_cell(x, h, w_ih, w_hh, b_ih, b_hh):
        gi = x @ w_ih.T + b_ih
        gh = h @ w_hh.T + b_hh
        r = jax.nn.sigmoid(gi[:, :H] + gh[:, :H])
        z = jax.nn.sigmoid(gi[:, H:2 * H] + gh[:, H:2 * H])
        n = jnp.tanh(gi[:, 2 * H:] + r * gh[:, 2 * H:])
        return (1.0 - z) * n + z * h

    def enc_step(h, x_t):
        h_new = gru_cell(x_t.reshape(1, 1), h,
                         p["w_ih_e"], p["w_hh_e"], p["b_ih_e"], p["b_hh_e"])
        return h_new, None

    h_enc, _ = lax.scan(enc_step, jnp.zeros((1, H), jnp.float32), state)
    encoder_hidden = h_enc[None]                                   # (1, 1, H)

    def dec_step(hidden, x_t):
        query = hidden[-1] @ p["w_q"].T                            # (H,)
        proj_key = encoder_hidden @ p["w_k"].T                     # (1, 1, H)
        scores = jnp.tanh(query + proj_key) @ p["w_e"].T           # (1, 1, 1)
        alphas = jax.nn.softmax(scores[:, :, 0][:, None, :], -1)   # (1, 1, 1)
        context = jnp.einsum("bik,bkh->bih", alphas, encoder_hidden)
        rnn_in = jnp.concatenate(
            [jnp.full((1, 1), x_t, jnp.float32), context[0]], axis=1)
        h_new = gru_cell(rnn_in, hidden,
                         p["w_ih_d"], p["w_hh_d"], p["b_ih_d"], p["b_hh_d"])
        pred = h_new @ p["w_fc"].T + p["b_fc"]                     # (1, O)
        return h_new, pred

    _, preds = lax.scan(dec_step, h_enc, state[1:])                # (S-1, 1, O)
    return jnp.zeros((S, 1, O), jnp.float32).at[1:].set(preds)


if __name__ == "__main__":
    MAX_LAYERS = 2
    NUM_LAYERS = 5 * MAX_LAYERS          # sequence length S = 10

    key = jax.random.PRNGKey(0)
    k_state, k_params = jax.random.split(key)
    state = jax.random.normal(k_state, (NUM_LAYERS,), jnp.float32)
    params = init_params(k_params)
    packed = pack_params(params)         # one-time packing, not in the hot path

    logits = controller_forward(state, packed)
    logits = jax.block_until_ready(logits)

    ref = controller_ref(state, params)
    assert logits.shape == (NUM_LAYERS, 1, OUTPUT_DIM)
    max_diff = jnp.max(jnp.abs(logits - ref))
    assert jnp.allclose(logits, ref, atol=1e-4, rtol=1e-4), (
        f"mismatch vs JAX reference, max abs diff = {max_diff}")
    # TODO(synk): dropout is identity (eval mode); Adam/update_policy/get_action
    # are training / host-side logic and intentionally not implemented.

    print("KERNEL_OK")
</pallas_src>

<mosaic_0001>
module attributes {stable_mosaic.version = 11 : i64} {
  func.func @controller_kernel(%arg0: memref<10x768xf32, #tpu.memory_space<vmem>>, %arg1: memref<128x1280xf32, #tpu.memory_space<vmem>>, %arg2: memref<3x128xf32, #tpu.memory_space<vmem>>, %arg3: memref<10x128xf32, #tpu.memory_space<vmem>>, %arg4: memref<10x384xf32, #tpu.memory_space<vmem>>, %arg5: memref<10x128xf32, #tpu.memory_space<vmem>>) attributes {dimension_semantics = [], scalar_prefetch = 0 : i64, scratch_operands = 2 : i64, tpu.core_type = #tpu.core_type<tc>} {
    %c0 = arith.constant 0 : index
    %c0_0 = arith.constant 0 : index
    %0 = vector.load %arg1[%c0, %c0_0] : memref<128x1280xf32, #tpu.memory_space<vmem>>, vector<128x384xf32>
    %c0_1 = arith.constant 0 : index
    %c384 = arith.constant 384 : index
    %1 = vector.load %arg1[%c0_1, %c384] : memref<128x1280xf32, #tpu.memory_space<vmem>>, vector<128x384xf32>
    %c0_2 = arith.constant 0 : index
    %c768 = arith.constant 768 : index
    %2 = vector.load %arg1[%c0_2, %c768] : memref<128x1280xf32, #tpu.memory_space<vmem>>, vector<128x384xf32>
    %c0_3 = arith.constant 0 : index
    %c1152 = arith.constant 1152 : index
    %3 = vector.load %arg1[%c0_3, %c1152] : memref<128x1280xf32, #tpu.memory_space<vmem>>, vector<128x128xf32>
    %c0_4 = arith.constant 0 : index
    %c0_5 = arith.constant 0 : index
    %4 = vector.load %arg2[%c0_4, %c0_5] : memref<3x128xf32, #tpu.memory_space<vmem>>, vector<1x128xf32>
    %c1 = arith.constant 1 : index
    %c0_6 = arith.constant 0 : index
    %5 = vector.load %arg2[%c1, %c0_6] : memref<3x128xf32, #tpu.memory_space<vmem>>, vector<1x128xf32>
    %c2 = arith.constant 2 : index
    %c0_7 = arith.constant 0 : index
    %6 = vector.load %arg2[%c2, %c0_7] : memref<3x128xf32, #tpu.memory_space<vmem>>, vector<1x128xf32>
    %cst = arith.constant 0.000000e+00 : f32
    %7 = vector.broadcast %cst : f32 to vector<1x128xf32>
    %c0_i32 = arith.constant 0 : i32
    %8 = arith.index_cast %c0_i32 : i32 to index
    %c0_8 = arith.constant 0 : index
    %9 = vector.load %arg0[%8, %c0_8] : memref<10x768xf32, #tpu.memory_space<vmem>>, vector<1x384xf32>
    %cst_9 = arith.constant dense<0.000000e+00> : vector<1x384xf32>
    %10 = tpu.matmul %7, %0, %cst_9 {dimension_numbers = #tpu.dot_dimension_numbers<[1], [0], [0], [1], [0, 0, 1, 1], [], []>} : vector<1x128xf32>, vector<128x384xf32>, vector<1x384xf32> -> vector<1x384xf32>
    %11 = vector.extract_strided_slice %9 {offsets = [0, 0], sizes = [1, 256], strides = [1, 1]} : vector<1x384xf32> to vector<1x256xf32>
    %12 = vector.extract_strided_slice %10 {offsets = [0, 0], sizes = [1, 256], strides = [1, 1]} : vector<1x384xf32> to vector<1x256xf32>
    %13 = arith.addf %11, %12 : vector<1x256xf32>
    %14 = arith.negf %13 : vector<1x256xf32>
    %15 = math.exp %14 : vector<1x256xf32>
    %cst_10 = arith.constant 1.000000e+00 : f32
    %16 = vector.broadcast %cst_10 : f32 to vector<1x256xf32>
    %17 = arith.addf %16, %15 : vector<1x256xf32>
    %18 = arith.divf %16, %17 : vector<1x256xf32>
    %19 = vector.extract_strided_slice %18 {offsets = [0, 0], sizes = [1, 128], strides = [1, 1]} : vector<1x256xf32> to vector<1x128xf32>
    %20 = vector.extract_strided_slice %18 {offsets = [0, 128], sizes = [1, 128], strides = [1, 1]} : vector<1x256xf32> to vector<1x128xf32>
    %21 = vector.extract_strided_slice %9 {offsets = [0, 256], sizes = [1, 128], strides = [1, 1]} : vector<1x384xf32> to vector<1x128xf32>
    %22 = vector.extract_strided_slice %10 {offsets = [0, 256], sizes = [1, 128], strides = [1, 1]} : vector<1x384xf32> to vector<1x128xf32>
    %23 = arith.addf %22, %4 : vector<1x128xf32>
    %24 = arith.mulf %19, %23 : vector<1x128xf32>
    %25 = arith.addf %21, %24 : vector<1x128xf32>
    %26 = math.tanh %25 : vector<1x128xf32>
    %27 = arith.subf %7, %26 : vector<1x128xf32>
    %28 = arith.mulf %20, %27 : vector<1x128xf32>
    %29 = arith.addf %26, %28 : vector<1x128xf32>
    %c1_i32 = arith.constant 1 : i32
    %30 = arith.index_cast %c1_i32 : i32 to index
    %c0_11 = arith.constant 0 : index
    %31 = vector.load %arg0[%30, %c0_11] : memref<10x768xf32, #tpu.memory_space<vmem>>, vector<1x384xf32>
    %cst_12 = arith.constant dense<0.000000e+00> : vector<1x384xf32>
    %32 = tpu.matmul %29, %0, %cst_12 {dimension_numbers = #tpu.dot_dimension_numbers<[1], [0], [0], [1], [0, 0, 1, 1], [], []>} : vector<1x128xf32>, vector<128x384xf32>, vector<1x384xf32> -> vector<1x384xf32>
    %33 = vector.extract_strided_slice %31 {offsets = [0, 0], sizes = [1, 256], strides = [1, 1]} : vector<1x384xf32> to vector<1x256xf32>
    %34 = vector.extract_strided_slice %32 {offsets = [0, 0], sizes = [1, 256], strides = [1, 1]} : vector<1x384xf32> to vector<1x256xf32>
    %35 = arith.addf %33, %34 : vector<1x256xf32>
    %36 = arith.negf %35 : vector<1x256xf32>
    %37 = math.exp %36 : vector<1x256xf32>
    %cst_13 = arith.constant 1.000000e+00 : f32
    %38 = vector.broadcast %cst_13 : f32 to vector<1x256xf32>
    %39 = arith.addf %38, %37 : vector<1x256xf32>
    %40 = arith.divf %38, %39 : vector<1x256xf32>
    %41 = vector.extract_strided_slice %40 {offsets = [0, 0], sizes = [1, 128], strides = [1, 1]} : vector<1x256xf32> to vector<1x128xf32>
    %42 = vector.extract_strided_slice %40 {offsets = [0, 128], sizes = [1, 128], strides = [1, 1]} : vector<1x256xf32> to vector<1x128xf32>
    %43 = vector.extract_strided_slice %31 {offsets = [0, 256], sizes = [1, 128], strides = [1, 1]} : vector<1x384xf32> to vector<1x128xf32>
    %44 = vector.extract_strided_slice %32 {offsets = [0, 256], sizes = [1, 128], strides = [1, 1]} : vector<1x384xf32> to vector<1x128xf32>
    %45 = arith.addf %44, %4 : vector<1x128xf32>
    %46 = arith.mulf %41, %45 : vector<1x128xf32>
    %47 = arith.addf %43, %46 : vector<1x128xf32>
    %48 = math.tanh %47 : vector<1x128xf32>
    %49 = arith.subf %29, %48 : vector<1x128xf32>
    %50 = arith.mulf %42, %49 : vector<1x128xf32>
    %51 = arith.addf %48, %50 : vector<1x128xf32>
    %c2_i32 = arith.constant 2 : i32
    %52 = arith.index_cast %c2_i32 : i32 to index
    %c0_14 = arith.constant 0 : index
    %53 = vector.load %arg0[%52, %c0_14] : memref<10x768xf32, #tpu.memory_space<vmem>>, vector<1x384xf32>
    %cst_15 = arith.constant dense<0.000000e+00> : vector<1x384xf32>
    %54 = tpu.matmul %51, %0, %cst_15 {dimension_numbers = #tpu.dot_dimension_numbers<[1], [0], [0], [1], [0, 0, 1, 1], [], []>} : vector<1x128xf32>, vector<128x384xf32>, vector<1x384xf32> -> vector<1x384xf32>
    %55 = vector.extract_strided_slice %53 {offsets = [0, 0], sizes = [1, 256], strides = [1, 1]} : vector<1x384xf32> to vector<1x256xf32>
    %56 = vector.extract_strided_slice %54 {offsets = [0, 0], sizes = [1, 256], strides = [1, 1]} : vector<1x384xf32> to vector<1x256xf32>
    %57 = arith.addf %55, %56 : vector<1x256xf32>
    %58 = arith.negf %57 : vector<1x256xf32>
    %59 = math.exp %58 : vector<1x256xf32>
    %cst_16 = arith.constant 1.000000e+00 : f32
    %60 = vector.broadcast %cst_16 : f32 to vector<1x256xf32>
    %61 = arith.addf %60, %59 : vector<1x256xf32>
    %62 = arith.divf %60, %61 : vector<1x256xf32>
    %63 = vector.extract_strided_slice %62 {offsets = [0, 0], sizes = [1, 128], strides = [1, 1]} : vector<1x256xf32> to vector<1x128xf32>
    %64 = vector.extract_strided_slice %62 {offsets = [0, 128], sizes = [1, 128], strides = [1, 1]} : vector<1x256xf32> to vector<1x128xf32>
    %65 = vector.extract_strided_slice %53 {offsets = [0, 256], sizes = [1, 128], strides = [1, 1]} : vector<1x384xf32> to vector<1x128xf32>
    %66 = vector.extract_strided_slice %54 {offsets = [0, 256], sizes = [1, 128], strides = [1, 1]} : vector<1x384xf32> to vector<1x128xf32>
    %67 = arith.addf %66, %4 : vector<1x128xf32>
    %68 = arith.mulf %63, %67 : vector<1x128xf32>
    %69 = arith.addf %65, %68 : vector<1x128xf32>
    %70 = math.tanh %69 : vector<1x128xf32>
    %71 = arith.subf %51, %70 : vector<1x128xf32>
    %72 = arith.mulf %64, %71 : vector<1x128xf32>
    %73 = arith.addf %70, %72 : vector<1x128xf32>
    %c3_i32 = arith.constant 3 : i32
    %74 = arith.index_cast %c3_i32 : i32 to index
    %c0_17 = arith.constant 0 : index
    %75 = vector.load %arg0[%74, %c0_17] : memref<10x768xf32, #tpu.memory_space<vmem>>, vector<1x384xf32>
    %cst_18 = arith.constant dense<0.000000e+00> : vector<1x384xf32>
    %76 = tpu.matmul %73, %0, %cst_18 {dimension_numbers = #tpu.dot_dimension_numbers<[1], [0], [0], [1], [0, 0, 1, 1], [], []>} : vector<1x128xf32>, vector<128x384xf32>, vector<1x384xf32> -> vector<1x384xf32>
    %77 = vector.extract_strided_slice %75 {offsets = [0, 0], sizes = [1, 256], strides = [1, 1]} : vector<1x384xf32> to vector<1x256xf32>
    %78 = vector.extract_strided_slice %76 {offsets = [0, 0], sizes = [1, 256], strides = [1, 1]} : vector<1x384xf32> to vector<1x256xf32>
    %79 = arith.addf %77, %78 : vector<1x256xf32>
    %80 = arith.negf %79 : vector<1x256xf32>
    %81 = math.exp %80 : vector<1x256xf32>
    %cst_19 = arith.constant 1.000000e+00 : f32
    %82 = vector.broadcast %cst_19 : f32 to vector<1x256xf32>
    %83 = arith.addf %82, %81 : vector<1x256xf32>
    %84 = arith.divf %82, %83 : vector<1x256xf32>
    %85 = vector.extract_strided_slice %84 {offsets = [0, 0], sizes = [1, 128], strides = [1, 1]} : vector<1x256xf32> to vector<1x128xf32>
    %86 = vector.extract_strided_slice %84 {offsets = [0, 128], sizes = [1, 128], strides = [1, 1]} : vector<1x256xf32> to vector<1x128xf32>
    %87 = vector.extract_strided_slice %75 {offsets = [0, 256], sizes = [1, 128], strides = [1, 1]} : vector<1x384xf32> to vector<1x128xf32>
    %88 = vector.extract_strided_slice %76 {offsets = [0, 256], sizes = [1, 128], strides = [1, 1]} : vector<1x384xf32> to vector<1x128xf32>
    %89 = arith.addf %88, %4 : vector<1x128xf32>
    %90 = arith.mulf %85, %89 : vector<1x128xf32>
    %91 = arith.addf %87, %90 : vector<1x128xf32>
    %92 = math.tanh %91 : vector<1x128xf32>
    %93 = arith.subf %73, %92 : vector<1x128xf32>
    %94 = arith.mulf %86, %93 : vector<1x128xf32>
    %95 = arith.addf %92, %94 : vector<1x128xf32>
    %c4_i32 = arith.constant 4 : i32
    %96 = arith.index_cast %c4_i32 : i32 to index
    %c0_20 = arith.constant 0 : index
    %97 = vector.load %arg0[%96, %c0_20] : memref<10x768xf32, #tpu.memory_space<vmem>>, vector<1x384xf32>
    %cst_21 = arith.constant dense<0.000000e+00> : vector<1x384xf32>
    %98 = tpu.matmul %95, %0, %cst_21 {dimension_numbers = #tpu.dot_dimension_numbers<[1], [0], [0], [1], [0, 0, 1, 1], [], []>} : vector<1x128xf32>, vector<128x384xf32>, vector<1x384xf32> -> vector<1x384xf32>
    %99 = vector.extract_strided_slice %97 {offsets = [0, 0], sizes = [1, 256], strides = [1, 1]} : vector<1x384xf32> to vector<1x256xf32>
    %100 = vector.extract_strided_slice %98 {offsets = [0, 0], sizes = [1, 256], strides = [1, 1]} : vector<1x384xf32> to vector<1x256xf32>
    %101 = arith.addf %99, %100 : vector<1x256xf32>
    %102 = arith.negf %101 : vector<1x256xf32>
    %103 = math.exp %102 : vector<1x256xf32>
    %cst_22 = arith.constant 1.000000e+00 : f32
    %104 = vector.broadcast %cst_22 : f32 to vector<1x256xf32>
    %105 = arith.addf %104, %103 : vector<1x256xf32>
    %106 = arith.divf %104, %105 : vector<1x256xf32>
    %107 = vector.extract_strided_slice %106 {offsets = [0, 0], sizes = [1, 128], strides = [1, 1]} : vector<1x256xf32> to vector<1x128xf32>
    %108 = vector.extract_strided_slice %106 {offsets = [0, 128], sizes = [1, 128], strides = [1, 1]} : vector<1x256xf32> to vector<1x128xf32>
    %109 = vector.extract_strided_slice %97 {offsets = [0, 256], sizes = [1, 128], strides = [1, 1]} : vector<1x384xf32> to vector<1x128xf32>
    %110 = vector.extract_strided_slice %98 {offsets = [0, 256], sizes = [1, 128], strides = [1, 1]} : vector<1x384xf32> to vector<1x128xf32>
    %111 = arith.addf %110, %4 : vector<1x128xf32>
    %112 = arith.mulf %107, %111 : vector<1x128xf32>
    %113 = arith.addf %109, %112 : vector<1x128xf32>
    %114 = math.tanh %113 : vector<1x128xf32>
    %115 = arith.subf %95, %114 : vector<1x128xf32>
    %116 = arith.mulf %108, %115 : vector<1x128xf32>
    %117 = arith.addf %114, %116 : vector<1x128xf32>
    %c5_i32 = arith.constant 5 : i32
    %118 = arith.index_cast %c5_i32 : i32 to index
    %c0_23 = arith.constant 0 : index
    %119 = vector.load %arg0[%118, %c0_23] : memref<10x768xf32, #tpu.memory_space<vmem>>, vector<1x384xf32>
    %cst_24 = arith.constant dense<0.000000e+00> : vector<1x384xf32>
    %120 = tpu.matmul %117, %0, %cst_24 {dimension_numbers = #tpu.dot_dimension_numbers<[1], [0], [0], [1], [0, 0, 1, 1], [], []>} : vector<1x128xf32>, vector<128x384xf32>, vector<1x384xf32> -> vector<1x384xf32>
    %121 = vector.extract_strided_slice %119 {offsets = [0, 0], sizes = [1, 256], strides = [1, 1]} : vector<1x384xf32> to vector<1x256xf32>
    %122 = vector.extract_strided_slice %120 {offsets = [0, 0], sizes = [1, 256], strides = [1, 1]} : vector<1x384xf32> to vector<1x256xf32>
    %123 = arith.addf %121, %122 : vector<1x256xf32>
    %124 = arith.negf %123 : vector<1x256xf32>
    %125 = math.exp %124 : vector<1x256xf32>
    %cst_25 = arith.constant 1.000000e+00 : f32
    %126 = vector.broadcast %cst_25 : f32 to vector<1x256xf32>
    %127 = arith.addf %126, %125 : vector<1x256xf32>
    %128 = arith.divf %126, %127 : vector<1x256xf32>
    %129 = vector.extract_strided_slice %128 {offsets = [0, 0], sizes = [1, 128], strides = [1, 1]} : vector<1x256xf32> to vector<1x128xf32>
    %130 = vector.extract_strided_slice %128 {offsets = [0, 128], sizes = [1, 128], strides = [1, 1]} : vector<1x256xf32> to vector<1x128xf32>
    %131 = vector.extract_strided_slice %119 {offsets = [0, 256], sizes = [1, 128], strides = [1, 1]} : vector<1x384xf32> to vector<1x128xf32>
    %132 = vector.extract_strided_slice %120 {offsets = [0, 256], sizes = [1, 128], strides = [1, 1]} : vector<1x384xf32> to vector<1x128xf32>
    %133 = arith.addf %132, %4 : vector<1x128xf32>
    %134 = arith.mulf %129, %133 : vector<1x128xf32>
    %135 = arith.addf %131, %134 : vector<1x128xf32>
    %136 = math.tanh %135 : vector<1x128xf32>
    %137 = arith.subf %117, %136 : vector<1x128xf32>
    %138 = arith.mulf %130, %137 : vector<1x128xf32>
    %139 = arith.addf %136, %138 : vector<1x128xf32>
    %c6_i32 = arith.constant 6 : i32
    %140 = arith.index_cast %c6_i32 : i32 to index
    %c0_26 = arith.constant 0 : index
    %141 = vector.load %arg0[%140, %c0_26] : memref<10x768xf32, #tpu.memory_space<vmem>>, vector<1x384xf32>
    %cst_27 = arith.constant dense<0.000000e+00> : vector<1x384xf32>
    %142 = tpu.matmul %139, %0, %cst_27 {dimension_numbers = #tpu.dot_dimension_numbers<[1], [0], [0], [1], [0, 0, 1, 1], [], []>} : vector<1x128xf32>, vector<128x384xf32>, vector<1x384xf32> -> vector<1x384xf32>
    %143 = vector.extract_strided_slice %141 {offsets = [0, 0], sizes = [1, 256], strides = [1, 1]} : vector<1x384xf32> to vector<1x256xf32>
    %144 = vector.extract_strided_slice %142 {offsets = [0, 0], sizes = [1, 256], strides = [1, 1]} : vector<1x384xf32> to vector<1x256xf32>
    %145 = arith.addf %143, %144 : vector<1x256xf32>
    %146 = arith.negf %145 : vector<1x256xf32>
    %147 = math.exp %146 : vector<1x256xf32>
    %cst_28 = arith.constant 1.000000e+00 : f32
    %148 = vector.broadcast %cst_28 : f32 to vector<1x256xf32>
    %149 = arith.addf %148, %147 : vector<1x256xf32>
    %150 = arith.divf %148, %149 : vector<1x256xf32>
    %151 = vector.extract_strided_slice %150 {offsets = [0, 0], sizes = [1, 128], strides = [1, 1]} : vector<1x256xf32> to vector<1x128xf32>
    %152 = vector.extract_strided_slice %150 {offsets = [0, 128], sizes = [1, 128], strides = [1, 1]} : vector<1x256xf32> to vector<1x128xf32>
    %153 = vector.extract_strided_slice %141 {offsets = [0, 256], sizes = [1, 128], strides = [1, 1]} : vector<1x384xf32> to vector<1x128xf32>
    %154 = vector.extract_strided_slice %142 {offsets = [0, 256], sizes = [1, 128], strides = [1, 1]} : vector<1x384xf32> to vector<1x128xf32>
    %155 = arith.addf %154, %4 : vector<1x128xf32>
    %156 = arith.mulf %151, %155 : vector<1x128xf32>
    %157 = arith.addf %153, %156 : vector<1x128xf32>
    %158 = math.tanh %157 : vector<1x128xf32>
    %159 = arith.subf %139, %158 : vector<1x128xf32>
    %160 = arith.mulf %152, %159 : vector<1x128xf32>
    %161 = arith.addf %158, %160 : vector<1x128xf32>
    %c7_i32 = arith.constant 7 : i32
    %162 = arith.index_cast %c7_i32 : i32 to index
    %c0_29 = arith.constant 0 : index
    %163 = vector.load %arg0[%162, %c0_29] : memref<10x768xf32, #tpu.memory_space<vmem>>, vector<1x384xf32>
    %cst_30 = arith.constant dense<0.000000e+00> : vector<1x384xf32>
    %164 = tpu.matmul %161, %0, %cst_30 {dimension_numbers = #tpu.dot_dimension_numbers<[1], [0], [0], [1], [0, 0, 1, 1], [], []>} : vector<1x128xf32>, vector<128x384xf32>, vector<1x384xf32> -> vector<1x384xf32>
    %165 = vector.extract_strided_slice %163 {offsets = [0, 0], sizes = [1, 256], strides = [1, 1]} : vector<1x384xf32> to vector<1x256xf32>
    %166 = vector.extract_strided_slice %164 {offsets = [0, 0], sizes = [1, 256], strides = [1, 1]} : vector<1x384xf32> to vector<1x256xf32>
    %167 = arith.addf %165, %166 : vector<1x256xf32>
    %168 = arith.negf %167 : vector<1x256xf32>
    %169 = math.exp %168 : vector<1x256xf32>
    %cst_31 = arith.constant 1.000000e+00 : f32
    %170 = vector.broadcast %cst_31 : f32 to vector<1x256xf32>
    %171 = arith.addf %170, %169 : vector<1x256xf32>
    %172 = arith.divf %170, %171 : vector<1x256xf32>
    %173 = vector.extract_strided_slice %172 {offsets = [0, 0], sizes = [1, 128], strides = [1, 1]} : vector<1x256xf32> to vector<1x128xf32>
    %174 = vector.extract_strided_slice %172 {offsets = [0, 128], sizes = [1, 128], strides = [1, 1]} : vector<1x256xf32> to vector<1x128xf32>
    %175 = vector.extract_strided_slice %163 {offsets = [0, 256], sizes = [1, 128], strides = [1, 1]} : vector<1x384xf32> to vector<1x128xf32>
    %176 = vector.extract_strided_slice %164 {offsets = [0, 256], sizes = [1, 128], strides = [1, 1]} : vector<1x384xf32> to vector<1x128xf32>
    %177 = arith.addf %176, %4 : vector<1x128xf32>
    %178 = arith.mulf %173, %177 : vector<1x128xf32>
    %179 = arith.addf %175, %178 : vector<1x128xf32>
    %180 = math.tanh %179 : vector<1x128xf32>
    %181 = arith.subf %161, %180 : vector<1x128xf32>
    %182 = arith.mulf %174, %181 : vector<1x128xf32>
    %183 = arith.addf %180, %182 : vector<1x128xf32>
    %c8_i32 = arith.constant 8 : i32
    %184 = arith.index_cast %c8_i32 : i32 to index
    %c0_32 = arith.constant 0 : index
    %185 = vector.load %arg0[%184, %c0_32] : memref<10x768xf32, #tpu.memory_space<vmem>>, vector<1x384xf32>
    %cst_33 = arith.constant dense<0.000000e+00> : vector<1x384xf32>
    %186 = tpu.matmul %183, %0, %cst_33 {dimension_numbers = #tpu.dot_dimension_numbers<[1], [0], [0], [1], [0, 0, 1, 1], [], []>} : vector<1x128xf32>, vector<128x384xf32>, vector<1x384xf32> -> vector<1x384xf32>
    %187 = vector.extract_strided_slice %185 {offsets = [0, 0], sizes = [1, 256], strides = [1, 1]} : vector<1x384xf32> to vector<1x256xf32>
    %188 = vector.extract_strided_slice %186 {offsets = [0, 0], sizes = [1, 256], strides = [1, 1]} : vector<1x384xf32> to vector<1x256xf32>
    %189 = arith.addf %187, %188 : vector<1x256xf32>
    %190 = arith.negf %189 : vector<1x256xf32>
    %191 = math.exp %190 : vector<1x256xf32>
    %cst_34 = arith.constant 1.000000e+00 : f32
    %192 = vector.broadcast %cst_34 : f32 to vector<1x256xf32>
    %193 = arith.addf %192, %191 : vector<1x256xf32>
    %194 = arith.divf %192, %193 : vector<1x256xf32>
    %195 = vector.extract_strided_slice %194 {offsets = [0, 0], sizes = [1, 128], strides = [1, 1]} : vector<1x256xf32> to vector<1x128xf32>
    %196 = vector.extract_strided_slice %194 {offsets = [0, 128], sizes = [1, 128], strides = [1, 1]} : vector<1x256xf32> to vector<1x128xf32>
    %197 = vector.extract_strided_slice %185 {offsets = [0, 256], sizes = [1, 128], strides = [1, 1]} : vector<1x384xf32> to vector<1x128xf32>
    %198 = vector.extract_strided_slice %186 {offsets = [0, 256], sizes = [1, 128], strides = [1, 1]} : vector<1x384xf32> to vector<1x128xf32>
    %199 = arith.addf %198, %4 : vector<1x128xf32>
    %200 = arith.mulf %195, %199 : vector<1x128xf32>
    %201 = arith.addf %197, %200 : vector<1x128xf32>
    %202 = math.tanh %201 : vector<1x128xf32>
    %203 = arith.subf %183, %202 : vector<1x128xf32>
    %204 = arith.mulf %196, %203 : vector<1x128xf32>
    %205 = arith.addf %202, %204 : vector<1x128xf32>
    %c9_i32 = arith.constant 9 : i32
    %206 = arith.index_cast %c9_i32 : i32 to index
    %c0_35 = arith.constant 0 : index
    %207 = vector.load %arg0[%206, %c0_35] : memref<10x768xf32, #tpu.memory_space<vmem>>, vector<1x384xf32>
    %cst_36 = arith.constant dense<0.000000e+00> : vector<1x384xf32>
    %208 = tpu.matmul %205, %0, %cst_36 {dimension_numbers = #tpu.dot_dimension_numbers<[1], [0], [0], [1], [0, 0, 1, 1], [], []>} : vector<1x128xf32>, vector<128x384xf32>, vector<1x384xf32> -> vector<1x384xf32>
    %209 = vector.extract_strided_slice %207 {offsets = [0, 0], sizes = [1, 256], strides = [1, 1]} : vector<1x384xf32> to vector<1x256xf32>
    %210 = vector.extract_strided_slice %208 {offsets = [0, 0], sizes = [1, 256], strides = [1, 1]} : vector<1x384xf32> to vector<1x256xf32>
    %211 = arith.addf %209, %210 : vector<1x256xf32>
    %212 = arith.negf %211 : vector<1x256xf32>
    %213 = math.exp %212 : vector<1x256xf32>
    %cst_37 = arith.constant 1.000000e+00 : f32
    %214 = vector.broadcast %cst_37 : f32 to vector<1x256xf32>
    %215 = arith.addf %214, %213 : vector<1x256xf32>
    %216 = arith.divf %214, %215 : vector<1x256xf32>
    %217 = vector.extract_strided_slice %216 {offsets = [0, 0], sizes = [1, 128], strides = [1, 1]} : vector<1x256xf32> to vector<1x128xf32>
    %218 = vector.extract_strided_slice %216 {offsets = [0, 128], sizes = [1, 128], strides = [1, 1]} : vector<1x256xf32> to vector<1x128xf32>
    %219 = vector.extract_strided_slice %207 {offsets = [0, 256], sizes = [1, 128], strides = [1, 1]} : vector<1x384xf32> to vector<1x128xf32>
    %220 = vector.extract_strided_slice %208 {offsets = [0, 256], sizes = [1, 128], strides = [1, 1]} : vector<1x384xf32> to vector<1x128xf32>
    %221 = arith.addf %220, %4 : vector<1x128xf32>
    %222 = arith.mulf %217, %221 : vector<1x128xf32>
    %223 = arith.addf %219, %222 : vector<1x128xf32>
    %224 = math.tanh %223 : vector<1x128xf32>
    %225 = arith.subf %205, %224 : vector<1x128xf32>
    %226 = arith.mulf %218, %225 : vector<1x128xf32>
    %227 = arith.addf %224, %226 : vector<1x128xf32>
    %c10_i32 = arith.constant 10 : i32
    %cst_38 = arith.constant dense<0.000000e+00> : vector<1x384xf32>
    %228 = tpu.matmul %227, %1, %cst_38 {dimension_numbers = #tpu.dot_dimension_numbers<[1], [0], [0], [1], [0, 0, 1, 1], [], []>} : vector<1x128xf32>, vector<128x384xf32>, vector<1x384xf32> -> vector<1x384xf32>
    %c0_39 = arith.constant 0 : index
    %c384_40 = arith.constant 384 : index
    %229 = vector.load %arg0[%c0_39, %c384_40] : memref<10x768xf32, #tpu.memory_space<vmem>>, vector<10x384xf32>
    %230 = vector.broadcast %228 : vector<1x384xf32> to vector<10x384xf32>
    %231 = arith.addf %229, %230 : vector<10x384xf32>
    %c0_41 = arith.constant 0 : index
    %c0_42 = arith.constant 0 : index
    %232 = vector.load %arg4[%c0_41, %c0_42] : memref<10x384xf32, #tpu.memory_space<vmem>>, vector<10x384xf32>
    tpu.vector_store %arg4[%c0_41, %c0_42], %231 {strides = array<i32>} : memref<10x384xf32, #tpu.memory_space<vmem>>, vector<10x384xf32>,
    %cst_43 = arith.constant 0.000000e+00 : f32
    %233 = vector.broadcast %cst_43 : f32 to vector<1x128xf32>
    %c0_44 = arith.constant 0 : index
    %c0_45 = arith.constant 0 : index
    %234 = vector.load %arg5[%c0_44, %c0_45] : memref<10x128xf32, #tpu.memory_space<vmem>>, vector<1x128xf32>
    tpu.vector_store %arg5[%c0_44, %c0_45], %233 {strides = array<i32>} : memref<10x128xf32, #tpu.memory_space<vmem>>, vector<1x128xf32>,
    %c1_i32_46 = arith.constant 1 : i32
    %235 = arith.index_cast %c1_i32_46 : i32 to index
    %c0_47 = arith.constant 0 : index
    %236 = vector.load %arg4[%235, %c0_47] : memref<10x384xf32, #tpu.memory_space<vmem>>, vector<1x384xf32>
    %cst_48 = arith.constant dense<0.000000e+00> : vector<1x384xf32>
    %237 = tpu.matmul %227, %2, %cst_48 {dimension_numbers = #tpu.dot_dimension_numbers<[1], [0], [0], [1], [0, 0, 1, 1], [], []>} : vector<1x128xf32>, vector<128x384xf32>, vector<1x384xf32> -> vector<1x384xf32>
    %238 = vector.extract_strided_slice %236 {offsets = [0, 0], sizes = [1, 256], strides = [1, 1]} : vector<1x384xf32> to vector<1x256xf32>
    %239 = vector.extract_strided_slice %237 {offsets = [0, 0], sizes = [1, 256], strides = [1, 1]} : vector<1x384xf32> to vector<1x256xf32>
    %240 = arith.addf %238, %239 : vector<1x256xf32>
    %241 = arith.negf %240 : vector<1x256xf32>
    %242 = math.exp %241 : vector<1x256xf32>
    %cst_49 = arith.constant 1.000000e+00 : f32
    %243 = vector.broadcast %cst_49 : f32 to vector<1x256xf32>
    %244 = arith.addf %243, %242 : vector<1x256xf32>
    %245 = arith.divf %243, %244 : vector<1x256xf32>
    %246 = vector.extract_strided_slice %245 {offsets = [0, 0], sizes = [1, 128], strides = [1, 1]} : vector<1x256xf32> to vector<1x128xf32>
    %247 = vector.extract_strided_slice %245 {offsets = [0, 128], sizes = [1, 128], strides = [1, 1]} : vector<1x256xf32> to vector<1x128xf32>
    %248 = vector.extract_strided_slice %236 {offsets = [0, 256], sizes = [1, 128], strides = [1, 1]} : vector<1x384xf32> to vector<1x128xf32>
    %249 = vector.extract_strided_slice %237 {offsets = [0, 256], sizes = [1, 128], strides = [1, 1]} : vector<1x384xf32> to vector<1x128xf32>
    %250 = arith.addf %249, %5 : vector<1x128xf32>
    %251 = arith.mulf %246, %250 : vector<1x128xf32>
    %252 = arith.addf %248, %251 : vector<1x128xf32>
    %253 = math.tanh %252 : vector<1x128xf32>
    %254 = arith.subf %227, %253 : vector<1x128xf32>
    %255 = arith.mulf %247, %254 : vector<1x128xf32>
    %256 = arith.addf %253, %255 : vector<1x128xf32>
    %257 = arith.index_cast %c1_i32_46 : i32 to index
    %c0_50 = arith.constant 0 : index
    %258 = vector.load %arg5[%257, %c0_50] : memref<10x128xf32, #tpu.memory_space<vmem>>, vector<1x128xf32>
    tpu.vector_store %arg5[%257, %c0_50], %256 {strides = array<i32>} : memref<10x128xf32, #tpu.memory_space<vmem>>, vector<1x128xf32>,
    %c2_i32_51 = arith.constant 2 : i32
    %259 = arith.index_cast %c2_i32_51 : i32 to index
    %c0_52 = arith.constant 0 : index
    %260 = vector.load %arg4[%259, %c0_52] : memref<10x384xf32, #tpu.memory_space<vmem>>, vector<1x384xf32>
    %cst_53 = arith.constant dense<0.000000e+00> : vector<1x384xf32>
    %261 = tpu.matmul %256, %2, %cst_53 {dimension_numbers = #tpu.dot_dimension_numbers<[1], [0], [0], [1], [0, 0, 1, 1], [], []>} : vector<1x128xf32>, vector<128x384xf32>, vector<1x384xf32> -> vector<1x384xf32>
    %262 = vector.extract_strided_slice %260 {offsets = [0, 0], sizes = [1, 256], strides = [1, 1]} : vector<1x384xf32> to vector<1x256xf32>
    %263 = vector.extract_strided_slice %261 {offsets = [0, 0], sizes = [1, 256], strides = [1, 1]} : vector<1x384xf32> to vector<1x256xf32>
    %264 = arith.addf %262, %263 : vector<1x256xf32>
    %265 = arith.negf %264 : vector<1x256xf32>
    %266 = math.exp %265 : vector<1x256xf32>
    %cst_54 = arith.constant 1.000000e+00 : f32
    %267 = vector.broadcast %cst_54 : f32 to vector<1x256xf32>
    %268 = arith.addf %267, %266 : vector<1x256xf32>
    %269 = arith.divf %267, %268 : vector<1x256xf32>
    %270 = vector.extract_strided_slice %269 {offsets = [0, 0], sizes = [1, 128], strides = [1, 1]} : vector<1x256xf32> to vector<1x128xf32>
    %271 = vector.extract_strided_slice %269 {offsets = [0, 128], sizes = [1, 128], strides = [1, 1]} : vector<1x256xf32> to vector<1x128xf32>
    %272 = vector.extract_strided_slice %260 {offsets = [0, 256], sizes = [1, 128], strides = [1, 1]} : vector<1x384xf32> to vector<1x128xf32>
    %273 = vector.extract_strided_slice %261 {offsets = [0, 256], sizes = [1, 128], strides = [1, 1]} : vector<1x384xf32> to vector<1x128xf32>
    %274 = arith.addf %273, %5 : vector<1x128xf32>
    %275 = arith.mulf %270, %274 : vector<1x128xf32>
    %276 = arith.addf %272, %275 : vector<1x128xf32>
    %277 = math.tanh %276 : vector<1x128xf32>
    %278 = arith.subf %256, %277 : vector<1x128xf32>
    %279 = arith.mulf %271, %278 : vector<1x128xf32>
    %280 = arith.addf %277, %279 : vector<1x128xf32>
    %281 = arith.index_cast %c2_i32_51 : i32 to index
    %c0_55 = arith.constant 0 : index
    %282 = vector.load %arg5[%281, %c0_55] : memref<10x128xf32, #tpu.memory_space<vmem>>, vector<1x128xf32>
    tpu.vector_store %arg5[%281, %c0_55], %280 {strides = array<i32>} : memref<10x128xf32, #tpu.memory_space<vmem>>, vector<1x128xf32>,
    %c3_i32_56 = arith.constant 3 : i32
    %283 = arith.index_cast %c3_i32_56 : i32 to index
    %c0_57 = arith.constant 0 : index
    %284 = vector.load %arg4[%283, %c0_57] : memref<10x384xf32, #tpu.memory_space<vmem>>, vector<1x384xf32>
    %cst_58 = arith.constant dense<0.000000e+00> : vector<1x384xf32>
    %285 = tpu.matmul %280, %2, %cst_58 {dimension_numbers = #tpu.dot_dimension_numbers<[1], [0], [0], [1], [0, 0, 1, 1], [], []>} : vector<1x128xf32>, vector<128x384xf32>, vector<1x384xf32> -> vector<1x384xf32>
    %286 = vector.extract_strided_slice %284 {offsets = [0, 0], sizes = [1, 256], strides = [1, 1]} : vector<1x384xf32> to vector<1x256xf32>
    %287 = vector.extract_strided_slice %285 {offsets = [0, 0], sizes = [1, 256], strides = [1, 1]} : vector<1x384xf32> to vector<1x256xf32>
    %288 = arith.addf %286, %287 : vector<1x256xf32>
    %289 = arith.negf %288 : vector<1x256xf32>
    %290 = math.exp %289 : vector<1x256xf32>
    %cst_59 = arith.constant 1.000000e+00 : f32
    %291 = vector.broadcast %cst_59 : f32 to vector<1x256xf32>
    %292 = arith.addf %291, %290 : vector<1x256xf32>
    %293 = arith.divf %291, %292 : vector<1x256xf32>
    %294 = vector.extract_strided_slice %293 {offsets = [0, 0], sizes = [1, 128], strides = [1, 1]} : vector<1x256xf32> to vector<1x128xf32>
    %295 = vector.extract_strided_slice %293 {offsets = [0, 128], sizes = [1, 128], strides = [1, 1]} : vector<1x256xf32> to vector<1x128xf32>
    %296 = vector.extract_strided_slice %284 {offsets = [0, 256], sizes = [1, 128], strides = [1, 1]} : vector<1x384xf32> to vector<1x128xf32>
    %297 = vector.extract_strided_slice %285 {offsets = [0, 256], sizes = [1, 128], strides = [1, 1]} : vector<1x384xf32> to vector<1x128xf32>
    %298 = arith.addf %297, %5 : vector<1x128xf32>
    %299 = arith.mulf %294, %298 : vector<1x128xf32>
    %300 = arith.addf %296, %299 : vector<1x128xf32>
    %301 = math.tanh %300 : vector<1x128xf32>
    %302 = arith.subf %280, %301 : vector<1x128xf32>
    %303 = arith.mulf %295, %302 : vector<1x128xf32>
    %304 = arith.addf %301, %303 : vector<1x128xf32>
    %305 = arith.index_cast %c3_i32_56 : i32 to index
    %c0_60 = arith.constant 0 : index
    %306 = vector.load %arg5[%305, %c0_60] : memref<10x128xf32, #tpu.memory_space<vmem>>, vector<1x128xf32>
    tpu.vector_store %arg5[%305, %c0_60], %304 {strides = array<i32>} : memref<10x128xf32, #tpu.memory_space<vmem>>, vector<1x128xf32>,
    %c4_i32_61 = arith.constant 4 : i32
    %307 = arith.index_cast %c4_i32_61 : i32 to index
    %c0_62 = arith.constant 0 : index
    %308 = vector.load %arg4[%307, %c0_62] : memref<10x384xf32, #tpu.memory_space<vmem>>, vector<1x384xf32>
    %cst_63 = arith.constant dense<0.000000e+00> : vector<1x384xf32>
    %309 = tpu.matmul %304, %2, %cst_63 {dimension_numbers = #tpu.dot_dimension_numbers<[1], [0], [0], [1], [0, 0, 1, 1], [], []>} : vector<1x128xf32>, vector<128x384xf32>, vector<1x384xf32> -> vector<1x384xf32>
    %310 = vector.extract_strided_slice %308 {offsets = [0, 0], sizes = [1, 256], strides = [1, 1]} : vector<1x384xf32> to vector<1x256xf32>
    %311 = vector.extract_strided_slice %309 {offsets = [0, 0], sizes = [1, 256], strides = [1, 1]} : vector<1x384xf32> to vector<1x256xf32>
    %312 = arith.addf %310, %311 : vector<1x256xf32>
    %313 = arith.negf %312 : vector<1x256xf32>
    %314 = math.exp %313 : vector<1x256xf32>
    %cst_64 = arith.constant 1.000000e+00 : f32
    %315 = vector.broadcast %cst_64 : f32 to vector<1x256xf32>
    %316 = arith.addf %315, %314 : vector<1x256xf32>
    %317 = arith.divf %315, %316 : vector<1x256xf32>
    %318 = vector.extract_strided_slice %317 {offsets = [0, 0], sizes = [1, 128], strides = [1, 1]} : vector<1x256xf32> to vector<1x128xf32>
    %319 = vector.extract_strided_slice %317 {offsets = [0, 128], sizes = [1, 128], strides = [1, 1]} : vector<1x256xf32> to vector<1x128xf32>
    %320 = vector.extract_strided_slice %308 {offsets = [0, 256], sizes = [1, 128], strides = [1, 1]} : vector<1x384xf32> to vector<1x128xf32>
    %321 = vector.extract_strided_slice %309 {offsets = [0, 256], sizes = [1, 128], strides = [1, 1]} : vector<1x384xf32> to vector<1x128xf32>
    %322 = arith.addf %321, %5 : vector<1x128xf32>
    %323 = arith.mulf %318, %322 : vector<1x128xf32>
    %324 = arith.addf %320, %323 : vector<1x128xf32>
    %325 = math.tanh %324 : vector<1x128xf32>
    %326 = arith.subf %304, %325 : vector<1x128xf32>
    %327 = arith.mulf %319, %326 : vector<1x128xf32>
    %328 = arith.addf %325, %327 : vector<1x128xf32>
    %329 = arith.index_cast %c4_i32_61 : i32 to index
    %c0_65 = arith.constant 0 : index
    %330 = vector.load %arg5[%329, %c0_65] : memref<10x128xf32, #tpu.memory_space<vmem>>, vector<1x128xf32>
    tpu.vector_store %arg5[%329, %c0_65], %328 {strides = array<i32>} : memref<10x128xf32, #tpu.memory_space<vmem>>, vector<1x128xf32>,
    %c5_i32_66 = arith.constant 5 : i32
    %331 = arith.index_cast %c5_i32_66 : i32 to index
    %c0_67 = arith.constant 0 : index
    %332 = vector.load %arg4[%331, %c0_67] : memref<10x384xf32, #tpu.memory_space<vmem>>, vector<1x384xf32>
    %cst_68 = arith.constant dense<0.000000e+00> : vector<1x384xf32>
    %333 = tpu.matmul %328, %2, %cst_68 {dimension_numbers = #tpu.dot_dimension_numbers<[1], [0], [0], [1], [0, 0, 1, 1], [], []>} : vector<1x128xf32>, vector<128x384xf32>, vector<1x384xf32> -> vector<1x384xf32>
    %334 = vector.extract_strided_slice %332 {offsets = [0, 0], sizes = [1, 256], strides = [1, 1]} : vector<1x384xf32> to vector<1x256xf32>
    %335 = vector.extract_strided_slice %333 {offsets = [0, 0], sizes = [1, 256], strides = [1, 1]} : vector<1x384xf32> to vector<1x256xf32>
    %336 = arith.addf %334, %335 : vector<1x256xf32>
    %337 = arith.negf %336 : vector<1x256xf32>
    %338 = math.exp %337 : vector<1x256xf32>
    %cst_69 = arith.constant 1.000000e+00 : f32
    %339 = vector.broadcast %cst_69 : f32 to vector<1x256xf32>
    %340 = arith.addf %339, %338 : vector<1x256xf32>
    %341 = arith.divf %339, %340 : vector<1x256xf32>
    %342 = vector.extract_strided_slice %341 {offsets = [0, 0], sizes = [1, 128], strides = [1, 1]} : vector<1x256xf32> to vector<1x128xf32>
    %343 = vector.extract_strided_slice %341 {offsets = [0, 128], sizes = [1, 128], strides = [1, 1]} : vector<1x256xf32> to vector<1x128xf32>
    %344 = vector.extract_strided_slice %332 {offsets = [0, 256], sizes = [1, 128], strides = [1, 1]} : vector<1x384xf32> to vector<1x128xf32>
    %345 = vector.extract_strided_slice %333 {offsets = [0, 256], sizes = [1, 128], strides = [1, 1]} : vector<1x384xf32> to vector<1x128xf32>
    %346 = arith.addf %345, %5 : vector<1x128xf32>
    %347 = arith.mulf %342, %346 : vector<1x128xf32>
    %348 = arith.addf %344, %347 : vector<1x128xf32>
    %349 = math.tanh %348 : vector<1x128xf32>
    %350 = arith.subf %328, %349 : vector<1x128xf32>
    %351 = arith.mulf %343, %350 : vector<1x128xf32>
    %352 = arith.addf %349, %351 : vector<1x128xf32>
    %353 = arith.index_cast %c5_i32_66 : i32 to index
    %c0_70 = arith.constant 0 : index
    %354 = vector.load %arg5[%353, %c0_70] : memref<10x128xf32, #tpu.memory_space<vmem>>, vector<1x128xf32>
    tpu.vector_store %arg5[%353, %c0_70], %352 {strides = array<i32>} : memref<10x128xf32, #tpu.memory_space<vmem>>, vector<1x128xf32>,
    %c6_i32_71 = arith.constant 6 : i32
    %355 = arith.index_cast %c6_i32_71 : i32 to index
    %c0_72 = arith.constant 0 : index
    %356 = vector.load %arg4[%355, %c0_72] : memref<10x384xf32, #tpu.memory_space<vmem>>, vector<1x384xf32>
    %cst_73 = arith.constant dense<0.000000e+00> : vector<1x384xf32>
    %357 = tpu.matmul %352, %2, %cst_73 {dimension_numbers = #tpu.dot_dimension_numbers<[1], [0], [0], [1], [0, 0, 1, 1], [], []>} : vector<1x128xf32>, vector<128x384xf32>, vector<1x384xf32> -> vector<1x384xf32>
    %358 = vector.extract_strided_slice %356 {offsets = [0, 0], sizes = [1, 256], strides = [1, 1]} : vector<1x384xf32> to vector<1x256xf32>
    %359 = vector.extract_strided_slice %357 {offsets = [0, 0], sizes = [1, 256], strides = [1, 1]} : vector<1x384xf32> to vector<1x256xf32>
    %360 = arith.addf %358, %359 : vector<1x256xf32>
    %361 = arith.negf %360 : vector<1x256xf32>
    %362 = math.exp %361 : vector<1x256xf32>
    %cst_74 = arith.constant 1.000000e+00 : f32
    %363 = vector.broadcast %cst_74 : f32 to vector<1x256xf32>
    %364 = arith.addf %363, %362 : vector<1x256xf32>
    %365 = arith.divf %363, %364 : vector<1x256xf32>
    %366 = vector.extract_strided_slice %365 {offsets = [0, 0], sizes = [1, 128], strides = [1, 1]} : vector<1x256xf32> to vector<1x128xf32>
    %367 = vector.extract_strided_slice %365 {offsets = [0, 128], sizes = [1, 128], strides = [1, 1]} : vector<1x256xf32> to vector<1x128xf32>
    %368 = vector.extract_strided_slice %356 {offsets = [0, 256], sizes = [1, 128], strides = [1, 1]} : vector<1x384xf32> to vector<1x128xf32>
    %369 = vector.extract_strided_slice %357 {offsets = [0, 256], sizes = [1, 128], strides = [1, 1]} : vector<1x384xf32> to vector<1x128xf32>
    %370 = arith.addf %369, %5 : vector<1x128xf32>
    %371 = arith.mulf %366, %370 : vector<1x128xf32>
    %372 = arith.addf %368, %371 : vector<1x128xf32>
    %373 = math.tanh %372 : vector<1x128xf32>
    %374 = arith.subf %352, %373 : vector<1x128xf32>
    %375 = arith.mulf %367, %374 : vector<1x128xf32>
    %376 = arith.addf %373, %375 : vector<1x128xf32>
    %377 = arith.index_cast %c6_i32_71 : i32 to index
    %c0_75 = arith.constant 0 : index
    %378 = vector.load %arg5[%377, %c0_75] : memref<10x128xf32, #tpu.memory_space<vmem>>, vector<1x128xf32>
    tpu.vector_store %arg5[%377, %c0_75], %376 {strides = array<i32>} : memref<10x128xf32, #tpu.memory_space<vmem>>, vector<1x128xf32>,
    %c7_i32_76 = arith.constant 7 : i32
    %379 = arith.index_cast %c7_i32_76 : i32 to index
    %c0_77 = arith.constant 0 : index
    %380 = vector.load %arg4[%379, %c0_77] : memref<10x384xf32, #tpu.memory_space<vmem>>, vector<1x384xf32>
    %cst_78 = arith.constant dense<0.000000e+00> : vector<1x384xf32>
    %381 = tpu.matmul %376, %2, %cst_78 {dimension_numbers = #tpu.dot_dimension_numbers<[1], [0], [0], [1], [0, 0, 1, 1], [], []>} : vector<1x128xf32>, vector<128x384xf32>, vector<1x384xf32> -> vector<1x384xf32>
    %382 = vector.extract_strided_slice %380 {offsets = [0, 0], sizes = [1, 256], strides = [1, 1]} : vector<1x384xf32> to vector<1x256xf32>
    %383 = vector.extract_strided_slice %381 {offsets = [0, 0], sizes = [1, 256], strides = [1, 1]} : vector<1x384xf32> to vector<1x256xf32>
    %384 = arith.addf %382, %383 : vector<1x256xf32>
    %385 = arith.negf %384 : vector<1x256xf32>
    %386 = math.exp %385 : vector<1x256xf32>
    %cst_79 = arith.constant 1.000000e+00 : f32
    %387 = vector.broadcast %cst_79 : f32 to vector<1x256xf32>
    %388 = arith.addf %387, %386 : vector<1x256xf32>
    %389 = arith.divf %387, %388 : vector<1x256xf32>
    %390 = vector.extract_strided_slice %389 {offsets = [0, 0], sizes = [1, 128], strides = [1, 1]} : vector<1x256xf32> to vector<1x128xf32>
    %391 = vector.extract_strided_slice %389 {offsets = [0, 128], sizes = [1, 128], strides = [1, 1]} : vector<1x256xf32> to vector<1x128xf32>
    %392 = vector.extract_strided_slice %380 {offsets = [0, 256], sizes = [1, 128], strides = [1, 1]} : vector<1x384xf32> to vector<1x128xf32>
    %393 = vector.extract_strided_slice %381 {offsets = [0, 256], sizes = [1, 128], strides = [1, 1]} : vector<1x384xf32> to vector<1x128xf32>
    %394 = arith.addf %393, %5 : vector<1x128xf32>
    %395 = arith.mulf %390, %394 : vector<1x128xf32>
    %396 = arith.addf %392, %395 : vector<1x128xf32>
    %397 = math.tanh %396 : vector<1x128xf32>
    %398 = arith.subf %376, %397 : vector<1x128xf32>
    %399 = arith.mulf %391, %398 : vector<1x128xf32>
    %400 = arith.addf %397, %399 : vector<1x128xf32>
    %401 = arith.index_cast %c7_i32_76 : i32 to index
    %c0_80 = arith.constant 0 : index
    %402 = vector.load %arg5[%401, %c0_80] : memref<10x128xf32, #tpu.memory_space<vmem>>, vector<1x128xf32>
    tpu.vector_store %arg5[%401, %c0_80], %400 {strides = array<i32>} : memref<10x128xf32, #tpu.memory_space<vmem>>, vector<1x128xf32>,
    %c8_i32_81 = arith.constant 8 : i32
    %403 = arith.index_cast %c8_i32_81 : i32 to index
    %c0_82 = arith.constant 0 : index
    %404 = vector.load %arg4[%403, %c0_82] : memref<10x384xf32, #tpu.memory_space<vmem>>, vector<1x384xf32>
    %cst_83 = arith.constant dense<0.000000e+00> : vector<1x384xf32>
    %405 = tpu.matmul %400, %2, %cst_83 {dimension_numbers = #tpu.dot_dimension_numbers<[1], [0], [0], [1], [0, 0, 1, 1], [], []>} : vector<1x128xf32>, vector<128x384xf32>, vector<1x384xf32> -> vector<1x384xf32>
    %406 = vector.extract_strided_slice %404 {offsets = [0, 0], sizes = [1, 256], strides = [1, 1]} : vector<1x384xf32> to vector<1x256xf32>
    %407 = vector.extract_strided_slice %405 {offsets = [0, 0], sizes = [1, 256], strides = [1, 1]} : vector<1x384xf32> to vector<1x256xf32>
    %408 = arith.addf %406, %407 : vector<1x256xf32>
    %409 = arith.negf %408 : vector<1x256xf32>
    %410 = math.exp %409 : vector<1x256xf32>
    %cst_84 = arith.constant 1.000000e+00 : f32
    %411 = vector.broadcast %cst_84 : f32 to vector<1x256xf32>
    %412 = arith.addf %411, %410 : vector<1x256xf32>
    %413 = arith.divf %411, %412 : vector<1x256xf32>
    %414 = vector.extract_strided_slice %413 {offsets = [0, 0], sizes = [1, 128], strides = [1, 1]} : vector<1x256xf32> to vector<1x128xf32>
    %415 = vector.extract_strided_slice %413 {offsets = [0, 128], sizes = [1, 128], strides = [1, 1]} : vector<1x256xf32> to vector<1x128xf32>
    %416 = vector.extract_strided_slice %404 {offsets = [0, 256], sizes = [1, 128], strides = [1, 1]} : vector<1x384xf32> to vector<1x128xf32>
    %417 = vector.extract_strided_slice %405 {offsets = [0, 256], sizes = [1, 128], strides = [1, 1]} : vector<1x384xf32> to vector<1x128xf32>
    %418 = arith.addf %417, %5 : vector<1x128xf32>
    %419 = arith.mulf %414, %418 : vector<1x128xf32>
    %420 = arith.addf %416, %419 : vector<1x128xf32>
    %421 = math.tanh %420 : vector<1x128xf32>
    %422 = arith.subf %400, %421 : vector<1x128xf32>
    %423 = arith.mulf %415, %422 : vector<1x128xf32>
    %424 = arith.addf %421, %423 : vector<1x128xf32>
    %425 = arith.index_cast %c8_i32_81 : i32 to index
    %c0_85 = arith.constant 0 : index
    %426 = vector.load %arg5[%425, %c0_85] : memref<10x128xf32, #tpu.memory_space<vmem>>, vector<1x128xf32>
    tpu.vector_store %arg5[%425, %c0_85], %424 {strides = array<i32>} : memref<10x128xf32, #tpu.memory_space<vmem>>, vector<1x128xf32>,
    %c9_i32_86 = arith.constant 9 : i32
    %427 = arith.index_cast %c9_i32_86 : i32 to index
    %c0_87 = arith.constant 0 : index
    %428 = vector.load %arg4[%427, %c0_87] : memref<10x384xf32, #tpu.memory_space<vmem>>, vector<1x384xf32>
    %cst_88 = arith.constant dense<0.000000e+00> : vector<1x384xf32>
    %429 = tpu.matmul %424, %2, %cst_88 {dimension_numbers = #tpu.dot_dimension_numbers<[1], [0], [0], [1], [0, 0, 1, 1], [], []>} : vector<1x128xf32>, vector<128x384xf32>, vector<1x384xf32> -> vector<1x384xf32>
    %430 = vector.extract_strided_slice %428 {offsets = [0, 0], sizes = [1, 256], strides = [1, 1]} : vector<1x384xf32> to vector<1x256xf32>
    %431 = vector.extract_strided_slice %429 {offsets = [0, 0], sizes = [1, 256], strides = [1, 1]} : vector<1x384xf32> to vector<1x256xf32>
    %432 = arith.addf %430, %431 : vector<1x256xf32>
    %433 = arith.negf %432 : vector<1x256xf32>
    %434 = math.exp %433 : vector<1x256xf32>
    %cst_89 = arith.constant 1.000000e+00 : f32
    %435 = vector.broadcast %cst_89 : f32 to vector<1x256xf32>
    %436 = arith.addf %435, %434 : vector<1x256xf32>
    %437 = arith.divf %435, %436 : vector<1x256xf32>
    %438 = vector.extract_strided_slice %437 {offsets = [0, 0], sizes = [1, 128], strides = [1, 1]} : vector<1x256xf32> to vector<1x128xf32>
    %439 = vector.extract_strided_slice %437 {offsets = [0, 128], sizes = [1, 128], strides = [1, 1]} : vector<1x256xf32> to vector<1x128xf32>
    %440 = vector.extract_strided_slice %428 {offsets = [0, 256], sizes = [1, 128], strides = [1, 1]} : vector<1x384xf32> to vector<1x128xf32>
    %441 = vector.extract_strided_slice %429 {offsets = [0, 256], sizes = [1, 128], strides = [1, 1]} : vector<1x384xf32> to vector<1x128xf32>
    %442 = arith.addf %441, %5 : vector<1x128xf32>
    %443 = arith.mulf %438, %442 : vector<1x128xf32>
    %444 = arith.addf %440, %443 : vector<1x128xf32>
    %445 = math.tanh %444 : vector<1x128xf32>
    %446 = arith.subf %424, %445 : vector<1x128xf32>
    %447 = arith.mulf %439, %446 : vector<1x128xf32>
    %448 = arith.addf %445, %447 : vector<1x128xf32>
    %449 = arith.index_cast %c9_i32_86 : i32 to index
    %c0_90 = arith.constant 0 : index
    %450 = vector.load %arg5[%449, %c0_90] : memref<10x128xf32, #tpu.memory_space<vmem>>, vector<1x128xf32>
    tpu.vector_store %arg5[%449, %c0_90], %448 {strides = array<i32>} : memref<10x128xf32, #tpu.memory_space<vmem>>, vector<1x128xf32>,
    %c9_i32_91 = arith.constant 9 : i32
    %c0_92 = arith.constant 0 : index
    %c0_93 = arith.constant 0 : index
    %451 = vector.load %arg5[%c0_92, %c0_93] : memref<10x128xf32, #tpu.memory_space<vmem>>, vector<10x128xf32>
    %cst_94 = arith.constant dense<0.000000e+00> : vector<10x128xf32>
    %452 = tpu.matmul %451, %3, %cst_94 {dimension_numbers = #tpu.dot_dimension_numbers<[1], [0], [0], [1], [0, 0, 1, 1], [], []>} : vector<10x128xf32>, vector<128x128xf32>, vector<10x128xf32> -> vector<10x128xf32>
    %453 = vector.broadcast %6 : vector<1x128xf32> to vector<10x128xf32>
    %454 = arith.addf %452, %453 : vector<10x128xf32>
    %455 = tpu.iota {dimensions = array<i32: 0>} : vector<10x128xi32>
    %c0_i32_95 = arith.constant 0 : i32
    %456 = vector.broadcast %c0_i32_95 : i32 to vector<10x128xi32>
    %457 = arith.cmpi eq, %455, %456 : vector<10x128xi32>
    %cst_96 = arith.constant 0.000000e+00 : f32
    %458 = vector.broadcast %cst_96 : f32 to vector<10x128xf32>
    %459 = arith.select %457, %458, %454 : vector<10x128xi1>, vector<10x128xf32>
    %c0_97 = arith.constant 0 : index
    %c0_98 = arith.constant 0 : index
    %460 = vector.load %arg3[%c0_97, %c0_98] : memref<10x128xf32, #tpu.memory_space<vmem>>, vector<10x128xf32>
    tpu.vector_store %arg3[%c0_97, %c0_98], %459 {strides = array<i32>} : memref<10x128xf32, #tpu.memory_space<vmem>>, vector<10x128xf32>,
    return
  }
}

</mosaic_0001>

<bundles_post_ra>
// kernel: controller_forward.1
= control target key start
LH: loop header
LB: loop body
LE: loop exit
PB: predicated region body
PF: predicated region fallthrough
CT: control target
= control target key end

     0   :  { %8 = vsyncpa [#allocation5], 0  ;;  %s6325_s12 = smov [#allocation4]   ;;  %s7290_s0 = inlined_call_operand.vmem [shape: f32[10,768], index: 0, kind: input, shape index: {}]   ;;  %s7291_s1 = inlined_call_operand.hbm [shape: f32[128,1280], index: 1, kind: input, shape index: {}]   ;;  %s7292_s2 = inlined_call_operand.vmem [shape: f32[3,128], index: 2, kind: input, shape index: {}]   ;;  %s7293_s3 = inlined_call_operand.vmem [shape: f32[10,128], index: 3, kind: output, shape index: {}]  }
   0x1   :  { %s16_s13 = sshll.u32 %s6325_s12, 4  ;;  %s6301_s16 = scalar_lea.hbm %s7291_s1, 20480  ;;  %s17_s13 = int_to_ptr.vmem [resolvable:$true] %s16_s13 }
   0x2   :  { %p6302_p0 = scmp.ne.s32.totalorder %s7291_s1, %s6301_s16  ;;  %p6305_p1 = scmp.lt.u32.totalorder %s6301_s16, %s7291_s1 }
   0x4   :  { %p6307_p2 = pnand %p6305_p1, %p6302_p0 }
   0x6   :  { %6310 = shalt.err (!%p6307_p2)
}
   0x7   :  { %s6311_s21 = scalar_lea.vmem %s17_s13, 20480  ;;  %p6316_p4 = scmp.lt.s32.totalorder %s17_s13, %s17_s13 }
   0x8   :  { %p6312_p3 = scmp.ne.s32.totalorder %s17_s13, %s6311_s21  ;;  %p6317_p5 = scmp.lt.s32.totalorder %s6311_s21, %s6311_s21 }
   0xa   :  { %p6318_p6 = por %p6317_p5, %p6316_p4 }
   0xc   :  { %p6319_p7 = pnand %p6318_p6, %p6312_p3 }
   0xe   :  { %6322 = shalt.err (!%p6319_p7)
}
   0xf   :  { %s6326_s22 = smov 1280   ;;  %s6327_s23 = smov 80  }
  0x10   :  { %22 = dma.hbm_to_vmem [thread:$0]  %s7291_s1, 20480, %s17_s13, [#allocation5], %s6326_s22, %s6326_s22, %s6327_s23  }
  0x11   :  { %6323 = dma.done.wait [#allocation5], 20480  }
  0x12   :  { %6324 = vsyncadd [#allocation5], 4294946816  ;;  %v6328_v0 = vmov 0.0   ;;  %v6329_v1 = vmov 0.0|0.0   ;;  %vm6330_vm0 = vmmov 0   ;;  %v29_v2 = vld [vmem:[#allocation4 + $0x8] sm:$0xff] }
  0x13   :  { %256 = vmatprep.mubr.f32.mxu0 %v6328_v0  ;;  %2171 = vst [vmem:[#allocation3] sm:$0x1] %v6328_v0  ;;  %5059 = vmatprep.subr.bf16.mxu1 %v6329_v1  ;;  %v32_v3 = vld [vmem:[#allocation4 + $0x58] sm:$0xff]  ;;  %v28_v4 = vld [vmem:[#allocation4] sm:$0xff]  ;;  %v31_v6 = vld [vmem:[#allocation4 + $0x50] sm:$0xff] }
  0x14   :  { %4324 = vmatprep.mubr.msk.f32.mxu1 %vm6330_vm0, %v6328_v0  ;;  %v6369_v5 = vpack.c.bf16 %v32_v3, %v29_v2  ;;  %v35_v7 = vld [vmem:[#allocation4 + $0xa8] sm:$0xff]  ;;  %v38_v8 = vld [vmem:[#allocation4 + $0xf8] sm:$0xff]  ;;  %v6371_v9 = vpack.c.bf16 %v31_v6, %v28_v4  ;;  %v34_v11 = vld [vmem:[#allocation4 + $0xa0] sm:$0xff] }
  0x15   :  { %v6373_v10 = vpack.c.bf16 %v38_v8, %v35_v7  ;;  %v37_v12 = vld [vmem:[#allocation4 + $0xf0] sm:$0xff]  ;;  %v41_v13 = vld [vmem:[#allocation4 + $0x148] sm:$0xff]  ;;  %v44_v14 = vld [vmem:[#allocation4 + $0x198] sm:$0xff] }
  0x16   :  { %5028 = vmatprep.subr.bf16.mxu0 %v6369_v5  ;;  %v6377_v15 = vpack.c.bf16 %v37_v12, %v34_v11  ;;  %v6380_v16 = vpack.c.bf16 %v44_v14, %v41_v13  ;;  %v40_v17 = vld [vmem:[#allocation4 + $0x140] sm:$0xff]  ;;  %v43_v18 = vld [vmem:[#allocation4 + $0x190] sm:$0xff]  ;;  %v47_v19 = vld [vmem:[#allocation4 + $0x1e8] sm:$0xff] }
  0x17   :  { %5030 = vmatpush1.bf16.msra.mxu0 %v6371_v9  ;;  %v50_v20 = vld [vmem:[#allocation4 + $0x238] sm:$0xff]  ;;  %v6383_v21 = vpack.c.bf16 %v43_v18, %v40_v17  ;;  %v46_v23 = vld [vmem:[#allocation4 + $0x1e0] sm:$0xff]  ;;  %v49_v24 = vld [vmem:[#allocation4 + $0x230] sm:$0xff]  ;;  %v6331_v17 = vmov 1966171168  }
  0x18   :  { %5032 = vmatprep.subr.bf16.mxu0 %v6373_v10  ;;  %v6386_v22 = vpack.c.bf16 %v50_v20, %v47_v19  ;;  %v53_v25 = vld [vmem:[#allocation4 + $0x288] sm:$0xff]  ;;  %v56_v26 = vld [vmem:[#allocation4 + $0x2d8] sm:$0xff]  ;;  %v30_v27 = vld [vmem:[#allocation4 + $0x10] sm:$0xff]  ;;  %v6389_v31 = vpack.c.bf16 %v49_v24, %v46_v23  ;;  %v337_v18 = vunpack.c.l.s4 %v6331_v17  ;;  %v339_v19 = vlaneseq }
  0x19   :  { %v33_v28 = vld [vmem:[#allocation4 + $0x60] sm:$0xff]  ;;  %v36_v29 = vld [vmem:[#allocation4 + $0xb0] sm:$0xff]  ;;  %v6394_v33 = vpack.c.bf16 %v56_v26, %v53_v25  ;;  %v59_v36 = vld [vmem:[#allocation4 + $0x328] sm:$0xff] }
  0x1a   :  { %v39_v30 = vld [vmem:[#allocation4 + $0x100] sm:$0xff]  ;;  %v6391_v32 = vpack.c.bf16 %v33_v28, %v30_v27  ;;  %v55_v35 = vld [vmem:[#allocation4 + $0x2d0] sm:$0xff]  ;;  %v62_v37 = vld [vmem:[#allocation4 + $0x378] sm:$0xff]  ;;  %v338_v20 = vunpack.c.0.s8 %v337_v18  ;;  %v6487_v23 = vshrl.u32 %v339_v19, 7 }
  0x1b   :  { %5034 = vmatpush1.bf16.msra.mxu0 %v6377_v15  ;;  %v52_v34 = vld [vmem:[#allocation4 + $0x280] sm:$0xff]  ;;  %v6397_v38 = vpack.c.bf16 %v39_v30, %v36_v29  ;;  %v42_v39 = vld [vmem:[#allocation4 + $0x150] sm:$0xff]  ;;  %v6404_v42 = vpack.c.bf16 %v62_v37, %v59_v36  ;;  %v65_v45 = vld [vmem:[#allocation4 + $0x3c8] sm:$0xff] }
  0x1c   :  { %5036 = vmatprep.subr.bf16.mxu0 %v6380_v16  ;;  %5061 = vmatpush3.bf16.msra.mxu1 %v6391_v32  ;;  %v45_v40 = vld [vmem:[#allocation4 + $0x1a0] sm:$0xff]  ;;  %v6401_v41 = vpack.c.bf16 %v55_v35, %v52_v34  ;;  %v61_v44 = vld [vmem:[#allocation4 + $0x370] sm:$0xff]  ;;  %v68_v46 = vld [vmem:[#allocation4 + $0x418] sm:$0xff]  ;;  %v6490_v25 = vsub.s32 %v338_v20, %v6487_v23  ;;  %vm3894_vm1 = vcmp.eq.s32.totalorder %v6487_v23, 0 }
  0x1d   :  { %5062 = vmatprep.subr.bf16.mxu1 %v6329_v1  ;;  %v58_v43 = vld [vmem:[#allocation4 + $0x320] sm:$0xff]  ;;  %v6407_v47 = vpack.c.bf16 %v45_v40, %v42_v39  ;;  %v48_v48 = vld [vmem:[#allocation4 + $0x1f0] sm:$0xff]  ;;  %v6414_v51 = vpack.c.bf16 %v68_v46, %v65_v45  ;;  %v71_v54 = vld [vmem:[#allocation4 + $0x468] sm:$0xff] }
  0x1e   :  { %v51_v49 = vld [vmem:[#allocation4 + $0x240] sm:$0xff]  ;;  %v6411_v50 = vpack.c.bf16 %v61_v44, %v58_v43  ;;  %v67_v53 = vld [vmem:[#allocation4 + $0x410] sm:$0xff]  ;;  %v74_v55 = vld [vmem:[#allocation4 + $0x4b8] sm:$0xff] }
  0x1f   :  { %5038 = vmatpush1.bf16.msra.mxu0 %v6383_v21  ;;  %v64_v52 = vld [vmem:[#allocation4 + $0x3c0] sm:$0xff]  ;;  %v6417_v56 = vpack.c.bf16 %v51_v49, %v48_v48  ;;  %v54_v57 = vld [vmem:[#allocation4 + $0x290] sm:$0xff]  ;;  %v6424_v60 = vpack.c.bf16 %v74_v55, %v71_v54 }
  0x20   :  { %5040 = vmatprep.subr.bf16.mxu0 %v6386_v22  ;;  %5064 = vmatpush3.bf16.msra.mxu1 %v6397_v38  ;;  %v57_v58 = vld [vmem:[#allocation4 + $0x2e0] sm:$0xff]  ;;  %v6421_v59 = vpack.c.bf16 %v67_v53, %v64_v52  ;;  %v73_v62 = vld [vmem:[#allocation4 + $0x4b0] sm:$0xff] }
  0x21   :  { %5065 = vmatprep.subr.bf16.mxu1 %v6329_v1  ;;  %v70_v61 = vld [vmem:[#allocation4 + $0x460] sm:$0xff]  ;;  %v6427_v63 = vpack.c.bf16 %v57_v58, %v54_v57  ;;  %v60_v2 = vld [vmem:[#allocation4 + $0x330] sm:$0xff] }
  0x22   :  { %v63_v3 = vld [vmem:[#allocation4 + $0x380] sm:$0xff]  ;;  %v6431_v4 = vpack.c.bf16 %v73_v62, %v70_v61  ;;  %v66_v7 = vld [vmem:[#allocation4 + $0x3d0] sm:$0xff] }
  0x23   :  { %5042 = vmatpush1.bf16.msra.mxu0 %v6389_v31  ;;  %v6435_v6 = vpack.c.bf16 %v63_v3, %v60_v2  ;;  %v69_v8 = vld [vmem:[#allocation4 + $0x420] sm:$0xff]  ;;  %v72_v12 = vld [vmem:[#allocation4 + $0x470] sm:$0xff] }
  0x24   :  { %5044 = vmatprep.subr.bf16.mxu0 %v6394_v33  ;;  %5067 = vmatpush3.bf16.msra.mxu1 %v6407_v47  ;;  %v6441_v11 = vpack.c.bf16 %v69_v8, %v66_v7  ;;  %v75_v13 = vld [vmem:[#allocation4 + $0x4c0] sm:$0xff] }
  0x25   :  { %5068 = vmatprep.subr.bf16.mxu1 %v6329_v1  ;;  %v6449_v14 = vpack.c.bf16 %v75_v13, %v72_v12  ;;  %v191_v29 = vld [vmem:[%s7290_s0] ss:$8 sm:$0x7]  ;;  %v3906_v8 = vld [vmem:[%s7290_s0 + $0x1] ss:$8 sm:$0x7] }
  0x26   :  { %v6500_v43 = vld [vmem:[%s7292_s2] sm:$0x1]  ;;  %v361_v45 = vrot.slane %v191_v29, 2 }
  0x27   :  { %5046 = vmatpush1.bf16.msra.mxu0 %v6401_v41 }
  0x28   :  { %5048 = vmatprep.subr.bf16.mxu0 %v6404_v42  ;;  %5070 = vmatpush3.bf16.msra.mxu1 %v6417_v56 }
  0x29   :  { %5071 = vmatprep.subr.bf16.mxu1 %v6329_v1 }
  0x2b   :  { %5050 = vmatpush1.bf16.msra.mxu0 %v6411_v50 }
  0x2c   :  { %5052 = vmatprep.subr.bf16.mxu0 %v6414_v51  ;;  %5073 = vmatpush3.bf16.msra.mxu1 %v6427_v63 }
  0x2d   :  { %5074 = vmatprep.subr.bf16.mxu1 %v6329_v1 }
  0x2f   :  { %5054 = vmatpush1.bf16.msra.mxu0 %v6421_v59 }
  0x30   :  { %5056 = vmatprep.subr.bf16.mxu0 %v6424_v60  ;;  %5076 = vmatpush3.bf16.msra.mxu1 %v6435_v6 }
  0x31   :  { %5077 = vmatprep.subr.bf16.mxu1 %v6329_v1 }
  0x33   :  { %5058 = vmatpush1.bf16.msra.mxu0 %v6431_v4 }
  0x34   :  { %5084 = vmatprep.subr.bf16.mxu0 %v6369_v5  ;;  %5079 = vmatpush3.bf16.msra.mxu1 %v6441_v11 }
  0x35   :  { %5080 = vmatprep.subr.bf16.mxu1 %v6329_v1 }
  0x36   :  { %257 = vmatmul.mubr.f32.vlgmr.msra.gmra.mrb[0].mxu0 %v6328_v0 }
  0x37   :  { %5086 = vmatpush1.bf16.msra.mxu0 %v6371_v9  ;;  %437 = vmatprep.mubr.f32.mxu0 %v6328_v0 }
  0x38   :  { %5088 = vmatprep.subr.bf16.mxu0 %v6373_v10  ;;  %5082 = vmatpush3.bf16.msra.mxu1 %v6449_v14 }
  0x39   :  { %5115 = vmatprep.subr.bf16.mxu1 %v6329_v1 }
  0x3b   :  { %5090 = vmatpush1.bf16.msra.mxu0 %v6377_v15  ;;  %4325 = vmatmul.mubr.f32.vlgmr.msra.gmra.mrb[0].mxu1 %v6328_v0 }
  0x3c   :  { %5092 = vmatprep.subr.bf16.mxu0 %v6380_v16  ;;  %5117 = vmatpush3.bf16.msra.mxu1 %v6391_v32 }
  0x3d   :  { %4359 = vmatprep.mubr.msk.f32.mxu1 %vm6330_vm0, %v6328_v0  ;;  %5118 = vmatprep.subr.bf16.mxu1 %v6329_v1 }
  0x3f   :  { %5094 = vmatpush1.bf16.msra.mxu0 %v6383_v21 }
  0x40   :  { %5096 = vmatprep.subr.bf16.mxu0 %v6386_v22  ;;  %5120 = vmatpush3.bf16.msra.mxu1 %v6397_v38 }
  0x41   :  { %5121 = vmatprep.subr.bf16.mxu1 %v6329_v1 }
  0x43   :  { %5098 = vmatpush1.bf16.msra.mxu0 %v6389_v31 }
  0x44   :  { %5100 = vmatprep.subr.bf16.mxu0 %v6394_v33  ;;  %5123 = vmatpush3.bf16.msra.mxu1 %v6407_v47 }
  0x45   :  { %5124 = vmatprep.subr.bf16.mxu1 %v6329_v1 }
  0x47   :  { %5102 = vmatpush1.bf16.msra.mxu0 %v6401_v41 }
  0x48   :  { %5104 = vmatprep.subr.bf16.mxu0 %v6404_v42  ;;  %5126 = vmatpush3.bf16.msra.mxu1 %v6417_v56 }
  0x49   :  { %5127 = vmatprep.subr.bf16.mxu1 %v6329_v1 }
  0x4b   :  { %5106 = vmatpush1.bf16.msra.mxu0 %v6411_v50 }
  0x4c   :  { %5108 = vmatprep.subr.bf16.mxu0 %v6414_v51  ;;  %5129 = vmatpush3.bf16.msra.mxu1 %v6427_v63 }
  0x4d   :  { %5130 = vmatprep.subr.bf16.mxu1 %v6329_v1 }
  0x4f   :  { %5110 = vmatpush1.bf16.msra.mxu0 %v6421_v59 }
  0x50   :  { %5112 = vmatprep.subr.bf16.mxu0 %v6424_v60  ;;  %5132 = vmatpush3.bf16.msra.mxu1 %v6435_v6 }
  0x51   :  { %5133 = vmatprep.subr.bf16.mxu1 %v6329_v1 }
  0x53   :  { %5114 = vmatpush1.bf16.msra.mxu0 %v6431_v4 }
  0x54   :  { %5140 = vmatprep.subr.bf16.mxu0 %v6369_v5  ;;  %5135 = vmatpush3.bf16.msra.mxu1 %v6441_v11 }
  0x55   :  { %5136 = vmatprep.subr.bf16.mxu1 %v6329_v1 }
  0x58   :  { %5138 = vmatpush3.bf16.msra.mxu1 %v6449_v14 }
  0x59   :  { %5171 = vmatprep.subr.bf16.mxu1 %v6329_v1 }
 0x109   :  { %v258_v24 = vpop.f32.mrb[0].mxu0 }
 0x10a   :  { %v260_v26 = vpop.f32.mrb[1].mxu0 }
 0x10b   :  { %v335_v27 = vcombine.low %v258_v24, %v260_v26  ;;  %v542_v24 = vrot.slane %v3906_v8, 2 }
 0x10d   :  { %v342_v28 = vrot.slane %v335_v27, %v6490_v25 }
 0x10e   :  { %v329_v36 = vpop.f32.mrb[0].mxu1 }
 0x10f   :  { %v349_v30 = vrot.slane %v342_v28, %v6490_v25  ;;  %v4326_v37 = vpop.f32.mrb[1].mxu1  ;;  %v358_v44 = vadd.f32 %v329_v36, %v6500_v43 }
 0x111   :  { %v351_v34 = vadd.f32 %v349_v30, %v191_v29 }
 0x113   :  { %v3905_v35 = vmul.f32 -1.442695, %v351_v34 }
 0x115   :  { %6186 = vpow2.f32 %v3905_v35 }
 0x11f   :  { %v6187_v39 = vpop.eup %6186 }
 0x120   :  { %v355_v40 = vadd.f32 1.0, %v6187_v39 }
 0x122   :  { %6188 = vrcp.f32 %v355_v40 }
 0x12c   :  { %v6189_v46 = vpop.eup %6188 }
 0x12d   :  { %v359_v48 = vmul.f32 %v6189_v46, %v358_v44  ;;  %v367_v54 = vrot.slane %v6189_v46, 1 }
 0x12f   :  { %v363_v49 = vadd.f32 %v361_v45, %v359_v48  ;;  %v3908_v48 = vld [vmem:[%s7290_s0 + $0x2] ss:$8 sm:$0x7] }
 0x131   :  { %6190 = vtanh.f32 %v363_v49 }
 0x13b   :  { %v6191_v52 = vpop.eup %6190 }
 0x13c   :  { %v365_v53 = vsub.f32 0.0, %v6191_v52 }
 0x13e   :  { %v369_v55 = vmul.f32 %v367_v54, %v365_v53 }
 0x140   :  { %v370_v57 = vadd.f32 %v6191_v52, %v369_v55 }
 0x142   :  { %438 = vmatmul.mubr.f32.vlgmr.msra.gmra.mrb[2].mxu0 %v370_v57  ;;  %4360 = vmatmul.mubr.f32.vlgmr.msra.gmra.mrb[2].mxu1 %v370_v57 }
 0x143   :  { %5142 = vmatpush1.bf16.msra.mxu0 %v6371_v9  ;;  %5173 = vmatpush3.bf16.msra.mxu1 %v6391_v32 }
 0x144   :  { %5144 = vmatprep.subr.bf16.mxu0 %v6373_v10  ;;  %5174 = vmatprep.subr.bf16.mxu1 %v6329_v1 }
 0x145   :  { %618 = vmatprep.mubr.f32.mxu0 %v6328_v0  ;;  %4394 = vmatprep.mubr.msk.f32.mxu1 %vm6330_vm0, %v6328_v0 }
 0x147   :  { %5146 = vmatpush1.bf16.msra.mxu0 %v6377_v15  ;;  %5176 = vmatpush3.bf16.msra.mxu1 %v6397_v38 }
 0x148   :  { %5148 = vmatprep.subr.bf16.mxu0 %v6380_v16  ;;  %5177 = vmatprep.subr.bf16.mxu1 %v6329_v1 }
 0x14b   :  { %5150 = vmatpush1.bf16.msra.mxu0 %v6383_v21  ;;  %5179 = vmatpush3.bf16.msra.mxu1 %v6407_v47 }
 0x14c   :  { %5152 = vmatprep.subr.bf16.mxu0 %v6386_v22  ;;  %5180 = vmatprep.subr.bf16.mxu1 %v6329_v1 }
 0x14f   :  { %5154 = vmatpush1.bf16.msra.mxu0 %v6389_v31  ;;  %5182 = vmatpush3.bf16.msra.mxu1 %v6417_v56 }
 0x150   :  { %5156 = vmatprep.subr.bf16.mxu0 %v6394_v33  ;;  %5183 = vmatprep.subr.bf16.mxu1 %v6329_v1 }
 0x153   :  { %5158 = vmatpush1.bf16.msra.mxu0 %v6401_v41  ;;  %5185 = vmatpush3.bf16.msra.mxu1 %v6427_v63 }
 0x154   :  { %5160 = vmatprep.subr.bf16.mxu0 %v6404_v42  ;;  %5186 = vmatprep.subr.bf16.mxu1 %v6329_v1 }
 0x157   :  { %5162 = vmatpush1.bf16.msra.mxu0 %v6411_v50  ;;  %5188 = vmatpush3.bf16.msra.mxu1 %v6435_v6 }
 0x158   :  { %5164 = vmatprep.subr.bf16.mxu0 %v6414_v51  ;;  %5189 = vmatprep.subr.bf16.mxu1 %v6329_v1 }
 0x15b   :  { %5166 = vmatpush1.bf16.msra.mxu0 %v6421_v59  ;;  %5191 = vmatpush3.bf16.msra.mxu1 %v6441_v11 }
 0x15c   :  { %5168 = vmatprep.subr.bf16.mxu0 %v6424_v60  ;;  %5192 = vmatprep.subr.bf16.mxu1 %v6329_v1 }
 0x15f   :  { %5170 = vmatpush1.bf16.msra.mxu0 %v6431_v4  ;;  %5194 = vmatpush3.bf16.msra.mxu1 %v6449_v14 }
 0x160   :  { %5196 = vmatprep.subr.bf16.mxu0 %v6369_v5  ;;  %5227 = vmatprep.subr.bf16.mxu1 %v6329_v1 }
 0x215   :  { %v439_v58 = vpop.f32.mrb[2].mxu0  ;;  %v510_v61 = vpop.f32.mrb[2].mxu1 }
 0x216   :  { %v441_v62 = vpop.f32.mrb[3].mxu0  ;;  %v4361_v2 = vpop.f32.mrb[3].mxu1  ;;  %v539_v20 = vadd.f32 %v510_v61, %v6500_v43 }
 0x217   :  { %v516_v3 = vcombine.low %v439_v58, %v441_v62  ;;  %v723_v58 = vrot.slane %v3908_v48, 2 }
 0x219   :  { %v523_v7 = vrot.slane %v516_v3, %v6490_v25 }
 0x21b   :  { %v530_v12 = vrot.slane %v523_v7, %v6490_v25 }
 0x21d   :  { %v532_v13 = vadd.f32 %v3906_v8, %v530_v12 }
 0x21f   :  { %v3907_v17 = vmul.f32 -1.442695, %v532_v13 }
 0x221   :  { %6192 = vpow2.f32 %v3907_v17 }
 0x22b   :  { %v6193_v18 = vpop.eup %6192 }
 0x22c   :  { %v536_v19 = vadd.f32 1.0, %v6193_v18 }
 0x22e   :  { %6194 = vrcp.f32 %v536_v19 }
 0x238   :  { %v6195_v26 = vpop.eup %6194 }
 0x239   :  { %v540_v27 = vmul.f32 %v6195_v26, %v539_v20  ;;  %v548_v34 = vrot.slane %v6195_v26, 1 }
 0x23b   :  { %v544_v28 = vadd.f32 %v542_v24, %v540_v27  ;;  %v3910_v27 = vld [vmem:[%s7290_s0 + $0x3] ss:$8 sm:$0x7] }
 0x23d   :  { %6196 = vtanh.f32 %v544_v28 }
 0x247   :  { %v6197_v29 = vpop.eup %6196 }
 0x248   :  { %v546_v30 = vsub.f32 %v370_v57, %v6197_v29 }
 0x24a   :  { %v550_v35 = vmul.f32 %v548_v34, %v546_v30 }
 0x24c   :  { %v551_v36 = vadd.f32 %v6197_v29, %v550_v35 }
 0x24e   :  { %619 = vmatmul.mubr.f32.vlgmr.msra.gmra.mrb[4].mxu0 %v551_v36  ;;  %4395 = vmatmul.mubr.f32.vlgmr.msra.gmra.mrb[4].mxu1 %v551_v36 }
 0x24f   :  { %5198 = vmatpush1.bf16.msra.mxu0 %v6371_v9  ;;  %5229 = vmatpush3.bf16.msra.mxu1 %v6391_v32 }
 0x250   :  { %5200 = vmatprep.subr.bf16.mxu0 %v6373_v10  ;;  %5230 = vmatprep.subr.bf16.mxu1 %v6329_v1 }
 0x251   :  { %799 = vmatprep.mubr.f32.mxu0 %v6328_v0  ;;  %4429 = vmatprep.mubr.msk.f32.mxu1 %vm6330_vm0, %v6328_v0 }
 0x253   :  { %5202 = vmatpush1.bf16.msra.mxu0 %v6377_v15  ;;  %5232 = vmatpush3.bf16.msra.mxu1 %v6397_v38 }
 0x254   :  { %5204 = vmatprep.subr.bf16.mxu0 %v6380_v16  ;;  %5233 = vmatprep.subr.bf16.mxu1 %v6329_v1 }
 0x257   :  { %5206 = vmatpush1.bf16.msra.mxu0 %v6383_v21  ;;  %5235 = vmatpush3.bf16.msra.mxu1 %v6407_v47 }
 0x258   :  { %5208 = vmatprep.subr.bf16.mxu0 %v6386_v22  ;;  %5236 = vmatprep.subr.bf16.mxu1 %v6329_v1 }
 0x25b   :  { %5210 = vmatpush1.bf16.msra.mxu0 %v6389_v31  ;;  %5238 = vmatpush3.bf16.msra.mxu1 %v6417_v56 }
 0x25c   :  { %5212 = vmatprep.subr.bf16.mxu0 %v6394_v33  ;;  %5239 = vmatprep.subr.bf16.mxu1 %v6329_v1 }
 0x25f   :  { %5214 = vmatpush1.bf16.msra.mxu0 %v6401_v41  ;;  %5241 = vmatpush3.bf16.msra.mxu1 %v6427_v63 }
 0x260   :  { %5216 = vmatprep.subr.bf16.mxu0 %v6404_v42  ;;  %5242 = vmatprep.subr.bf16.mxu1 %v6329_v1 }
 0x263   :  { %5218 = vmatpush1.bf16.msra.mxu0 %v6411_v50  ;;  %5244 = vmatpush3.bf16.msra.mxu1 %v6435_v6 }
 0x264   :  { %5220 = vmatprep.subr.bf16.mxu0 %v6414_v51  ;;  %5245 = vmatprep.subr.bf16.mxu1 %v6329_v1 }
 0x267   :  { %5222 = vmatpush1.bf16.msra.mxu0 %v6421_v59  ;;  %5247 = vmatpush3.bf16.msra.mxu1 %v6441_v11 }
 0x268   :  { %5224 = vmatprep.subr.bf16.mxu0 %v6424_v60  ;;  %5248 = vmatprep.subr.bf16.mxu1 %v6329_v1 }
 0x26b   :  { %5226 = vmatpush1.bf16.msra.mxu0 %v6431_v4  ;;  %5250 = vmatpush3.bf16.msra.mxu1 %v6449_v14 }
 0x26c   :  { %5252 = vmatprep.subr.bf16.mxu0 %v6369_v5  ;;  %5283 = vmatprep.subr.bf16.mxu1 %v6329_v1 }
 0x321   :  { %v620_v37 = vpop.f32.mrb[4].mxu0  ;;  %v691_v39 = vpop.f32.mrb[4].mxu1 }
 0x322   :  { %v622_v40 = vpop.f32.mrb[5].mxu0  ;;  %v4396_v44 = vpop.f32.mrb[5].mxu1  ;;  %v720_v57 = vadd.f32 %v691_v39, %v6500_v43 }
 0x323   :  { %v697_v45 = vcombine.low %v620_v37, %v622_v40  ;;  %v904_v37 = vrot.slane %v3910_v27, 2 }
 0x325   :  { %v704_v46 = vrot.slane %v697_v45, %v6490_v25 }
 0x327   :  { %v711_v49 = vrot.slane %v704_v46, %v6490_v25 }
 0x329   :  { %v713_v52 = vadd.f32 %v3908_v48, %v711_v49 }
 0x32b   :  { %v3909_v53 = vmul.f32 -1.442695, %v713_v52 }
 0x32d   :  { %6198 = vpow2.f32 %v3909_v53 }
 0x337   :  { %v6199_v54 = vpop.eup %6198 }
 0x338   :  { %v717_v55 = vadd.f32 1.0, %v6199_v54 }
 0x33a   :  { %6200 = vrcp.f32 %v717_v55 }
 0x344   :  { %v6201_v61 = vpop.eup %6200 }
 0x345   :  { %v721_v62 = vmul.f32 %v6201_v61, %v720_v57  ;;  %v729_v8 = vrot.slane %v6201_v61, 1 }
 0x347   :  { %v725_v2 = vadd.f32 %v723_v58, %v721_v62  ;;  %v3912_v62 = vld [vmem:[%s7290_s0 + $0x4] ss:$8 sm:$0x7] }
 0x349   :  { %6202 = vtanh.f32 %v725_v2 }
 0x353   :  { %v6203_v3 = vpop.eup %6202 }
 0x354   :  { %v727_v7 = vsub.f32 %v551_v36, %v6203_v3 }
 0x356   :  { %v731_v12 = vmul.f32 %v729_v8, %v727_v7 }
 0x358   :  { %v732_v13 = vadd.f32 %v6203_v3, %v731_v12 }
 0x35a   :  { %800 = vmatmul.mubr.f32.vlgmr.msra.gmra.mrb[6].mxu0 %v732_v13  ;;  %4430 = vmatmul.mubr.f32.vlgmr.msra.gmra.mrb[6].mxu1 %v732_v13 }
 0x35b   :  { %5254 = vmatpush1.bf16.msra.mxu0 %v6371_v9  ;;  %5285 = vmatpush3.bf16.msra.mxu1 %v6391_v32 }
 0x35c   :  { %5256 = vmatprep.subr.bf16.mxu0 %v6373_v10  ;;  %5286 = vmatprep.subr.bf16.mxu1 %v6329_v1 }
 0x35d   :  { %980 = vmatprep.mubr.f32.mxu0 %v6328_v0  ;;  %4464 = vmatprep.mubr.msk.f32.mxu1 %vm6330_vm0, %v6328_v0 }
 0x35f   :  { %5258 = vmatpush1.bf16.msra.mxu0 %v6377_v15  ;;  %5288 = vmatpush3.bf16.msra.mxu1 %v6397_v38 }
 0x360   :  { %5260 = vmatprep.subr.bf16.mxu0 %v6380_v16  ;;  %5289 = vmatprep.subr.bf16.mxu1 %v6329_v1 }
 0x363   :  { %5262 = vmatpush1.bf16.msra.mxu0 %v6383_v21  ;;  %5291 = vmatpush3.bf16.msra.mxu1 %v6407_v47 }
 0x364   :  { %5264 = vmatprep.subr.bf16.mxu0 %v6386_v22  ;;  %5292 = vmatprep.subr.bf16.mxu1 %v6329_v1 }
 0x367   :  { %5266 = vmatpush1.bf16.msra.mxu0 %v6389_v31  ;;  %5294 = vmatpush3.bf16.msra.mxu1 %v6417_v56 }
 0x368   :  { %5268 = vmatprep.subr.bf16.mxu0 %v6394_v33  ;;  %5295 = vmatprep.subr.bf16.mxu1 %v6329_v1 }
 0x36b   :  { %5270 = vmatpush1.bf16.msra.mxu0 %v6401_v41  ;;  %5297 = vmatpush3.bf16.msra.mxu1 %v6427_v63 }
 0x36c   :  { %5272 = vmatprep.subr.bf16.mxu0 %v6404_v42  ;;  %5298 = vmatprep.subr.bf16.mxu1 %v6329_v1 }
 0x36f   :  { %5274 = vmatpush1.bf16.msra.mxu0 %v6411_v50  ;;  %5300 = vmatpush3.bf16.msra.mxu1 %v6435_v6 }
 0x370   :  { %5276 = vmatprep.subr.bf16.mxu0 %v6414_v51  ;;  %5301 = vmatprep.subr.bf16.mxu1 %v6329_v1 }
 0x373   :  { %5278 = vmatpush1.bf16.msra.mxu0 %v6421_v59  ;;  %5303 = vmatpush3.bf16.msra.mxu1 %v6441_v11 }
 0x374   :  { %5280 = vmatprep.subr.bf16.mxu0 %v6424_v60  ;;  %5304 = vmatprep.subr.bf16.mxu1 %v6329_v1 }
 0x377   :  { %5282 = vmatpush1.bf16.msra.mxu0 %v6431_v4  ;;  %5306 = vmatpush3.bf16.msra.mxu1 %v6449_v14 }
 0x378   :  { %5308 = vmatprep.subr.bf16.mxu0 %v6369_v5  ;;  %5339 = vmatprep.subr.bf16.mxu1 %v6329_v1 }
 0x42d   :  { %v801_v17 = vpop.f32.mrb[6].mxu0  ;;  %v872_v18 = vpop.f32.mrb[6].mxu1 }
 0x42e   :  { %v803_v19 = vpop.f32.mrb[7].mxu0  ;;  %v4431_v20 = vpop.f32.mrb[7].mxu1  ;;  %v901_v36 = vadd.f32 %v872_v18, %v6500_v43 }
 0x42f   :  { %v878_v24 = vcombine.low %v801_v17, %v803_v19  ;;  %v1085_v17 = vrot.slane %v3912_v62, 2 }
 0x431   :  { %v885_v26 = vrot.slane %v878_v24, %v6490_v25 }
 0x433   :  { %v892_v28 = vrot.slane %v885_v26, %v6490_v25 }
 0x435   :  { %v894_v29 = vadd.f32 %v3910_v27, %v892_v28 }
 0x437   :  { %v3911_v30 = vmul.f32 -1.442695, %v894_v29 }
 0x439   :  { %6204 = vpow2.f32 %v3911_v30 }
 0x443   :  { %v6205_v34 = vpop.eup %6204 }
 0x444   :  { %v898_v35 = vadd.f32 1.0, %v6205_v34 }
 0x446   :  { %6206 = vrcp.f32 %v898_v35 }
 0x450   :  { %v6207_v39 = vpop.eup %6206 }
 0x451   :  { %v902_v40 = vmul.f32 %v6207_v39, %v901_v36  ;;  %v910_v48 = vrot.slane %v6207_v39, 1 }
 0x453   :  { %v906_v44 = vadd.f32 %v904_v37, %v902_v40  ;;  %v3914_v40 = vld [vmem:[%s7290_s0 + $0x5] ss:$8 sm:$0x7] }
 0x455   :  { %6208 = vtanh.f32 %v906_v44 }
 0x45f   :  { %v6209_v45 = vpop.eup %6208 }
 0x460   :  { %v908_v46 = vsub.f32 %v732_v13, %v6209_v45 }
 0x462   :  { %v912_v49 = vmul.f32 %v910_v48, %v908_v46 }
 0x464   :  { %v913_v52 = vadd.f32 %v6209_v45, %v912_v49 }
 0x466   :  { %981 = vmatmul.mubr.f32.vlgmr.msra.gmra.mrb[8].mxu0 %v913_v52  ;;  %4465 = vmatmul.mubr.f32.vlgmr.msra.gmra.mrb[8].mxu1 %v913_v52 }
 0x467   :  { %5310 = vmatpush1.bf16.msra.mxu0 %v6371_v9  ;;  %5341 = vmatpush3.bf16.msra.mxu1 %v6391_v32 }
 0x468   :  { %5312 = vmatprep.subr.bf16.mxu0 %v6373_v10  ;;  %5342 = vmatprep.subr.bf16.mxu1 %v6329_v1 }
 0x469   :  { %1161 = vmatprep.mubr.f32.mxu0 %v6328_v0  ;;  %4499 = vmatprep.mubr.msk.f32.mxu1 %vm6330_vm0, %v6328_v0 }
 0x46b   :  { %5314 = vmatpush1.bf16.msra.mxu0 %v6377_v15  ;;  %5344 = vmatpush3.bf16.msra.mxu1 %v6397_v38 }
 0x46c   :  { %5316 = vmatprep.subr.bf16.mxu0 %v6380_v16  ;;  %5345 = vmatprep.subr.bf16.mxu1 %v6329_v1 }
 0x46f   :  { %5318 = vmatpush1.bf16.msra.mxu0 %v6383_v21  ;;  %5347 = vmatpush3.bf16.msra.mxu1 %v6407_v47 }
 0x470   :  { %5320 = vmatprep.subr.bf16.mxu0 %v6386_v22  ;;  %5348 = vmatprep.subr.bf16.mxu1 %v6329_v1 }
 0x473   :  { %5322 = vmatpush1.bf16.msra.mxu0 %v6389_v31  ;;  %5350 = vmatpush3.bf16.msra.mxu1 %v6417_v56 }
 0x474   :  { %5324 = vmatprep.subr.bf16.mxu0 %v6394_v33  ;;  %5351 = vmatprep.subr.bf16.mxu1 %v6329_v1 }
 0x477   :  { %5326 = vmatpush1.bf16.msra.mxu0 %v6401_v41  ;;  %5353 = vmatpush3.bf16.msra.mxu1 %v6427_v63 }
 0x478   :  { %5328 = vmatprep.subr.bf16.mxu0 %v6404_v42  ;;  %5354 = vmatprep.subr.bf16.mxu1 %v6329_v1 }
 0x47b   :  { %5330 = vmatpush1.bf16.msra.mxu0 %v6411_v50  ;;  %5356 = vmatpush3.bf16.msra.mxu1 %v6435_v6 }
 0x47c   :  { %5332 = vmatprep.subr.bf16.mxu0 %v6414_v51  ;;  %5357 = vmatprep.subr.bf16.mxu1 %v6329_v1 }
 0x47f   :  { %5334 = vmatpush1.bf16.msra.mxu0 %v6421_v59  ;;  %5359 = vmatpush3.bf16.msra.mxu1 %v6441_v11 }
 0x480   :  { %5336 = vmatprep.subr.bf16.mxu0 %v6424_v60  ;;  %5360 = vmatprep.subr.bf16.mxu1 %v6329_v1 }
 0x483   :  { %5338 = vmatpush1.bf16.msra.mxu0 %v6431_v4  ;;  %5362 = vmatpush3.bf16.msra.mxu1 %v6449_v14 }
 0x484   :  { %5364 = vmatprep.subr.bf16.mxu0 %v6369_v5  ;;  %5395 = vmatprep.subr.bf16.mxu1 %v6329_v1 }
 0x539   :  { %v982_v53 = vpop.f32.mrb[8].mxu0  ;;  %v1053_v54 = vpop.f32.mrb[8].mxu1 }
 0x53a   :  { %v984_v55 = vpop.f32.mrb[9].mxu0  ;;  %v4466_v57 = vpop.f32.mrb[9].mxu1  ;;  %v1082_v13 = vadd.f32 %v1053_v54, %v6500_v43 }
 0x53b   :  { %v1059_v58 = vcombine.low %v982_v53, %v984_v55  ;;  %v1266_v53 = vrot.slane %v3914_v40, 2 }
 0x53d   :  { %v1066_v61 = vrot.slane %v1059_v58, %v6490_v25 }
 0x53f   :  { %v1073_v2 = vrot.slane %v1066_v61, %v6490_v25 }
 0x541   :  { %v1075_v3 = vadd.f32 %v3912_v62, %v1073_v2 }
 0x543   :  { %v3913_v7 = vmul.f32 -1.442695, %v1075_v3 }
 0x545   :  { %6210 = vpow2.f32 %v3913_v7 }
 0x54f   :  { %v6211_v8 = vpop.eup %6210 }
 0x550   :  { %v1079_v12 = vadd.f32 1.0, %v6211_v8 }
 0x552   :  { %6212 = vrcp.f32 %v1079_v12 }
 0x55c   :  { %v6213_v18 = vpop.eup %6212 }
 0x55d   :  { %v1083_v19 = vmul.f32 %v6213_v18, %v1082_v13  ;;  %v1091_v27 = vrot.slane %v6213_v18, 1 }
 0x55f   :  { %v1087_v20 = vadd.f32 %v1085_v17, %v1083_v19  ;;  %v3916_v19 = vld [vmem:[%s7290_s0 + $0x6] ss:$8 sm:$0x7] }
 0x561   :  { %6214 = vtanh.f32 %v1087_v20 }
 0x56b   :  { %v6215_v24 = vpop.eup %6214 }
 0x56c   :  { %v1089_v26 = vsub.f32 %v913_v52, %v6215_v24 }
 0x56e   :  { %v1093_v28 = vmul.f32 %v1091_v27, %v1089_v26 }
 0x570   :  { %v1094_v29 = vadd.f32 %v6215_v24, %v1093_v28 }
 0x572   :  { %1162 = vmatmul.mubr.f32.vlgmr.msra.gmra.mrb[10].mxu0 %v1094_v29  ;;  %4500 = vmatmul.mubr.f32.vlgmr.msra.gmra.mrb[10].mxu1 %v1094_v29 }
 0x573   :  { %5366 = vmatpush1.bf16.msra.mxu0 %v6371_v9  ;;  %5397 = vmatpush3.bf16.msra.mxu1 %v6391_v32 }
 0x574   :  { %5368 = vmatprep.subr.bf16.mxu0 %v6373_v10  ;;  %5398 = vmatprep.subr.bf16.mxu1 %v6329_v1 }
 0x575   :  { %1342 = vmatprep.mubr.f32.mxu0 %v6328_v0  ;;  %4534 = vmatprep.mubr.msk.f32.mxu1 %vm6330_vm0, %v6328_v0 }
 0x577   :  { %5370 = vmatpush1.bf16.msra.mxu0 %v6377_v15  ;;  %5400 = vmatpush3.bf16.msra.mxu1 %v6397_v38 }
 0x578   :  { %5372 = vmatprep.subr.bf16.mxu0 %v6380_v16  ;;  %5401 = vmatprep.subr.bf16.mxu1 %v6329_v1 }
 0x57b   :  { %5374 = vmatpush1.bf16.msra.mxu0 %v6383_v21  ;;  %5403 = vmatpush3.bf16.msra.mxu1 %v6407_v47 }
 0x57c   :  { %5376 = vmatprep.subr.bf16.mxu0 %v6386_v22  ;;  %5404 = vmatprep.subr.bf16.mxu1 %v6329_v1 }
 0x57f   :  { %5378 = vmatpush1.bf16.msra.mxu0 %v6389_v31  ;;  %5406 = vmatpush3.bf16.msra.mxu1 %v6417_v56 }
 0x580   :  { %5380 = vmatprep.subr.bf16.mxu0 %v6394_v33  ;;  %5407 = vmatprep.subr.bf16.mxu1 %v6329_v1 }
 0x583   :  { %5382 = vmatpush1.bf16.msra.mxu0 %v6401_v41  ;;  %5409 = vmatpush3.bf16.msra.mxu1 %v6427_v63 }
 0x584   :  { %5384 = vmatprep.subr.bf16.mxu0 %v6404_v42  ;;  %5410 = vmatprep.subr.bf16.mxu1 %v6329_v1 }
 0x587   :  { %5386 = vmatpush1.bf16.msra.mxu0 %v6411_v50  ;;  %5412 = vmatpush3.bf16.msra.mxu1 %v6435_v6 }
 0x588   :  { %5388 = vmatprep.subr.bf16.mxu0 %v6414_v51  ;;  %5413 = vmatprep.subr.bf16.mxu1 %v6329_v1 }
 0x58b   :  { %5390 = vmatpush1.bf16.msra.mxu0 %v6421_v59  ;;  %5415 = vmatpush3.bf16.msra.mxu1 %v6441_v11 }
 0x58c   :  { %5392 = vmatprep.subr.bf16.mxu0 %v6424_v60  ;;  %5416 = vmatprep.subr.bf16.mxu1 %v6329_v1 }
 0x58f   :  { %5394 = vmatpush1.bf16.msra.mxu0 %v6431_v4  ;;  %5418 = vmatpush3.bf16.msra.mxu1 %v6449_v14 }
 0x590   :  { %5420 = vmatprep.subr.bf16.mxu0 %v6369_v5  ;;  %5451 = vmatprep.subr.bf16.mxu1 %v6329_v1 }
 0x645   :  { %v1163_v30 = vpop.f32.mrb[10].mxu0  ;;  %v1234_v34 = vpop.f32.mrb[10].mxu1 }
 0x646   :  { %v1165_v35 = vpop.f32.mrb[11].mxu0  ;;  %v4501_v36 = vpop.f32.mrb[11].mxu1  ;;  %v1263_v52 = vadd.f32 %v1234_v34, %v6500_v43 }
 0x647   :  { %v1240_v37 = vcombine.low %v1163_v30, %v1165_v35  ;;  %v1447_v30 = vrot.slane %v3916_v19, 2 }
 0x649   :  { %v1247_v39 = vrot.slane %v1240_v37, %v6490_v25 }
 0x64b   :  { %v1254_v44 = vrot.slane %v1247_v39, %v6490_v25 }
 0x64d   :  { %v1256_v45 = vadd.f32 %v3914_v40, %v1254_v44 }
 0x64f   :  { %v3915_v46 = vmul.f32 -1.442695, %v1256_v45 }
 0x651   :  { %6216 = vpow2.f32 %v3915_v46 }
 0x65b   :  { %v6217_v48 = vpop.eup %6216 }
 0x65c   :  { %v1260_v49 = vadd.f32 1.0, %v6217_v48 }
 0x65e   :  { %6218 = vrcp.f32 %v1260_v49 }
 0x668   :  { %v6219_v54 = vpop.eup %6218 }
 0x669   :  { %v1264_v55 = vmul.f32 %v6219_v54, %v1263_v52  ;;  %v1272_v62 = vrot.slane %v6219_v54, 1 }
 0x66b   :  { %v1268_v57 = vadd.f32 %v1266_v53, %v1264_v55  ;;  %v3918_v55 = vld [vmem:[%s7290_s0 + $0x7] ss:$8 sm:$0x7] }
 0x66d   :  { %6220 = vtanh.f32 %v1268_v57 }
 0x677   :  { %v6221_v58 = vpop.eup %6220 }
 0x678   :  { %v1270_v61 = vsub.f32 %v1094_v29, %v6221_v58 }
 0x67a   :  { %v1274_v2 = vmul.f32 %v1272_v62, %v1270_v61 }
 0x67c   :  { %v1275_v3 = vadd.f32 %v6221_v58, %v1274_v2 }
 0x67e   :  { %1343 = vmatmul.mubr.f32.vlgmr.msra.gmra.mrb[12].mxu0 %v1275_v3  ;;  %4535 = vmatmul.mubr.f32.vlgmr.msra.gmra.mrb[12].mxu1 %v1275_v3 }
 0x67f   :  { %5422 = vmatpush1.bf16.msra.mxu0 %v6371_v9  ;;  %5453 = vmatpush3.bf16.msra.mxu1 %v6391_v32 }
 0x680   :  { %5424 = vmatprep.subr.bf16.mxu0 %v6373_v10  ;;  %5454 = vmatprep.subr.bf16.mxu1 %v6329_v1 }
 0x681   :  { %1523 = vmatprep.mubr.f32.mxu0 %v6328_v0  ;;  %4569 = vmatprep.mubr.msk.f32.mxu1 %vm6330_vm0, %v6328_v0 }
 0x683   :  { %5426 = vmatpush1.bf16.msra.mxu0 %v6377_v15  ;;  %5456 = vmatpush3.bf16.msra.mxu1 %v6397_v38 }
 0x684   :  { %5428 = vmatprep.subr.bf16.mxu0 %v6380_v16  ;;  %5457 = vmatprep.subr.bf16.mxu1 %v6329_v1 }
 0x687   :  { %5430 = vmatpush1.bf16.msra.mxu0 %v6383_v21  ;;  %5459 = vmatpush3.bf16.msra.mxu1 %v6407_v47 }
 0x688   :  { %5432 = vmatprep.subr.bf16.mxu0 %v6386_v22  ;;  %5460 = vmatprep.subr.bf16.mxu1 %v6329_v1 }
 0x68b   :  { %5434 = vmatpush1.bf16.msra.mxu0 %v6389_v31  ;;  %5462 = vmatpush3.bf16.msra.mxu1 %v6417_v56 }
 0x68c   :  { %5436 = vmatprep.subr.bf16.mxu0 %v6394_v33  ;;  %5463 = vmatprep.subr.bf16.mxu1 %v6329_v1 }
 0x68f   :  { %5438 = vmatpush1.bf16.msra.mxu0 %v6401_v41  ;;  %5465 = vmatpush3.bf16.msra.mxu1 %v6427_v63 }
 0x690   :  { %5440 = vmatprep.subr.bf16.mxu0 %v6404_v42  ;;  %5466 = vmatprep.subr.bf16.mxu1 %v6329_v1 }
 0x693   :  { %5442 = vmatpush1.bf16.msra.mxu0 %v6411_v50  ;;  %5468 = vmatpush3.bf16.msra.mxu1 %v6435_v6 }
 0x694   :  { %5444 = vmatprep.subr.bf16.mxu0 %v6414_v51  ;;  %5469 = vmatprep.subr.bf16.mxu1 %v6329_v1 }
 0x697   :  { %5446 = vmatpush1.bf16.msra.mxu0 %v6421_v59  ;;  %5471 = vmatpush3.bf16.msra.mxu1 %v6441_v11 }
 0x698   :  { %5448 = vmatprep.subr.bf16.mxu0 %v6424_v60  ;;  %5472 = vmatprep.subr.bf16.mxu1 %v6329_v1 }
 0x69b   :  { %5450 = vmatpush1.bf16.msra.mxu0 %v6431_v4  ;;  %5474 = vmatpush3.bf16.msra.mxu1 %v6449_v14 }
 0x69c   :  { %5476 = vmatprep.subr.bf16.mxu0 %v6369_v5  ;;  %5507 = vmatprep.subr.bf16.mxu1 %v6329_v1 }
 0x751   :  { %v1344_v7 = vpop.f32.mrb[12].mxu0  ;;  %v1415_v8 = vpop.f32.mrb[12].mxu1 }
 0x752   :  { %v1346_v12 = vpop.f32.mrb[13].mxu0  ;;  %v4536_v13 = vpop.f32.mrb[13].mxu1  ;;  %v1444_v29 = vadd.f32 %v1415_v8, %v6500_v43 }
 0x753   :  { %v1421_v17 = vcombine.low %v1344_v7, %v1346_v12 }
 0x755   :  { %v1428_v18 = vrot.slane %v1421_v17, %v6490_v25 }
 0x757   :  { %v1435_v20 = vrot.slane %v1428_v18, %v6490_v25 }
 0x759   :  { %v1437_v24 = vadd.f32 %v3916_v19, %v1435_v20 }
 0x75b   :  { %v3917_v26 = vmul.f32 -1.442695, %v1437_v24 }
 0x75d   :  { %6222 = vpow2.f32 %v3917_v26  ;;  %v76_v26 = vld [vmem:[#allocation4 + $0x18] sm:$0xff] }
 0x767   :  { %v6223_v27 = vpop.eup %6222 }
 0x768   :  { %v1441_v28 = vadd.f32 1.0, %v6223_v27  ;;  %v79_v27 = vld [vmem:[#allocation4 + $0x68] sm:$0xff] }
 0x76a   :  { %6224 = vrcp.f32 %v1441_v28  ;;  %v78_v28 = vld [vmem:[#allocation4 + $0x28] sm:$0xff] }
 0x774   :  { %v6225_v34 = vpop.eup %6224 }
 0x775   :  { %v1445_v35 = vmul.f32 %v6225_v34, %v1444_v29  ;;  %v1453_v40 = vrot.slane %v6225_v34, 1  ;;  %v5589_v29 = vpack.c.bf16 %v79_v27, %v76_v26  ;;  %v122_v26 = vld [vmem:[#allocation4 + $0x4d0] sm:$0xff] }
 0x777   :  { %v1449_v36 = vadd.f32 %v1447_v30, %v1445_v35  ;;  %v81_v30 = vld [vmem:[#allocation4 + $0x78] sm:$0xff]  ;;  %v83_v35 = vld [vmem:[#allocation4 + $0xc0] sm:$0xff] }
 0x778   :  { %v5620_v34 = vpack.c.bf16 %v81_v30, %v78_v28  ;;  %v118_v30 = vld [vmem:[#allocation4 + $0x478] sm:$0xff] }
 0x779   :  { %6226 = vtanh.f32 %v1449_v36  ;;  %v86_v36 = vld [vmem:[#allocation4 + $0x110] sm:$0xff] }
 0x783   :  { %v6227_v37 = vpop.eup %6226 }
 0x784   :  { %v1451_v39 = vsub.f32 %v1275_v3, %v6227_v37  ;;  %v1628_v3 = vrot.slane %v3918_v55, 2 }
 0x786   :  { %v1455_v44 = vmul.f32 %v1453_v40, %v1451_v39  ;;  %v82_v39 = vld [vmem:[#allocation4 + $0xb8] sm:$0xff]  ;;  %v85_v40 = vld [vmem:[#allocation4 + $0x108] sm:$0xff] }
 0x788   :  { %v1456_v45 = vadd.f32 %v6227_v37, %v1455_v44  ;;  %v5591_v37 = vpack.c.bf16 %v86_v36, %v83_v35  ;;  %v84_v44 = vld [vmem:[#allocation4 + $0xc8] sm:$0xff]  ;;  %v123_v36 = vld [vmem:[#allocation4 + $0x4d8] sm:$0xff] }
 0x789   :  { %v120_v35 = vld [vmem:[#allocation4 + $0x488] sm:$0xff] }
 0x78a   :  { %1524 = vmatmul.mubr.f32.vlgmr.msra.gmra.mrb[14].mxu0 %v1456_v45  ;;  %4570 = vmatmul.mubr.f32.vlgmr.msra.gmra.mrb[14].mxu1 %v1456_v45 }
 0x78b   :  { %5478 = vmatpush1.bf16.msra.mxu0 %v6371_v9  ;;  %5509 = vmatpush3.bf16.msra.mxu1 %v6391_v32 }
 0x78c   :  { %5480 = vmatprep.subr.bf16.mxu0 %v6373_v10  ;;  %5510 = vmatprep.subr.bf16.mxu1 %v6329_v1 }
 0x78d   :  { %1704 = vmatprep.mubr.f32.mxu0 %v6328_v0  ;;  %4604 = vmatprep.mubr.msk.f32.mxu1 %vm6330_vm0, %v6328_v0 }
 0x78f   :  { %5482 = vmatpush1.bf16.msra.mxu0 %v6377_v15  ;;  %5512 = vmatpush3.bf16.msra.mxu1 %v6397_v38 }
 0x790   :  { %5484 = vmatprep.subr.bf16.mxu0 %v6380_v16  ;;  %5513 = vmatprep.subr.bf16.mxu1 %v6329_v1 }
 0x793   :  { %5486 = vmatpush1.bf16.msra.mxu0 %v6383_v21  ;;  %5515 = vmatpush3.bf16.msra.mxu1 %v6407_v47 }
 0x794   :  { %5488 = vmatprep.subr.bf16.mxu0 %v6386_v22  ;;  %5516 = vmatprep.subr.bf16.mxu1 %v6329_v1 }
 0x797   :  { %5490 = vmatpush1.bf16.msra.mxu0 %v6389_v31  ;;  %5518 = vmatpush3.bf16.msra.mxu1 %v6417_v56 }
 0x798   :  { %5492 = vmatprep.subr.bf16.mxu0 %v6394_v33  ;;  %5519 = vmatprep.subr.bf16.mxu1 %v6329_v1 }
 0x79b   :  { %5494 = vmatpush1.bf16.msra.mxu0 %v6401_v41  ;;  %5521 = vmatpush3.bf16.msra.mxu1 %v6427_v63 }
 0x79c   :  { %5496 = vmatprep.subr.bf16.mxu0 %v6404_v42  ;;  %5522 = vmatprep.subr.bf16.mxu1 %v6329_v1 }
 0x79f   :  { %5498 = vmatpush1.bf16.msra.mxu0 %v6411_v50  ;;  %5524 = vmatpush3.bf16.msra.mxu1 %v6435_v6 }
 0x7a0   :  { %5500 = vmatprep.subr.bf16.mxu0 %v6414_v51  ;;  %5525 = vmatprep.subr.bf16.mxu1 %v6329_v1 }
 0x7a3   :  { %5502 = vmatpush1.bf16.msra.mxu0 %v6421_v59  ;;  %5527 = vmatpush3.bf16.msra.mxu1 %v6441_v11 }
 0x7a4   :  { %5504 = vmatprep.subr.bf16.mxu0 %v6424_v60  ;;  %5528 = vmatprep.subr.bf16.mxu1 %v6329_v1 }
 0x7a7   :  { %5506 = vmatpush1.bf16.msra.mxu0 %v6431_v4  ;;  %5530 = vmatpush3.bf16.msra.mxu1 %v6449_v14 }
 0x7a8   :  { %5532 = vmatprep.subr.bf16.mxu0 %v6369_v5  ;;  %5563 = vmatprep.subr.bf16.mxu1 %v6329_v1 }
 0x85d   :  { %v1525_v46 = vpop.f32.mrb[14].mxu0  ;;  %v1596_v48 = vpop.f32.mrb[14].mxu1 }
 0x85e   :  { %v1527_v49 = vpop.f32.mrb[15].mxu0  ;;  %v4571_v52 = vpop.f32.mrb[15].mxu1  ;;  %v1625_v2 = vadd.f32 %v1596_v48, %v6500_v43 }
 0x85f   :  { %v1602_v53 = vcombine.low %v1525_v46, %v1527_v49  ;;  %v87_v46 = vld [vmem:[#allocation4 + $0x118] sm:$0xff]  ;;  %v89_v49 = vld [vmem:[#allocation4 + $0x160] sm:$0xff]  ;;  %v92_v52 = vld [vmem:[#allocation4 + $0x1b0] sm:$0xff] }
 0x860   :  { %v5623_v48 = vpack.c.bf16 %v87_v46, %v84_v44  ;;  %v5641_v44 = vpack.c.bf16 %v123_v36, %v120_v35  ;;  %v147_v35 = vld [vmem:[#allocation4 + $0x270] sm:$0xff]  ;;  %v149_v36 = vld [vmem:[#allocation4 + $0x2b8] sm:$0xff] }
 0x861   :  { %v1609_v54 = vrot.slane %v1602_v53, %v6490_v25  ;;  %v5595_v53 = vpack.c.bf16 %v92_v52, %v89_v49 }
 0x863   :  { %v1616_v57 = vrot.slane %v1609_v54, %v6490_v25  ;;  %v88_v54 = vld [vmem:[#allocation4 + $0x158] sm:$0xff] }
 0x865   :  { %v1618_v58 = vadd.f32 %v3918_v55, %v1616_v57  ;;  %v91_v55 = vld [vmem:[#allocation4 + $0x1a8] sm:$0xff] }
 0x866   :  { %v90_v57 = vld [vmem:[#allocation4 + $0x168] sm:$0xff] }
 0x867   :  { %v3919_v61 = vmul.f32 -1.442695, %v1618_v58  ;;  %v5597_v58 = vpack.c.bf16 %v91_v55, %v88_v54  ;;  %v3922_v55 = vld [vmem:[%s7290_s0 + $0x31] ss:$8 sm:$0x7] }
 0x869   :  { %6228 = vpow2.f32 %v3919_v61  ;;  %v93_v61 = vld [vmem:[#allocation4 + $0x1b8] sm:$0xff] }
 0x873   :  { %v6229_v62 = vpop.eup %6228 }
 0x874   :  { %v1622_v5 = vadd.f32 1.0, %v6229_v62  ;;  %v5626_v62 = vpack.c.bf16 %v93_v61, %v90_v57 }
 0x876   :  { %6230 = vrcp.f32 %v1622_v5  ;;  %v95_v5 = vld [vmem:[#allocation4 + $0x200] sm:$0xff] }
 0x880   :  { %v6231_v7 = vpop.eup %6230 }
 0x881   :  { %v1626_v8 = vmul.f32 %v6231_v7, %v1625_v2  ;;  %v1634_v18 = vrot.slane %v6231_v7, 1  ;;  %v98_v2 = vld [vmem:[#allocation4 + $0x250] sm:$0xff]  ;;  %v94_v7 = vld [vmem:[#allocation4 + $0x1f8] sm:$0xff] }
 0x883   :  { %v1630_v12 = vadd.f32 %v1628_v3, %v1626_v8  ;;  %v5599_v3 = vpack.c.bf16 %v98_v2, %v95_v5  ;;  %v97_v8 = vld [vmem:[#allocation4 + $0x248] sm:$0xff]  ;;  %v6300_v2 = vld [vmem:[%s7292_s2] sm:$0x1] }
 0x885   :  { %6232 = vtanh.f32 %v1630_v12  ;;  %v96_v12 = vld [vmem:[#allocation4 + $0x208] sm:$0xff] }
 0x88f   :  { %v6233_v13 = vpop.eup %6232 }
 0x890   :  { %v1632_v17 = vsub.f32 %v1456_v45, %v6233_v13  ;;  %v5593_v45 = vpack.c.bf16 %v85_v40, %v82_v39  ;;  %v128_v39 = vld [vmem:[#allocation4 + $0x88] sm:$0xff] }
 0x892   :  { %v1636_v19 = vmul.f32 %v1634_v18, %v1632_v17  ;;  %v99_v17 = vld [vmem:[#allocation4 + $0x258] sm:$0xff] }
 0x893   :  { %v5629_v18 = vpack.c.bf16 %v99_v17, %v96_v12 }
 0x894   :  { %v1637_v20 = vadd.f32 %v6233_v13, %v1636_v19  ;;  %v5601_v13 = vpack.c.bf16 %v97_v8, %v94_v7  ;;  %v101_v19 = vld [vmem:[#allocation4 + $0x2a0] sm:$0xff]  ;;  %v1990_v7 = vrot.slane %v3922_v55, 2 }
 0x896   :  { %1705 = vmatmul.mubr.f32.vlgmr.msra.gmra.mrb[16].mxu0 %v1637_v20  ;;  %4605 = vmatmul.mubr.f32.vlgmr.msra.gmra.mrb[16].mxu1 %v1637_v20 }
 0x897   :  { %5534 = vmatpush1.bf16.msra.mxu0 %v6371_v9  ;;  %5565 = vmatpush3.bf16.msra.mxu1 %v6391_v32 }
 0x898   :  { %5536 = vmatprep.subr.bf16.mxu0 %v6373_v10  ;;  %5566 = vmatprep.subr.bf16.mxu1 %v6329_v1 }
 0x899   :  { %1885 = vmatprep.mubr.f32.mxu0 %v6328_v0  ;;  %4639 = vmatprep.mubr.msk.f32.mxu1 %vm6330_vm0, %v6328_v0 }
 0x89b   :  { %5538 = vmatpush1.bf16.msra.mxu0 %v6377_v15  ;;  %5568 = vmatpush3.bf16.msra.mxu1 %v6397_v38 }
 0x89c   :  { %5540 = vmatprep.subr.bf16.mxu0 %v6380_v16  ;;  %5569 = vmatprep.subr.bf16.mxu1 %v6329_v1 }
 0x89f   :  { %5542 = vmatpush1.bf16.msra.mxu0 %v6383_v21  ;;  %5571 = vmatpush3.bf16.msra.mxu1 %v6407_v47 }
 0x8a0   :  { %5544 = vmatprep.subr.bf16.mxu0 %v6386_v22  ;;  %5572 = vmatprep.subr.bf16.mxu1 %v6329_v1 }
 0x8a3   :  { %5546 = vmatpush1.bf16.msra.mxu0 %v6389_v31  ;;  %5574 = vmatpush3.bf16.msra.mxu1 %v6417_v56  ;;  %v3920_v31 = vld [vmem:[%s7290_s0 + $0x30] ss:$8 sm:$0x7] }
 0x8a4   :  { %5548 = vmatprep.subr.bf16.mxu0 %v6394_v33  ;;  %5575 = vmatprep.subr.bf16.mxu1 %v6329_v1 }
 0x8a7   :  { %5550 = vmatpush1.bf16.msra.mxu0 %v6401_v41  ;;  %5577 = vmatpush3.bf16.msra.mxu1 %v6427_v63 }
 0x8a8   :  { %5552 = vmatprep.subr.bf16.mxu0 %v6404_v42  ;;  %5578 = vmatprep.subr.bf16.mxu1 %v6329_v1 }
 0x8ab   :  { %5554 = vmatpush1.bf16.msra.mxu0 %v6411_v50  ;;  %5580 = vmatpush3.bf16.msra.mxu1 %v6435_v6  ;;  %v1809_v50 = vrot.slane %v3920_v31, 2 }
 0x8ac   :  { %5556 = vmatprep.subr.bf16.mxu0 %v6414_v51  ;;  %5581 = vmatprep.subr.bf16.mxu1 %v6329_v1 }
 0x8af   :  { %5558 = vmatpush1.bf16.msra.mxu0 %v6421_v59  ;;  %5583 = vmatpush3.bf16.msra.mxu1 %v6441_v11 }
 0x8b0   :  { %5560 = vmatprep.subr.bf16.mxu0 %v6424_v60  ;;  %5584 = vmatprep.subr.bf16.mxu1 %v6329_v1 }
 0x8b3   :  { %5562 = vmatpush1.bf16.msra.mxu0 %v6431_v4  ;;  %5586 = vmatpush3.bf16.msra.mxu1 %v6449_v14  ;;  %v77_v14 = vld [vmem:[#allocation4 + $0x20] sm:$0xff] }
 0x8b4   :  { %5619 = vmatprep.subr.bf16.mxu1 %v6329_v1 }
 0x969   :  { %v1706_v9 = vpop.f32.mrb[16].mxu0  ;;  %v1777_v10 = vpop.f32.mrb[16].mxu1 }
 0x96a   :  { %v1708_v15 = vpop.f32.mrb[17].mxu0  ;;  %v4606_v16 = vpop.f32.mrb[17].mxu1  ;;  %v1806_v47 = vadd.f32 %v1777_v10, %v6500_v43  ;;  %v80_v43 = vld [vmem:[#allocation4 + $0x70] sm:$0xff]  ;;  %v100_v10 = vld [vmem:[#allocation4 + $0x298] sm:$0xff] }
 0x96b   :  { %v1783_v21 = vcombine.low %v1706_v9, %v1708_v15  ;;  %v5587_v24 = vpack.c.bf16 %v80_v43, %v77_v14  ;;  %v103_v15 = vld [vmem:[#allocation4 + $0x2e8] sm:$0xff]  ;;  %v117_v43 = vld [vmem:[#allocation4 + $0x438] sm:$0xff] }
 0x96c   :  { %v102_v16 = vld [vmem:[#allocation4 + $0x2a8] sm:$0xff] }
 0x96d   :  { %v1790_v22 = vrot.slane %v1783_v21, %v6490_v25  ;;  %5588 = vmatprep.subr.bf16.mxu0 %v5587_v24  ;;  %v5605_v21 = vpack.c.bf16 %v103_v15, %v100_v10  ;;  %v114_v14 = vld [vmem:[#allocation4 + $0x3e8] sm:$0xff]  ;;  %v119_v24 = vld [vmem:[#allocation4 + $0x480] sm:$0xff]  ;;  %v129_v15 = vld [vmem:[#allocation4 + $0x90] sm:$0xff] }
 0x96e   :  { %v5638_v28 = vpack.c.bf16 %v117_v43, %v114_v14  ;;  %v126_v10 = vld [vmem:[#allocation4 + $0x40] sm:$0xff]  ;;  %v141_v14 = vld [vmem:[#allocation4 + $0x1d0] sm:$0xff]  ;;  %v143_v43 = vld [vmem:[#allocation4 + $0x218] sm:$0xff] }
 0x96f   :  { %v1797_v32 = vrot.slane %v1790_v22, %v6490_v25  ;;  %v105_v22 = vld [vmem:[#allocation4 + $0x2f8] sm:$0xff] }
 0x971   :  { %v1799_v33 = vadd.f32 %v3920_v31, %v1797_v32  ;;  %v5632_v31 = vpack.c.bf16 %v105_v22, %v102_v16  ;;  %v107_v32 = vld [vmem:[#allocation4 + $0x340] sm:$0xff]  ;;  %v131_v16 = vld [vmem:[#allocation4 + $0xd8] sm:$0xff] }
 0x973   :  { %v3921_v38 = vmul.f32 -1.442695, %v1799_v33  ;;  %v110_v33 = vld [vmem:[#allocation4 + $0x390] sm:$0xff] }
 0x975   :  { %6234 = vpow2.f32 %v3921_v38  ;;  %v106_v38 = vld [vmem:[#allocation4 + $0x338] sm:$0xff] }
 0x97f   :  { %v6235_v41 = vpop.eup %6234 }
 0x980   :  { %v1803_v42 = vadd.f32 1.0, %v6235_v41  ;;  %v5607_v41 = vpack.c.bf16 %v110_v33, %v107_v32  ;;  %v6859_v32 = vpack.c.bf16 %v129_v15, %v126_v10  ;;  %v130_v33 = vld [vmem:[#allocation4 + $0xd0] sm:$0xff]  ;;  %v170_v10 = vld [vmem:[#allocation4 + $0x4e8] sm:$0xff] }
 0x982   :  { %6236 = vrcp.f32 %v1803_v42  ;;  %v109_v42 = vld [vmem:[#allocation4 + $0x388] sm:$0xff] }
 0x98c   :  { %v6237_v51 = vpop.eup %6236 }
 0x98d   :  { %v1807_v56 = vmul.f32 %v6237_v51, %v1806_v47  ;;  %v1815_v4 = vrot.slane %v6237_v51, 1  ;;  %v108_v47 = vld [vmem:[#allocation4 + $0x348] sm:$0xff]  ;;  %v5609_v51 = vpack.c.bf16 %v109_v42, %v106_v38  ;;  %v133_v42 = vld [vmem:[#allocation4 + $0x120] sm:$0xff] }
 0x98f   :  { %v1811_v59 = vadd.f32 %v1809_v50, %v1807_v56  ;;  %v111_v50 = vld [vmem:[#allocation4 + $0x398] sm:$0xff] }
 0x990   :  { %v5635_v56 = vpack.c.bf16 %v111_v50, %v108_v47  ;;  %v132_v47 = vld [vmem:[#allocation4 + $0xe0] sm:$0xff]  ;;  %v135_v50 = vld [vmem:[#allocation4 + $0x130] sm:$0xff] }
 0x991   :  { %6238 = vtanh.f32 %v1811_v59  ;;  %v113_v59 = vld [vmem:[#allocation4 + $0x3e0] sm:$0xff] }
 0x99b   :  { %v6239_v60 = vpop.eup %6238 }
 0x99c   :  { %v1813_v63 = vsub.f32 %v1637_v20, %v6239_v60  ;;  %v104_v20 = vld [vmem:[#allocation4 + $0x2f0] sm:$0xff] }
 0x99d   :  { %v5603_v9 = vpack.c.bf16 %v104_v20, %v101_v19 }
 0x99e   :  { %v1817_v6 = vmul.f32 %v1815_v4, %v1813_v63  ;;  %v112_v63 = vld [vmem:[#allocation4 + $0x3d8] sm:$0xff] }
 0x9a0   :  { %v6830_v11 = vadd.f32 %v6239_v60, %v1817_v6  ;;  %v116_v60 = vld [vmem:[#allocation4 + $0x430] sm:$0xff]  ;;  %v115_v6 = vld [vmem:[#allocation4 + $0x428] sm:$0xff] }
 0x9a1   :  { %v5611_v4 = vpack.c.bf16 %v116_v60, %v113_v59  ;;  %v5613_v27 = vpack.c.bf16 %v115_v6, %v112_v63  ;;  %v6871_v59 = vpack.c.bf16 %v135_v50, %v132_v47  ;;  %v136_v60 = vld [vmem:[#allocation4 + $0x170] sm:$0xff]  ;;  %v138_v6 = vld [vmem:[#allocation4 + $0x180] sm:$0xff] }
 0x9a2   :  { %1886 = vmatmul.mubr.f32.vlgmr.msra.gmra.mrb[18].mxu0 %v6830_v11  ;;  %4640 = vmatmul.mubr.f32.vlgmr.msra.gmra.mrb[18].mxu1 %v6830_v11  ;;  %v171_v47 = vld [vmem:[#allocation4 + $0x4f0] sm:$0xff] }
 0x9a3   :  { %2064 = vmatprep.mubr.f32.mxu0 %v6328_v0  ;;  %4674 = vmatprep.mubr.msk.f32.mxu1 %vm6330_vm0, %v6328_v0 }
 0x9a4   :  { %5590 = vmatpush1.bf16.msra.mxu0 %v5589_v29  ;;  %5621 = vmatpush3.bf16.msra.mxu1 %v5620_v34  ;;  %v5615_v29 = vpack.c.bf16 %v122_v26, %v119_v24  ;;  %v121_v34 = vld [vmem:[#allocation4 + $0x4c8] sm:$0xff] }
 0x9a5   :  { %5622 = vmatprep.subr.bf16.mxu1 %v6329_v1  ;;  %5592 = vmatprep.subr.bf16.mxu0 %v5591_v37  ;;  %v125_v37 = vld [vmem:[#allocation4 + $0x38] sm:$0xff]  ;;  %v5617_v40 = vpack.c.bf16 %v121_v34, %v118_v30  ;;  %v146_v24 = vld [vmem:[#allocation4 + $0x268] sm:$0xff]  ;;  %v145_v30 = vld [vmem:[#allocation4 + $0x260] sm:$0xff] }
 0x9a6   :  { %v144_v34 = vld [vmem:[#allocation4 + $0x220] sm:$0xff] }
 0x9a8   :  { %5594 = vmatpush1.bf16.msra.mxu0 %v5593_v45  ;;  %5624 = vmatpush3.bf16.msra.mxu1 %v5623_v48  ;;  %v6843_v45 = vpack.c.bf16 %v128_v39, %v125_v37  ;;  %v152_v37 = vld [vmem:[#allocation4 + $0x308] sm:$0xff] }
 0x9a9   :  { %5625 = vmatprep.subr.bf16.mxu1 %v6329_v1  ;;  %5596 = vmatprep.subr.bf16.mxu0 %v5595_v53 }
 0x9ac   :  { %5598 = vmatpush1.bf16.msra.mxu0 %v5597_v58  ;;  %5627 = vmatpush3.bf16.msra.mxu1 %v5626_v62 }
 0x9ad   :  { %5628 = vmatprep.subr.bf16.mxu1 %v6329_v1  ;;  %5600 = vmatprep.subr.bf16.mxu0 %v5599_v3 }
 0x9b0   :  { %5602 = vmatpush1.bf16.msra.mxu0 %v5601_v13  ;;  %5630 = vmatpush3.bf16.msra.mxu1 %v5629_v18  ;;  %v124_v18 = vld [vmem:[#allocation4 + $0x30] sm:$0xff] }
 0x9b1   :  { %5631 = vmatprep.subr.bf16.mxu1 %v6329_v1  ;;  %5604 = vmatprep.subr.bf16.mxu0 %v5603_v9  ;;  %v127_v9 = vld [vmem:[#allocation4 + $0x80] sm:$0xff] }
 0x9b4   :  { %5606 = vmatpush1.bf16.msra.mxu0 %v5605_v21  ;;  %5633 = vmatpush3.bf16.msra.mxu1 %v5632_v31  ;;  %v134_v21 = vld [vmem:[#allocation4 + $0x128] sm:$0xff]  ;;  %v6857_v31 = vpack.c.bf16 %v127_v9, %v124_v18  ;;  %v163_v18 = vld [vmem:[#allocation4 + $0x440] sm:$0xff]  ;;  %v167_v9 = vld [vmem:[#allocation4 + $0x498] sm:$0xff] }
 0x9b5   :  { %5608 = vmatprep.subr.bf16.mxu0 %v5607_v41  ;;  %5634 = vmatprep.subr.bf16.mxu1 %v6329_v1  ;;  %v6863_v41 = vpack.c.bf16 %v134_v21, %v131_v16  ;;  %v166_v21 = vld [vmem:[#allocation4 + $0x490] sm:$0xff] }
 0x9b8   :  { %5610 = vmatpush1.bf16.msra.mxu0 %v5609_v51  ;;  %5636 = vmatpush3.bf16.msra.mxu1 %v5635_v56  ;;  %v140_v51 = vld [vmem:[#allocation4 + $0x1c8] sm:$0xff]  ;;  %v6869_v56 = vpack.c.bf16 %v133_v42, %v130_v33  ;;  %v169_v33 = vld [vmem:[#allocation4 + $0x4e0] sm:$0xff] }
 0x9b9   :  { %5612 = vmatprep.subr.bf16.mxu0 %v5611_v4  ;;  %5637 = vmatprep.subr.bf16.mxu1 %v6329_v1  ;;  %v139_v4 = vld [vmem:[#allocation4 + $0x1c0] sm:$0xff]  ;;  %v6932_v50 = vpack.c.bf16 %v169_v33, %v166_v21 }
 0x9ba   :  { %v6882_v26 = vpack.c.bf16 %v139_v4, %v136_v60  ;;  %v168_v42 = vld [vmem:[#allocation4 + $0x4a0] sm:$0xff]  ;;  %v2144_v60 = vld [vmem:[%s7290_s0 + $0x48] sm:$0x3] }
 0x9bb   :  { %v7003_v33 = vld [vmem:[%s7292_s2 + $0x1] sm:$0x1] }
 0x9bc   :  { %5614 = vmatpush1.bf16.msra.mxu0 %v5613_v27  ;;  %5639 = vmatpush3.bf16.msra.mxu1 %v5638_v28  ;;  %v6884_v27 = vpack.c.bf16 %v141_v14, %v138_v6  ;;  %v142_v28 = vld [vmem:[#allocation4 + $0x210] sm:$0xff]  ;;  %v2141_v6 = vld [vmem:[%s7290_s0 + $0x18] sm:$0xff] }
 0x9bd   :  { %5616 = vmatprep.subr.bf16.mxu0 %v5615_v29  ;;  %5640 = vmatprep.subr.bf16.mxu1 %v6329_v1  ;;  %v6888_v29 = vpack.c.bf16 %v146_v24, %v143_v43  ;;  %v6892_v39 = vpack.c.bf16 %v145_v30, %v142_v28  ;;  %v2143_v43 = vld [vmem:[%s7290_s0 + $0x28] sm:$0xff]  ;;  %v2146_v24 = vld [vmem:[%s7290_s0 + $0x58] sm:$0x3] }
 0x9c0   :  { %5618 = vmatpush1.bf16.msra.mxu0 %v5617_v40  ;;  %5642 = vmatpush3.bf16.msra.mxu1 %v5641_v44  ;;  %v6894_v40 = vpack.c.bf16 %v147_v35, %v144_v34  ;;  %v148_v44 = vld [vmem:[#allocation4 + $0x2b0] sm:$0xff]  ;;  %v2142_v35 = vld [vmem:[%s7290_s0 + $0x20] sm:$0xff] }
 0x9c1   :  { %5644 = vmatprep.subr.bf16.mxu0 %v6843_v45  ;;  %5675 = vmatprep.subr.bf16.mxu1 %v6329_v1 }
 0xa75   :  { %v1887_v46 = vpop.f32.mrb[18].mxu0  ;;  %v1958_v48 = vpop.f32.mrb[18].mxu1 }
 0xa76   :  { %v1889_v49 = vpop.f32.mrb[19].mxu0  ;;  %v4641_v52 = vpop.f32.mrb[19].mxu1  ;;  %v1987_v3 = vadd.f32 %v6300_v2, %v1958_v48  ;;  %v151_v48 = vld [vmem:[#allocation4 + $0x300] sm:$0xff]  ;;  %v159_v2 = vld [vmem:[#allocation4 + $0x3b0] sm:$0xff] }
 0xa77   :  { %v1964_v53 = vcombine.low %v1887_v46, %v1889_v49  ;;  %v6898_v46 = vpack.c.bf16 %v152_v37, %v149_v36  ;;  %v150_v49 = vld [vmem:[#allocation4 + $0x2c0] sm:$0xff]  ;;  %v153_v52 = vld [vmem:[#allocation4 + $0x310] sm:$0xff] }
 0xa78   :  { %v2145_v36 = vld [vmem:[%s7290_s0 + $0x50] sm:$0x3] }
 0xa79   :  { %v1971_v54 = vrot.slane %v1964_v53, %v6490_v25  ;;  %v155_v53 = vld [vmem:[#allocation4 + $0x358] sm:$0xff] }
 0xa7b   :  { %v1978_v57 = vrot.slane %v1971_v54, %v6490_v25  ;;  %v158_v54 = vld [vmem:[#allocation4 + $0x3a8] sm:$0xff] }
 0xa7d   :  { %v1980_v58 = vadd.f32 %v3922_v55, %v1978_v57  ;;  %v6902_v55 = vpack.c.bf16 %v151_v48, %v148_v44  ;;  %v6904_v57 = vpack.c.bf16 %v153_v52, %v150_v49 }
 0xa7f   :  { %v3923_v61 = vmul.f32 -1.442695, %v1980_v58  ;;  %v154_v58 = vld [vmem:[#allocation4 + $0x350] sm:$0xff] }
 0xa81   :  { %6240 = vpow2.f32 %v3923_v61  ;;  %v6908_v61 = vpack.c.bf16 %v158_v54, %v155_v53 }
 0xa8b   :  { %v6241_v62 = vpop.eup %6240 }
 0xa8c   :  { %v1984_v5 = vadd.f32 1.0, %v6241_v62  ;;  %v157_v62 = vld [vmem:[#allocation4 + $0x3a0] sm:$0xff] }
 0xa8e   :  { %6242 = vrcp.f32 %v1984_v5  ;;  %v156_v5 = vld [vmem:[#allocation4 + $0x360] sm:$0xff] }
 0xa98   :  { %v6243_v8 = vpop.eup %6242 }
 0xa99   :  { %v1988_v12 = vmul.f32 %v6243_v8, %v1987_v3  ;;  %v1996_v20 = vrot.slane %v6243_v8, 1  ;;  %v161_v3 = vld [vmem:[#allocation4 + $0x3f8] sm:$0xff]  ;;  %v6912_v8 = vpack.c.bf16 %v157_v62, %v154_v58 }
 0xa9b   :  { %v1992_v13 = vadd.f32 %v1990_v7, %v1988_v12  ;;  %v164_v7 = vld [vmem:[#allocation4 + $0x448] sm:$0xff]  ;;  %v6914_v12 = vpack.c.bf16 %v159_v2, %v156_v5 }
 0xa9d   :  { %6244 = vtanh.f32 %v1992_v13  ;;  %v160_v13 = vld [vmem:[#allocation4 + $0x3f0] sm:$0xff] }
 0xa9e   :  { %v6922_v15 = vpack.c.bf16 %v163_v18, %v160_v13 }
 0xaa7   :  { %v6245_v17 = vpop.eup %6244 }
 0xaa8   :  { %v1994_v19 = vsub.f32 %v6830_v11, %v6245_v17  ;;  %v137_v11 = vld [vmem:[#allocation4 + $0x178] sm:$0xff] }
 0xaa9   :  { %v6875_v63 = vpack.c.bf16 %v140_v51, %v137_v11  ;;  %v6934_v11 = vpack.c.bf16 %v171_v47, %v168_v42  ;;  %v2149_v51 = vsub.s32 0, %v6487_v23 }
 0xaaa   :  { %v1998_v22 = vmul.f32 %v1996_v20, %v1994_v19  ;;  %v162_v19 = vld [vmem:[#allocation4 + $0x400] sm:$0xff]  ;;  %v165_v20 = vld [vmem:[#allocation4 + $0x450] sm:$0xff] }
 0xaab   :  { %v6924_v16 = vpack.c.bf16 %v165_v20, %v162_v19 }
 0xaac   :  { %v6861_v38 = vadd.f32 %v6245_v17, %v1998_v22  ;;  %v6918_v17 = vpack.c.bf16 %v164_v7, %v161_v3  ;;  %v6928_v22 = vpack.c.bf16 %v170_v10, %v167_v9 }
 0xaae   :  { %2065 = vmatmul.mubr.f32.vlgmr.msra.gmra.mrb[20].mxu0 %v6861_v38  ;;  %4675 = vmatmul.mubr.f32.vlgmr.msra.gmra.mrb[20].mxu1 %v6861_v38 }
 0xaaf   :  { %5646 = vmatpush1.bf16.msra.mxu0 %v6857_v31  ;;  %5677 = vmatpush3.bf16.msra.mxu1 %v6859_v32 }
 0xab0   :  { %5648 = vmatprep.subr.bf16.mxu0 %v6863_v41  ;;  %5678 = vmatprep.subr.bf16.mxu1 %v6329_v1 }
 0xab1   :  { %2238 = vmatprep.mubr.f32.mxu0 %v6328_v0  ;;  %4709 = vmatprep.mubr.msk.f32.mxu1 %vm6330_vm0, %v6328_v0 }
 0xab3   :  { %5650 = vmatpush1.bf16.msra.mxu0 %v6869_v56  ;;  %5680 = vmatpush3.bf16.msra.mxu1 %v6871_v59 }
 0xab4   :  { %5652 = vmatprep.subr.bf16.mxu0 %v6875_v63  ;;  %5681 = vmatprep.subr.bf16.mxu1 %v6329_v1 }
 0xab7   :  { %5654 = vmatpush1.bf16.msra.mxu0 %v6882_v26  ;;  %5683 = vmatpush3.bf16.msra.mxu1 %v6884_v27 }
 0xab8   :  { %5656 = vmatprep.subr.bf16.mxu0 %v6888_v29  ;;  %5684 = vmatprep.subr.bf16.mxu1 %v6329_v1 }
 0xabb   :  { %5658 = vmatpush1.bf16.msra.mxu0 %v6892_v39  ;;  %5686 = vmatpush3.bf16.msra.mxu1 %v6894_v40 }
 0xabc   :  { %5660 = vmatprep.subr.bf16.mxu0 %v6898_v46  ;;  %5687 = vmatprep.subr.bf16.mxu1 %v6329_v1 }
 0xabf   :  { %5662 = vmatpush1.bf16.msra.mxu0 %v6902_v55  ;;  %5689 = vmatpush3.bf16.msra.mxu1 %v6904_v57 }
 0xac0   :  { %5664 = vmatprep.subr.bf16.mxu0 %v6908_v61  ;;  %5690 = vmatprep.subr.bf16.mxu1 %v6329_v1 }
 0xac3   :  { %5666 = vmatpush1.bf16.msra.mxu0 %v6912_v8  ;;  %5692 = vmatpush3.bf16.msra.mxu1 %v6914_v12 }
 0xac4   :  { %5668 = vmatprep.subr.bf16.mxu0 %v6918_v17  ;;  %5693 = vmatprep.subr.bf16.mxu1 %v6329_v1 }
 0xac7   :  { %5670 = vmatpush1.bf16.msra.mxu0 %v6922_v15  ;;  %5695 = vmatpush3.bf16.msra.mxu1 %v6924_v16 }
 0xac8   :  { %5672 = vmatprep.subr.bf16.mxu0 %v6928_v22  ;;  %5696 = vmatprep.subr.bf16.mxu1 %v6329_v1 }
 0xacb   :  { %5674 = vmatpush1.bf16.msra.mxu0 %v6932_v50  ;;  %5698 = vmatpush3.bf16.msra.mxu1 %v6934_v11 }
 0xacc   :  { %5700 = vmatprep.subr.bf16.mxu0 %v6843_v45  ;;  %5731 = vmatprep.subr.bf16.mxu1 %v6329_v1 }
 0xace   :  { %2239 = vmatmul.mubr.f32.vlgmr.msra.gmra.mrb[22].mxu0 %v6861_v38  ;;  %4710 = vmatmul.mubr.f32.vlgmr.msra.gmra.mrb[22].mxu1 %v6861_v38 }
 0xacf   :  { %5702 = vmatpush1.bf16.msra.mxu0 %v6857_v31  ;;  %5733 = vmatpush3.bf16.msra.mxu1 %v6859_v32 }
 0xad0   :  { %5704 = vmatprep.subr.bf16.mxu0 %v6863_v41  ;;  %5734 = vmatprep.subr.bf16.mxu1 %v6329_v1 }
 0xad1   :  { %2420 = vmatprep.mubr.f32.mxu0 %v6328_v0  ;;  %4744 = vmatprep.mubr.msk.f32.mxu1 %vm6330_vm0, %v6328_v0 }
 0xad3   :  { %5706 = vmatpush1.bf16.msra.mxu0 %v6869_v56  ;;  %5736 = vmatpush3.bf16.msra.mxu1 %v6871_v59 }
 0xad4   :  { %5708 = vmatprep.subr.bf16.mxu0 %v6875_v63  ;;  %5737 = vmatprep.subr.bf16.mxu1 %v6329_v1 }
 0xad7   :  { %5710 = vmatpush1.bf16.msra.mxu0 %v6882_v26  ;;  %5739 = vmatpush3.bf16.msra.mxu1 %v6884_v27 }
 0xad8   :  { %5712 = vmatprep.subr.bf16.mxu0 %v6888_v29  ;;  %5740 = vmatprep.subr.bf16.mxu1 %v6329_v1 }
 0xadb   :  { %5714 = vmatpush1.bf16.msra.mxu0 %v6892_v39  ;;  %5742 = vmatpush3.bf16.msra.mxu1 %v6894_v40 }
 0xadc   :  { %5716 = vmatprep.subr.bf16.mxu0 %v6898_v46  ;;  %5743 = vmatprep.subr.bf16.mxu1 %v6329_v1 }
 0xadf   :  { %5718 = vmatpush1.bf16.msra.mxu0 %v6902_v55  ;;  %5745 = vmatpush3.bf16.msra.mxu1 %v6904_v57 }
 0xae0   :  { %5720 = vmatprep.subr.bf16.mxu0 %v6908_v61  ;;  %5746 = vmatprep.subr.bf16.mxu1 %v6329_v1 }
 0xae3   :  { %5722 = vmatpush1.bf16.msra.mxu0 %v6912_v8  ;;  %5748 = vmatpush3.bf16.msra.mxu1 %v6914_v12 }
 0xae4   :  { %5724 = vmatprep.subr.bf16.mxu0 %v6918_v17  ;;  %5749 = vmatprep.subr.bf16.mxu1 %v6329_v1 }
 0xae7   :  { %5726 = vmatpush1.bf16.msra.mxu0 %v6922_v15  ;;  %5751 = vmatpush3.bf16.msra.mxu1 %v6924_v16 }
 0xae8   :  { %5728 = vmatprep.subr.bf16.mxu0 %v6928_v22  ;;  %5752 = vmatprep.subr.bf16.mxu1 %v6329_v1 }
 0xaeb   :  { %5730 = vmatpush1.bf16.msra.mxu0 %v6932_v50  ;;  %5754 = vmatpush3.bf16.msra.mxu1 %v6934_v11 }
 0xaec   :  { %5756 = vmatprep.subr.bf16.mxu0 %v6843_v45  ;;  %5787 = vmatprep.subr.bf16.mxu1 %v6329_v1 }
 0xb81   :  { %v2066_v4 = vpop.f32.mrb[20].mxu0  ;;  %v2137_v14 = vpop.f32.mrb[20].mxu1 }
 0xb82   :  { %v2150_v28 = vrot.slane %v2066_v4, %v2149_v51  ;;  %v2158_v30 = vrot.slane %v2137_v14, %v2149_v51  ;;  %v2068_v34 = vpop.f32.mrb[21].mxu0  ;;  %v4676_v37 = vpop.f32.mrb[21].mxu1 }
 0xb83   :  { %v2154_v44 = vrot.slane %v2068_v34, %v2149_v51 }
 0xb84   :  { %v2159_v48 = vadd.f32 %v2150_v28, %v2141_v6  ;;  %v2162_v49 = vadd.f32 %v2150_v28, %v2144_v60  ;;  %v2161_v52 = vadd.f32 %v2158_v30, %v2143_v43  ;;  %v2164_v53 = vadd.f32 %v2158_v30, %v2146_v24 }
 0xb85   :  { %v2160_v54 = vadd.f32 %v2154_v44, %v2142_v35  ;;  %v2163_v58 = vadd.f32 %v2154_v44, %v2145_v36 }
 0xb86   :  { %2165 = vst [vmem:[#allocation2] sm:$0xff] %v2159_v48  ;;  %2168 = vst [vmem:[#allocation2 + $0x18] sm:$0x3] %v2162_v49 }
 0xb87   :  { %2167 = vst [vmem:[#allocation2 + $0x10] sm:$0xff] %v2161_v52  ;;  %2170 = vst [vmem:[#allocation2 + $0x28] sm:$0x3] %v2164_v53 }
 0xb88   :  { %2166 = vst [vmem:[#allocation2 + $0x8] sm:$0xff] %v2160_v54  ;;  %2169 = vst [vmem:[#allocation2 + $0x20] sm:$0x3] %v2163_v58 }
 0xb8f   :  { %v2173_v19 = vld [vmem:[#allocation2 + $0x1] ss:$8 sm:$0x7]  ;;  %v2355_v48 = vld [vmem:[#allocation2 + $0x2] ss:$8 sm:$0x7] }
 0xb90   :  { %v2343_v60 = vrot.slane %v2173_v19, 2 }
 0xba1   :  { %v2240_v62 = vpop.f32.mrb[22].mxu0  ;;  %v2311_v5 = vpop.f32.mrb[22].mxu1 }
 0xba2   :  { %v2242_v2 = vpop.f32.mrb[23].mxu0  ;;  %v4711_v3 = vpop.f32.mrb[23].mxu1  ;;  %v2340_v42 = vadd.f32 %v2311_v5, %v7003_v33 }
 0xba3   :  { %v2317_v7 = vcombine.low %v2240_v62, %v2242_v2  ;;  %v2525_v2 = vrot.slane %v2355_v48, 2 }
 0xba5   :  { %v2324_v13 = vrot.slane %v2317_v7, %v6490_v25 }
 0xba7   :  { %v2331_v18 = vrot.slane %v2324_v13, %v6490_v25 }
 0xba9   :  { %v2333_v20 = vadd.f32 %v2331_v18, %v2173_v19 }
 0xbab   :  { %v3924_v9 = vmul.f32 -1.442695, %v2333_v20 }
 0xbad   :  { %6246 = vpow2.f32 %v3924_v9 }
 0xbb7   :  { %v6247_v10 = vpop.eup %6246 }
 0xbb8   :  { %v2337_v21 = vadd.f32 1.0, %v6247_v10 }
 0xbba   :  { %6248 = vrcp.f32 %v2337_v21 }
 0xbc4   :  { %v6249_v47 = vpop.eup %6248 }
 0xbc5   :  { %v2341_v51 = vmul.f32 %v6249_v47, %v2340_v42  ;;  %v2349_v43 = vrot.slane %v6249_v47, 1 }
 0xbc7   :  { %v2345_v4 = vadd.f32 %v2343_v60, %v2341_v51 }
 0xbc9   :  { %6250 = vtanh.f32 %v2345_v4  ;;  %v2537_v4 = vld [vmem:[#allocation2 + $0x3] ss:$8 sm:$0x7] }
 0xbd3   :  { %v6251_v6 = vpop.eup %6250 }
 0xbd4   :  { %v2347_v14 = vsub.f32 %v6861_v38, %v6251_v6 }
 0xbd6   :  { %v2351_v24 = vmul.f32 %v2349_v43, %v2347_v14 }
 0xbd8   :  { %v2352_v28 = vadd.f32 %v6251_v6, %v2351_v24 }
 0xbda   :  { %2353 = vst [vmem:[#allocation3 + $0x1] sm:$0x1] %v2352_v28  ;;  %2421 = vmatmul.mubr.f32.vlgmr.msra.gmra.mrb[24].mxu0 %v2352_v28  ;;  %4745 = vmatmul.mubr.f32.vlgmr.msra.gmra.mrb[24].mxu1 %v2352_v28 }
 0xbdb   :  { %5758 = vmatpush1.bf16.msra.mxu0 %v6857_v31  ;;  %5789 = vmatpush3.bf16.msra.mxu1 %v6859_v32 }
 0xbdc   :  { %5760 = vmatprep.subr.bf16.mxu0 %v6863_v41  ;;  %5790 = vmatprep.subr.bf16.mxu1 %v6329_v1 }
 0xbdd   :  { %2602 = vmatprep.mubr.f32.mxu0 %v6328_v0  ;;  %4779 = vmatprep.mubr.msk.f32.mxu1 %vm6330_vm0, %v6328_v0 }
 0xbdf   :  { %5762 = vmatpush1.bf16.msra.mxu0 %v6869_v56  ;;  %5792 = vmatpush3.bf16.msra.mxu1 %v6871_v59 }
 0xbe0   :  { %5764 = vmatprep.subr.bf16.mxu0 %v6875_v63  ;;  %5793 = vmatprep.subr.bf16.mxu1 %v6329_v1 }
 0xbe3   :  { %5766 = vmatpush1.bf16.msra.mxu0 %v6882_v26  ;;  %5795 = vmatpush3.bf16.msra.mxu1 %v6884_v27 }
 0xbe4   :  { %5768 = vmatprep.subr.bf16.mxu0 %v6888_v29  ;;  %5796 = vmatprep.subr.bf16.mxu1 %v6329_v1 }
 0xbe7   :  { %5770 = vmatpush1.bf16.msra.mxu0 %v6892_v39  ;;  %5798 = vmatpush3.bf16.msra.mxu1 %v6894_v40 }
 0xbe8   :  { %5772 = vmatprep.subr.bf16.mxu0 %v6898_v46  ;;  %5799 = vmatprep.subr.bf16.mxu1 %v6329_v1 }
 0xbeb   :  { %5774 = vmatpush1.bf16.msra.mxu0 %v6902_v55  ;;  %5801 = vmatpush3.bf16.msra.mxu1 %v6904_v57 }
 0xbec   :  { %5776 = vmatprep.subr.bf16.mxu0 %v6908_v61  ;;  %5802 = vmatprep.subr.bf16.mxu1 %v6329_v1 }
 0xbef   :  { %5778 = vmatpush1.bf16.msra.mxu0 %v6912_v8  ;;  %5804 = vmatpush3.bf16.msra.mxu1 %v6914_v12 }
 0xbf0   :  { %5780 = vmatprep.subr.bf16.mxu0 %v6918_v17  ;;  %5805 = vmatprep.subr.bf16.mxu1 %v6329_v1 }
 0xbf3   :  { %5782 = vmatpush1.bf16.msra.mxu0 %v6922_v15  ;;  %5807 = vmatpush3.bf16.msra.mxu1 %v6924_v16 }
 0xbf4   :  { %5784 = vmatprep.subr.bf16.mxu0 %v6928_v22  ;;  %5808 = vmatprep.subr.bf16.mxu1 %v6329_v1 }
 0xbf7   :  { %5786 = vmatpush1.bf16.msra.mxu0 %v6932_v50  ;;  %5810 = vmatpush3.bf16.msra.mxu1 %v6934_v11 }
 0xbf8   :  { %5812 = vmatprep.subr.bf16.mxu0 %v6843_v45  ;;  %5843 = vmatprep.subr.bf16.mxu1 %v6329_v1 }
 0xcad   :  { %v2422_v38 = vpop.f32.mrb[24].mxu0  ;;  %v2493_v30 = vpop.f32.mrb[24].mxu1 }
 0xcae   :  { %v2424_v34 = vpop.f32.mrb[25].mxu0  ;;  %v4746_v35 = vpop.f32.mrb[25].mxu1  ;;  %v2522_v58 = vadd.f32 %v2493_v30, %v7003_v33 }
 0xcaf   :  { %v2499_v36 = vcombine.low %v2422_v38, %v2424_v34  ;;  %v2707_v34 = vrot.slane %v2537_v4, 2 }
 0xcb1   :  { %v2506_v37 = vrot.slane %v2499_v36, %v6490_v25 }
 0xcb3   :  { %v2513_v44 = vrot.slane %v2506_v37, %v6490_v25 }
 0xcb5   :  { %v2515_v49 = vadd.f32 %v2513_v44, %v2355_v48 }
 0xcb7   :  { %v3925_v52 = vmul.f32 -1.442695, %v2515_v49 }
 0xcb9   :  { %6252 = vpow2.f32 %v3925_v52 }
 0xcc3   :  { %v6253_v53 = vpop.eup %6252 }
 0xcc4   :  { %v2519_v54 = vadd.f32 1.0, %v6253_v53 }
 0xcc6   :  { %6254 = vrcp.f32 %v2519_v54 }
 0xcd0   :  { %v6255_v62 = vpop.eup %6254 }
 0xcd1   :  { %v2523_v5 = vmul.f32 %v6255_v62, %v2522_v58  ;;  %v2531_v18 = vrot.slane %v6255_v62, 1 }
 0xcd3   :  { %v2527_v3 = vadd.f32 %v2525_v2, %v2523_v5 }
 0xcd5   :  { %6256 = vtanh.f32 %v2527_v3  ;;  %v2719_v3 = vld [vmem:[#allocation2 + $0x4] ss:$8 sm:$0x7] }
 0xcdf   :  { %v6257_v7 = vpop.eup %6256 }
 0xce0   :  { %v2529_v13 = vsub.f32 %v2352_v28, %v6257_v7 }
 0xce2   :  { %v2533_v19 = vmul.f32 %v2531_v18, %v2529_v13 }
 0xce4   :  { %v2534_v20 = vadd.f32 %v6257_v7, %v2533_v19 }
 0xce6   :  { %2535 = vst [vmem:[#allocation3 + $0x2] sm:$0x1] %v2534_v20  ;;  %2603 = vmatmul.mubr.f32.vlgmr.msra.gmra.mrb[26].mxu0 %v2534_v20  ;;  %4780 = vmatmul.mubr.f32.vlgmr.msra.gmra.mrb[26].mxu1 %v2534_v20 }
 0xce7   :  { %5814 = vmatpush1.bf16.msra.mxu0 %v6857_v31  ;;  %5845 = vmatpush3.bf16.msra.mxu1 %v6859_v32 }
 0xce8   :  { %5816 = vmatprep.subr.bf16.mxu0 %v6863_v41  ;;  %5846 = vmatprep.subr.bf16.mxu1 %v6329_v1 }
 0xce9   :  { %2784 = vmatprep.mubr.f32.mxu0 %v6328_v0  ;;  %4814 = vmatprep.mubr.msk.f32.mxu1 %vm6330_vm0, %v6328_v0 }
 0xceb   :  { %5818 = vmatpush1.bf16.msra.mxu0 %v6869_v56  ;;  %5848 = vmatpush3.bf16.msra.mxu1 %v6871_v59 }
 0xcec   :  { %5820 = vmatprep.subr.bf16.mxu0 %v6875_v63  ;;  %5849 = vmatprep.subr.bf16.mxu1 %v6329_v1 }
 0xcef   :  { %5822 = vmatpush1.bf16.msra.mxu0 %v6882_v26  ;;  %5851 = vmatpush3.bf16.msra.mxu1 %v6884_v27 }
 0xcf0   :  { %5824 = vmatprep.subr.bf16.mxu0 %v6888_v29  ;;  %5852 = vmatprep.subr.bf16.mxu1 %v6329_v1 }
 0xcf3   :  { %5826 = vmatpush1.bf16.msra.mxu0 %v6892_v39  ;;  %5854 = vmatpush3.bf16.msra.mxu1 %v6894_v40 }
 0xcf4   :  { %5828 = vmatprep.subr.bf16.mxu0 %v6898_v46  ;;  %5855 = vmatprep.subr.bf16.mxu1 %v6329_v1 }
 0xcf7   :  { %5830 = vmatpush1.bf16.msra.mxu0 %v6902_v55  ;;  %5857 = vmatpush3.bf16.msra.mxu1 %v6904_v57 }
 0xcf8   :  { %5832 = vmatprep.subr.bf16.mxu0 %v6908_v61  ;;  %5858 = vmatprep.subr.bf16.mxu1 %v6329_v1 }
 0xcfb   :  { %5834 = vmatpush1.bf16.msra.mxu0 %v6912_v8  ;;  %5860 = vmatpush3.bf16.msra.mxu1 %v6914_v12 }
 0xcfc   :  { %5836 = vmatprep.subr.bf16.mxu0 %v6918_v17  ;;  %5861 = vmatprep.subr.bf16.mxu1 %v6329_v1 }
 0xcff   :  { %5838 = vmatpush1.bf16.msra.mxu0 %v6922_v15  ;;  %5863 = vmatpush3.bf16.msra.mxu1 %v6924_v16 }
 0xd00   :  { %5840 = vmatprep.subr.bf16.mxu0 %v6928_v22  ;;  %5864 = vmatprep.subr.bf16.mxu1 %v6329_v1 }
 0xd03   :  { %5842 = vmatpush1.bf16.msra.mxu0 %v6932_v50  ;;  %5866 = vmatpush3.bf16.msra.mxu1 %v6934_v11 }
 0xd04   :  { %5868 = vmatprep.subr.bf16.mxu0 %v6843_v45  ;;  %5899 = vmatprep.subr.bf16.mxu1 %v6329_v1 }
 0xdb9   :  { %v2604_v9 = vpop.f32.mrb[26].mxu0  ;;  %v2675_v10 = vpop.f32.mrb[26].mxu1 }
 0xdba   :  { %v2606_v21 = vpop.f32.mrb[27].mxu0  ;;  %v4781_v42 = vpop.f32.mrb[27].mxu1  ;;  %v2704_v28 = vadd.f32 %v2675_v10, %v7003_v33 }
 0xdbb   :  { %v2681_v47 = vcombine.low %v2604_v9, %v2606_v21  ;;  %v2889_v21 = vrot.slane %v2719_v3, 2 }
 0xdbd   :  { %v2688_v51 = vrot.slane %v2681_v47, %v6490_v25 }
 0xdbf   :  { %v2695_v60 = vrot.slane %v2688_v51, %v6490_v25 }
 0xdc1   :  { %v2697_v6 = vadd.f32 %v2695_v60, %v2537_v4 }
 0xdc3   :  { %v3926_v14 = vmul.f32 -1.442695, %v2697_v6 }
 0xdc5   :  { %6258 = vpow2.f32 %v3926_v14 }
 0xdcf   :  { %v6259_v43 = vpop.eup %6258 }
 0xdd0   :  { %v2701_v24 = vadd.f32 1.0, %v6259_v43 }
 0xdd2   :  { %6260 = vrcp.f32 %v2701_v24 }
 0xddc   :  { %v6261_v38 = vpop.eup %6260 }
 0xddd   :  { %v2705_v30 = vmul.f32 %v6261_v38, %v2704_v28  ;;  %v2713_v44 = vrot.slane %v6261_v38, 1 }
 0xddf   :  { %v2709_v35 = vadd.f32 %v2707_v34, %v2705_v30 }
 0xde1   :  { %6262 = vtanh.f32 %v2709_v35  ;;  %v2901_v35 = vld [vmem:[#allocation2 + $0x5] ss:$8 sm:$0x7] }
 0xdeb   :  { %v6263_v36 = vpop.eup %6262 }
 0xdec   :  { %v2711_v37 = vsub.f32 %v2534_v20, %v6263_v36 }
 0xdee   :  { %v2715_v48 = vmul.f32 %v2713_v44, %v2711_v37 }
 0xdf0   :  { %v2716_v49 = vadd.f32 %v6263_v36, %v2715_v48 }
 0xdf2   :  { %2717 = vst [vmem:[#allocation3 + $0x3] sm:$0x1] %v2716_v49  ;;  %2785 = vmatmul.mubr.f32.vlgmr.msra.gmra.mrb[28].mxu0 %v2716_v49  ;;  %4815 = vmatmul.mubr.f32.vlgmr.msra.gmra.mrb[28].mxu1 %v2716_v49 }
 0xdf3   :  { %5870 = vmatpush1.bf16.msra.mxu0 %v6857_v31  ;;  %5901 = vmatpush3.bf16.msra.mxu1 %v6859_v32 }
 0xdf4   :  { %5872 = vmatprep.subr.bf16.mxu0 %v6863_v41  ;;  %5902 = vmatprep.subr.bf16.mxu1 %v6329_v1 }
 0xdf5   :  { %2966 = vmatprep.mubr.f32.mxu0 %v6328_v0  ;;  %4849 = vmatprep.mubr.msk.f32.mxu1 %vm6330_vm0, %v6328_v0 }
 0xdf7   :  { %5874 = vmatpush1.bf16.msra.mxu0 %v6869_v56  ;;  %5904 = vmatpush3.bf16.msra.mxu1 %v6871_v59 }
 0xdf8   :  { %5876 = vmatprep.subr.bf16.mxu0 %v6875_v63  ;;  %5905 = vmatprep.subr.bf16.mxu1 %v6329_v1 }
 0xdfb   :  { %5878 = vmatpush1.bf16.msra.mxu0 %v6882_v26  ;;  %5907 = vmatpush3.bf16.msra.mxu1 %v6884_v27 }
 0xdfc   :  { %5880 = vmatprep.subr.bf16.mxu0 %v6888_v29  ;;  %5908 = vmatprep.subr.bf16.mxu1 %v6329_v1 }
 0xdff   :  { %5882 = vmatpush1.bf16.msra.mxu0 %v6892_v39  ;;  %5910 = vmatpush3.bf16.msra.mxu1 %v6894_v40 }
 0xe00   :  { %5884 = vmatprep.subr.bf16.mxu0 %v6898_v46  ;;  %5911 = vmatprep.subr.bf16.mxu1 %v6329_v1 }
 0xe03   :  { %5886 = vmatpush1.bf16.msra.mxu0 %v6902_v55  ;;  %5913 = vmatpush3.bf16.msra.mxu1 %v6904_v57 }
 0xe04   :  { %5888 = vmatprep.subr.bf16.mxu0 %v6908_v61  ;;  %5914 = vmatprep.subr.bf16.mxu1 %v6329_v1 }
 0xe07   :  { %5890 = vmatpush1.bf16.msra.mxu0 %v6912_v8  ;;  %5916 = vmatpush3.bf16.msra.mxu1 %v6914_v12 }
 0xe08   :  { %5892 = vmatprep.subr.bf16.mxu0 %v6918_v17  ;;  %5917 = vmatprep.subr.bf16.mxu1 %v6329_v1 }
 0xe0b   :  { %5894 = vmatpush1.bf16.msra.mxu0 %v6922_v15  ;;  %5919 = vmatpush3.bf16.msra.mxu1 %v6924_v16 }
 0xe0c   :  { %5896 = vmatprep.subr.bf16.mxu0 %v6928_v22  ;;  %5920 = vmatprep.subr.bf16.mxu1 %v6329_v1 }
 0xe0f   :  { %5898 = vmatpush1.bf16.msra.mxu0 %v6932_v50  ;;  %5922 = vmatpush3.bf16.msra.mxu1 %v6934_v11 }
 0xe10   :  { %5924 = vmatprep.subr.bf16.mxu0 %v6843_v45  ;;  %5955 = vmatprep.subr.bf16.mxu1 %v6329_v1 }
 0xec5   :  { %v2786_v52 = vpop.f32.mrb[28].mxu0  ;;  %v2857_v53 = vpop.f32.mrb[28].mxu1 }
 0xec6   :  { %v2788_v54 = vpop.f32.mrb[29].mxu0  ;;  %v4816_v58 = vpop.f32.mrb[29].mxu1  ;;  %v2886_v20 = vadd.f32 %v2857_v53, %v7003_v33 }
 0xec7   :  { %v2863_v62 = vcombine.low %v2786_v52, %v2788_v54  ;;  %v3071_v54 = vrot.slane %v2901_v35, 2 }
 0xec9   :  { %v2870_v5 = vrot.slane %v2863_v62, %v6490_v25 }
 0xecb   :  { %v2877_v2 = vrot.slane %v2870_v5, %v6490_v25 }
 0xecd   :  { %v2879_v7 = vadd.f32 %v2877_v2, %v2719_v3 }
 0xecf   :  { %v3927_v13 = vmul.f32 -1.442695, %v2879_v7 }
 0xed1   :  { %6264 = vpow2.f32 %v3927_v13 }
 0xedb   :  { %v6265_v18 = vpop.eup %6264 }
 0xedc   :  { %v2883_v19 = vadd.f32 1.0, %v6265_v18 }
 0xede   :  { %6266 = vrcp.f32 %v2883_v19 }
 0xee8   :  { %v6267_v9 = vpop.eup %6266 }
 0xee9   :  { %v2887_v10 = vmul.f32 %v6267_v9, %v2886_v20  ;;  %v2895_v60 = vrot.slane %v6267_v9, 1 }
 0xeeb   :  { %v2891_v42 = vadd.f32 %v2889_v21, %v2887_v10 }
 0xeed   :  { %6268 = vtanh.f32 %v2891_v42  ;;  %v3083_v42 = vld [vmem:[#allocation2 + $0x6] ss:$8 sm:$0x7] }
 0xef7   :  { %v6269_v47 = vpop.eup %6268 }
 0xef8   :  { %v2893_v51 = vsub.f32 %v2716_v49, %v6269_v47 }
 0xefa   :  { %v2897_v4 = vmul.f32 %v2895_v60, %v2893_v51 }
 0xefc   :  { %v2898_v6 = vadd.f32 %v6269_v47, %v2897_v4 }
 0xefe   :  { %2899 = vst [vmem:[#allocation3 + $0x4] sm:$0x1] %v2898_v6  ;;  %2967 = vmatmul.mubr.f32.vlgmr.msra.gmra.mrb[30].mxu0 %v2898_v6  ;;  %4850 = vmatmul.mubr.f32.vlgmr.msra.gmra.mrb[30].mxu1 %v2898_v6 }
 0xeff   :  { %5926 = vmatpush1.bf16.msra.mxu0 %v6857_v31  ;;  %5957 = vmatpush3.bf16.msra.mxu1 %v6859_v32 }
 0xf00   :  { %5928 = vmatprep.subr.bf16.mxu0 %v6863_v41  ;;  %5958 = vmatprep.subr.bf16.mxu1 %v6329_v1 }
 0xf01   :  { %3148 = vmatprep.mubr.f32.mxu0 %v6328_v0  ;;  %4884 = vmatprep.mubr.msk.f32.mxu1 %vm6330_vm0, %v6328_v0 }
 0xf03   :  { %5930 = vmatpush1.bf16.msra.mxu0 %v6869_v56  ;;  %5960 = vmatpush3.bf16.msra.mxu1 %v6871_v59 }
 0xf04   :  { %5932 = vmatprep.subr.bf16.mxu0 %v6875_v63  ;;  %5961 = vmatprep.subr.bf16.mxu1 %v6329_v1 }
 0xf07   :  { %5934 = vmatpush1.bf16.msra.mxu0 %v6882_v26  ;;  %5963 = vmatpush3.bf16.msra.mxu1 %v6884_v27 }
 0xf08   :  { %5936 = vmatprep.subr.bf16.mxu0 %v6888_v29  ;;  %5964 = vmatprep.subr.bf16.mxu1 %v6329_v1 }
 0xf0b   :  { %5938 = vmatpush1.bf16.msra.mxu0 %v6892_v39  ;;  %5966 = vmatpush3.bf16.msra.mxu1 %v6894_v40 }
 0xf0c   :  { %5940 = vmatprep.subr.bf16.mxu0 %v6898_v46  ;;  %5967 = vmatprep.subr.bf16.mxu1 %v6329_v1 }
 0xf0f   :  { %5942 = vmatpush1.bf16.msra.mxu0 %v6902_v55  ;;  %5969 = vmatpush3.bf16.msra.mxu1 %v6904_v57 }
 0xf10   :  { %5944 = vmatprep.subr.bf16.mxu0 %v6908_v61  ;;  %5970 = vmatprep.subr.bf16.mxu1 %v6329_v1 }
 0xf13   :  { %5946 = vmatpush1.bf16.msra.mxu0 %v6912_v8  ;;  %5972 = vmatpush3.bf16.msra.mxu1 %v6914_v12 }
 0xf14   :  { %5948 = vmatprep.subr.bf16.mxu0 %v6918_v17  ;;  %5973 = vmatprep.subr.bf16.mxu1 %v6329_v1 }
 0xf17   :  { %5950 = vmatpush1.bf16.msra.mxu0 %v6922_v15  ;;  %5975 = vmatpush3.bf16.msra.mxu1 %v6924_v16 }
 0xf18   :  { %5952 = vmatprep.subr.bf16.mxu0 %v6928_v22  ;;  %5976 = vmatprep.subr.bf16.mxu1 %v6329_v1 }
 0xf1b   :  { %5954 = vmatpush1.bf16.msra.mxu0 %v6932_v50  ;;  %5978 = vmatpush3.bf16.msra.mxu1 %v6934_v11 }
 0xf1c   :  { %5980 = vmatprep.subr.bf16.mxu0 %v6843_v45  ;;  %6011 = vmatprep.subr.bf16.mxu1 %v6329_v1 }
 0xfd1   :  { %v2968_v14 = vpop.f32.mrb[30].mxu0  ;;  %v3039_v43 = vpop.f32.mrb[30].mxu1 }
 0xfd2   :  { %v2970_v24 = vpop.f32.mrb[31].mxu0  ;;  %v4851_v28 = vpop.f32.mrb[31].mxu1  ;;  %v3068_v49 = vadd.f32 %v3039_v43, %v7003_v33 }
 0xfd3   :  { %v3045_v38 = vcombine.low %v2968_v14, %v2970_v24  ;;  %v3253_v24 = vrot.slane %v3083_v42, 2 }
 0xfd5   :  { %v3052_v30 = vrot.slane %v3045_v38, %v6490_v25 }
 0xfd7   :  { %v3059_v34 = vrot.slane %v3052_v30, %v6490_v25 }
 0xfd9   :  { %v3061_v36 = vadd.f32 %v3059_v34, %v2901_v35 }
 0xfdb   :  { %v3928_v37 = vmul.f32 -1.442695, %v3061_v36 }
 0xfdd   :  { %6270 = vpow2.f32 %v3928_v37 }
 0xfe7   :  { %v6271_v44 = vpop.eup %6270 }
 0xfe8   :  { %v3065_v48 = vadd.f32 1.0, %v6271_v44 }
 0xfea   :  { %6272 = vrcp.f32 %v3065_v48 }
 0xff4   :  { %v6273_v52 = vpop.eup %6272 }
 0xff5   :  { %v3069_v53 = vmul.f32 %v6273_v52, %v3068_v49  ;;  %v3077_v2 = vrot.slane %v6273_v52, 1 }
 0xff7   :  { %v3073_v58 = vadd.f32 %v3071_v54, %v3069_v53 }
 0xff9   :  { %6274 = vtanh.f32 %v3073_v58  ;;  %v3265_v58 = vld [vmem:[#allocation2 + $0x7] ss:$8 sm:$0x7] }
0x1003   :  { %v6275_v62 = vpop.eup %6274 }
0x1004   :  { %v3075_v5 = vsub.f32 %v2898_v6, %v6275_v62 }
0x1006   :  { %v3079_v3 = vmul.f32 %v3077_v2, %v3075_v5 }
0x1008   :  { %v3080_v7 = vadd.f32 %v6275_v62, %v3079_v3 }
0x100a   :  { %3081 = vst [vmem:[#allocation3 + $0x5] sm:$0x1] %v3080_v7  ;;  %3149 = vmatmul.mubr.f32.vlgmr.msra.gmra.mrb[32].mxu0 %v3080_v7  ;;  %4885 = vmatmul.mubr.f32.vlgmr.msra.gmra.mrb[32].mxu1 %v3080_v7 }
0x100b   :  { %5982 = vmatpush1.bf16.msra.mxu0 %v6857_v31  ;;  %6013 = vmatpush3.bf16.msra.mxu1 %v6859_v32 }
0x100c   :  { %5984 = vmatprep.subr.bf16.mxu0 %v6863_v41  ;;  %6014 = vmatprep.subr.bf16.mxu1 %v6329_v1 }
0x100d   :  { %3330 = vmatprep.mubr.f32.mxu0 %v6328_v0  ;;  %4919 = vmatprep.mubr.msk.f32.mxu1 %vm6330_vm0, %v6328_v0 }
0x100f   :  { %5986 = vmatpush1.bf16.msra.mxu0 %v6869_v56  ;;  %6016 = vmatpush3.bf16.msra.mxu1 %v6871_v59 }
0x1010   :  { %5988 = vmatprep.subr.bf16.mxu0 %v6875_v63  ;;  %6017 = vmatprep.subr.bf16.mxu1 %v6329_v1 }
0x1013   :  { %5990 = vmatpush1.bf16.msra.mxu0 %v6882_v26  ;;  %6019 = vmatpush3.bf16.msra.mxu1 %v6884_v27 }
0x1014   :  { %5992 = vmatprep.subr.bf16.mxu0 %v6888_v29  ;;  %6020 = vmatprep.subr.bf16.mxu1 %v6329_v1 }
0x1017   :  { %5994 = vmatpush1.bf16.msra.mxu0 %v6892_v39  ;;  %6022 = vmatpush3.bf16.msra.mxu1 %v6894_v40 }
0x1018   :  { %5996 = vmatprep.subr.bf16.mxu0 %v6898_v46  ;;  %6023 = vmatprep.subr.bf16.mxu1 %v6329_v1 }
0x101b   :  { %5998 = vmatpush1.bf16.msra.mxu0 %v6902_v55  ;;  %6025 = vmatpush3.bf16.msra.mxu1 %v6904_v57 }
0x101c   :  { %6000 = vmatprep.subr.bf16.mxu0 %v6908_v61  ;;  %6026 = vmatprep.subr.bf16.mxu1 %v6329_v1 }
0x101f   :  { %6002 = vmatpush1.bf16.msra.mxu0 %v6912_v8  ;;  %6028 = vmatpush3.bf16.msra.mxu1 %v6914_v12 }
0x1020   :  { %6004 = vmatprep.subr.bf16.mxu0 %v6918_v17  ;;  %6029 = vmatprep.subr.bf16.mxu1 %v6329_v1 }
0x1023   :  { %6006 = vmatpush1.bf16.msra.mxu0 %v6922_v15  ;;  %6031 = vmatpush3.bf16.msra.mxu1 %v6924_v16 }
0x1024   :  { %6008 = vmatprep.subr.bf16.mxu0 %v6928_v22  ;;  %6032 = vmatprep.subr.bf16.mxu1 %v6329_v1 }
0x1027   :  { %6010 = vmatpush1.bf16.msra.mxu0 %v6932_v50  ;;  %6034 = vmatpush3.bf16.msra.mxu1 %v6934_v11 }
0x1028   :  { %6036 = vmatprep.subr.bf16.mxu0 %v6843_v45  ;;  %6067 = vmatprep.subr.bf16.mxu1 %v6329_v1 }
0x10dd   :  { %v3150_v13 = vpop.f32.mrb[32].mxu0  ;;  %v3221_v18 = vpop.f32.mrb[32].mxu1 }
0x10de   :  { %v3152_v19 = vpop.f32.mrb[33].mxu0  ;;  %v4886_v20 = vpop.f32.mrb[33].mxu1  ;;  %v3250_v6 = vadd.f32 %v3221_v18, %v7003_v33  ;;  %v3435_v18 = vrot.slane %v3265_v58, 2 }
0x10df   :  { %v3227_v9 = vcombine.low %v3150_v13, %v3152_v19 }
0x10e1   :  { %v3234_v10 = vrot.slane %v3227_v9, %v6490_v25 }
0x10e3   :  { %v3241_v21 = vrot.slane %v3234_v10, %v6490_v25 }
0x10e5   :  { %v3243_v47 = vadd.f32 %v3241_v21, %v3083_v42 }
0x10e7   :  { %v3929_v51 = vmul.f32 -1.442695, %v3243_v47 }
0x10e9   :  { %6276 = vpow2.f32 %v3929_v51  ;;  %v174_v51 = vld [vmem:[#allocation4 + $0xe8] sm:$0xff] }
0x10f3   :  { %v6277_v60 = vpop.eup %6276 }
0x10f4   :  { %v3247_v4 = vadd.f32 1.0, %v6277_v60  ;;  %v175_v60 = vld [vmem:[#allocation4 + $0x138] sm:$0xff] }
0x10f6   :  { %6278 = vrcp.f32 %v3247_v4  ;;  %v6151_v4 = vpack.c.bf16 %v175_v60, %v174_v51 }
0x1100   :  { %v6279_v14 = vpop.eup %6278 }
0x1101   :  { %v3251_v43 = vmul.f32 %v6279_v14, %v3250_v6  ;;  %v3259_v34 = vrot.slane %v6279_v14, 1  ;;  %v176_v6 = vld [vmem:[#allocation4 + $0x188] sm:$0xff]  ;;  %v177_v14 = vld [vmem:[#allocation4 + $0x1d8] sm:$0xff] }
0x1103   :  { %v3255_v28 = vadd.f32 %v3253_v24, %v3251_v43  ;;  %v6155_v43 = vpack.c.bf16 %v177_v14, %v176_v6  ;;  %v178_v24 = vld [vmem:[#allocation4 + $0x228] sm:$0xff] }
0x1105   :  { %6280 = vtanh.f32 %v3255_v28  ;;  %v179_v28 = vld [vmem:[#allocation4 + $0x278] sm:$0xff] }
0x110f   :  { %v6281_v38 = vpop.eup %6280 }
0x1110   :  { %v3257_v30 = vsub.f32 %v3080_v7, %v6281_v38 }
0x1112   :  { %v3261_v35 = vmul.f32 %v3259_v34, %v3257_v30  ;;  %v180_v30 = vld [vmem:[#allocation4 + $0x2c8] sm:$0xff]  ;;  %v181_v34 = vld [vmem:[#allocation4 + $0x318] sm:$0xff] }
0x1114   :  { %v3262_v36 = vadd.f32 %v6281_v38, %v3261_v35  ;;  %v6159_v38 = vpack.c.bf16 %v179_v28, %v178_v24  ;;  %v6163_v35 = vpack.c.bf16 %v181_v34, %v180_v30 }
0x1116   :  { %3263 = vst [vmem:[#allocation3 + $0x6] sm:$0x1] %v3262_v36  ;;  %3331 = vmatmul.mubr.f32.vlgmr.msra.gmra.mrb[34].mxu0 %v3262_v36  ;;  %4920 = vmatmul.mubr.f32.vlgmr.msra.gmra.mrb[34].mxu1 %v3262_v36 }
0x1117   :  { %6038 = vmatpush1.bf16.msra.mxu0 %v6857_v31  ;;  %6069 = vmatpush3.bf16.msra.mxu1 %v6859_v32 }
0x1118   :  { %6040 = vmatprep.subr.bf16.mxu0 %v6863_v41  ;;  %6070 = vmatprep.subr.bf16.mxu1 %v6329_v1 }
0x1119   :  { %3512 = vmatprep.mubr.f32.mxu0 %v6328_v0  ;;  %4954 = vmatprep.mubr.msk.f32.mxu1 %vm6330_vm0, %v6328_v0 }
0x111b   :  { %6042 = vmatpush1.bf16.msra.mxu0 %v6869_v56  ;;  %6072 = vmatpush3.bf16.msra.mxu1 %v6871_v59 }
0x111c   :  { %6044 = vmatprep.subr.bf16.mxu0 %v6875_v63  ;;  %6073 = vmatprep.subr.bf16.mxu1 %v6329_v1 }
0x111f   :  { %6046 = vmatpush1.bf16.msra.mxu0 %v6882_v26  ;;  %6075 = vmatpush3.bf16.msra.mxu1 %v6884_v27 }
0x1120   :  { %6048 = vmatprep.subr.bf16.mxu0 %v6888_v29  ;;  %6076 = vmatprep.subr.bf16.mxu1 %v6329_v1 }
0x1123   :  { %6050 = vmatpush1.bf16.msra.mxu0 %v6892_v39  ;;  %6078 = vmatpush3.bf16.msra.mxu1 %v6894_v40 }
0x1124   :  { %6052 = vmatprep.subr.bf16.mxu0 %v6898_v46  ;;  %6079 = vmatprep.subr.bf16.mxu1 %v6329_v1 }
0x1127   :  { %6054 = vmatpush1.bf16.msra.mxu0 %v6902_v55  ;;  %6081 = vmatpush3.bf16.msra.mxu1 %v6904_v57 }
0x1128   :  { %6056 = vmatprep.subr.bf16.mxu0 %v6908_v61  ;;  %6082 = vmatprep.subr.bf16.mxu1 %v6329_v1 }
0x112b   :  { %6058 = vmatpush1.bf16.msra.mxu0 %v6912_v8  ;;  %6084 = vmatpush3.bf16.msra.mxu1 %v6914_v12 }
0x112c   :  { %6060 = vmatprep.subr.bf16.mxu0 %v6918_v17  ;;  %6085 = vmatprep.subr.bf16.mxu1 %v6329_v1 }
0x112f   :  { %6062 = vmatpush1.bf16.msra.mxu0 %v6922_v15  ;;  %6087 = vmatpush3.bf16.msra.mxu1 %v6924_v16 }
0x1130   :  { %6064 = vmatprep.subr.bf16.mxu0 %v6928_v22  ;;  %6088 = vmatprep.subr.bf16.mxu1 %v6329_v1 }
0x1133   :  { %6066 = vmatpush1.bf16.msra.mxu0 %v6932_v50  ;;  %6090 = vmatpush3.bf16.msra.mxu1 %v6934_v11 }
0x1134   :  { %6092 = vmatprep.subr.bf16.mxu0 %v6843_v45  ;;  %6123 = vmatprep.subr.bf16.mxu1 %v6329_v1 }
0x11e9   :  { %v3332_v37 = vpop.f32.mrb[34].mxu0  ;;  %v3403_v44 = vpop.f32.mrb[34].mxu1 }
0x11ea   :  { %v3334_v48 = vpop.f32.mrb[35].mxu0  ;;  %v4921_v49 = vpop.f32.mrb[35].mxu1  ;;  %v3432_v45 = vadd.f32 %v3403_v44, %v7003_v33 }
0x11eb   :  { %v3409_v52 = vcombine.low %v3332_v37, %v3334_v48  ;;  %v183_v37 = vld [vmem:[#allocation4 + $0x3b8] sm:$0xff]  ;;  %v184_v48 = vld [vmem:[#allocation4 + $0x408] sm:$0xff] }
0x11ec   :  { %v185_v49 = vld [vmem:[#allocation4 + $0x458] sm:$0xff] }
0x11ed   :  { %v3416_v53 = vrot.slane %v3409_v52, %v6490_v25  ;;  %v6171_v52 = vpack.c.bf16 %v185_v49, %v184_v48 }
0x11ef   :  { %v3423_v54 = vrot.slane %v3416_v53, %v6490_v25  ;;  %v186_v53 = vld [vmem:[#allocation4 + $0x4a8] sm:$0xff] }
0x11f1   :  { %v3425_v62 = vadd.f32 %v3423_v54, %v3265_v58  ;;  %v187_v54 = vld [vmem:[#allocation4 + $0x4f8] sm:$0xff] }
0x11f2   :  { %v6175_v58 = vpack.c.bf16 %v187_v54, %v186_v53 }
0x11f3   :  { %v3930_v5 = vmul.f32 -1.442695, %v3425_v62 }
0x11f5   :  { %6282 = vpow2.f32 %v3930_v5 }
0x11ff   :  { %v6283_v2 = vpop.eup %6282 }
0x1200   :  { %v3429_v3 = vadd.f32 1.0, %v6283_v2 }
0x1202   :  { %6284 = vrcp.f32 %v3429_v3 }
0x120c   :  { %v6285_v7 = vpop.eup %6284 }
0x120d   :  { %v3433_v13 = vmul.f32 %v6285_v7, %v3432_v45  ;;  %v3441_v10 = vrot.slane %v6285_v7, 1 }
0x120f   :  { %v3437_v19 = vadd.f32 %v3435_v18, %v3433_v13  ;;  %v3629_v18 = vld [vmem:[#allocation2 + $0x19] ss:$8 sm:$0x7] }
0x1211   :  { %6286 = vtanh.f32 %v3437_v19 }
0x121b   :  { %v6287_v20 = vpop.eup %6286 }
0x121c   :  { %v3439_v9 = vsub.f32 %v3262_v36, %v6287_v20  ;;  %v182_v36 = vld [vmem:[#allocation4 + $0x368] sm:$0xff] }
0x121d   :  { %v6167_v44 = vpack.c.bf16 %v183_v37, %v182_v36 }
0x121e   :  { %v3443_v21 = vmul.f32 %v3441_v10, %v3439_v9 }
0x1220   :  { %v3444_v42 = vadd.f32 %v6287_v20, %v3443_v21 }
0x1222   :  { %3445 = vst [vmem:[#allocation3 + $0x7] sm:$0x1] %v3444_v42  ;;  %3513 = vmatmul.mubr.f32.vlgmr.msra.gmra.mrb[36].mxu0 %v3444_v42  ;;  %4955 = vmatmul.mubr.f32.vlgmr.msra.gmra.mrb[36].mxu1 %v3444_v42 }
0x1223   :  { %6094 = vmatpush1.bf16.msra.mxu0 %v6857_v31  ;;  %6125 = vmatpush3.bf16.msra.mxu1 %v6859_v32 }
0x1224   :  { %6096 = vmatprep.subr.bf16.mxu0 %v6863_v41  ;;  %6126 = vmatprep.subr.bf16.mxu1 %v6329_v1 }
0x1225   :  { %3694 = vmatprep.mubr.f32.mxu0 %v6328_v0  ;;  %4989 = vmatprep.mubr.msk.f32.mxu1 %vm6330_vm0, %v6328_v0 }
0x1227   :  { %6098 = vmatpush1.bf16.msra.mxu0 %v6869_v56  ;;  %6128 = vmatpush3.bf16.msra.mxu1 %v6871_v59 }
0x1228   :  { %6100 = vmatprep.subr.bf16.mxu0 %v6875_v63  ;;  %6129 = vmatprep.subr.bf16.mxu1 %v6329_v1 }
0x122b   :  { %6102 = vmatpush1.bf16.msra.mxu0 %v6882_v26  ;;  %6131 = vmatpush3.bf16.msra.mxu1 %v6884_v27  ;;  %v3447_v26 = vld [vmem:[#allocation2 + $0x18] ss:$8 sm:$0x7] }
0x122c   :  { %6104 = vmatprep.subr.bf16.mxu0 %v6888_v29  ;;  %6132 = vmatprep.subr.bf16.mxu1 %v6329_v1 }
0x122f   :  { %6106 = vmatpush1.bf16.msra.mxu0 %v6892_v39  ;;  %6134 = vmatpush3.bf16.msra.mxu1 %v6894_v40 }
0x1230   :  { %6108 = vmatprep.subr.bf16.mxu0 %v6898_v46  ;;  %6135 = vmatprep.subr.bf16.mxu1 %v6329_v1 }
0x1233   :  { %6110 = vmatpush1.bf16.msra.mxu0 %v6902_v55  ;;  %6137 = vmatpush3.bf16.msra.mxu1 %v6904_v57  ;;  %v3617_v57 = vrot.slane %v3447_v26, 2 }
0x1234   :  { %6112 = vmatprep.subr.bf16.mxu0 %v6908_v61  ;;  %6138 = vmatprep.subr.bf16.mxu1 %v6329_v1 }
0x1237   :  { %6114 = vmatpush1.bf16.msra.mxu0 %v6912_v8  ;;  %6140 = vmatpush3.bf16.msra.mxu1 %v6914_v12 }
0x1238   :  { %6116 = vmatprep.subr.bf16.mxu0 %v6918_v17  ;;  %6141 = vmatprep.subr.bf16.mxu1 %v6329_v1 }
0x123b   :  { %6118 = vmatpush1.bf16.msra.mxu0 %v6922_v15  ;;  %6143 = vmatpush3.bf16.msra.mxu1 %v6924_v16 }
0x123c   :  { %6120 = vmatprep.subr.bf16.mxu0 %v6928_v22  ;;  %6144 = vmatprep.subr.bf16.mxu1 %v6329_v1  ;;  %v3810_v22 = vld [vmem:[#allocation3] sm:$0xff] }
0x123f   :  { %6122 = vmatpush1.bf16.msra.mxu0 %v6932_v50  ;;  %6146 = vmatpush3.bf16.msra.mxu1 %v6934_v11  ;;  %v172_v50 = vld [vmem:[#allocation4 + $0x48] sm:$0xff]  ;;  %v173_v11 = vld [vmem:[#allocation4 + $0x98] sm:$0xff] }
0x1240   :  { %v6147_v47 = vpack.c.bf16 %v173_v11, %v172_v50 }
0x1242   :  { %6148 = vmatprep.subr.bf16.mxu0 %v6147_v47 }
0x12f5   :  { %v3514_v0 = vpop.f32.mrb[36].mxu0  ;;  %v3585_v31 = vpop.f32.mrb[36].mxu1 }
0x12f6   :  { %v3516_v32 = vpop.f32.mrb[37].mxu0  ;;  %v4956_v41 = vpop.f32.mrb[37].mxu1  ;;  %v3614_v1 = vadd.f32 %v3585_v31, %v7003_v33  ;;  %v3799_v31 = vrot.slane %v3629_v18, 2 }
0x12f7   :  { %v3591_v56 = vcombine.low %v3514_v0, %v3516_v32 }
0x12f9   :  { %v3598_v59 = vrot.slane %v3591_v56, %v6490_v25 }
0x12fb   :  { %v3605_v63 = vrot.slane %v3598_v59, %v6490_v25 }
0x12fd   :  { %v3607_v27 = vadd.f32 %v3605_v63, %v3447_v26 }
0x12ff   :  { %v3931_v29 = vmul.f32 -1.442695, %v3607_v27  ;;  %v3933_v27 = vld [vmem:[%s7292_s2 + $0x2] ss:$0 sm:$0xff] }
0x1301   :  { %6288 = vpow2.f32 %v3931_v29 }
0x130b   :  { %v6289_v39 = vpop.eup %6288 }
0x130c   :  { %v3611_v40 = vadd.f32 1.0, %v6289_v39 }
0x130e   :  { %6290 = vrcp.f32 %v3611_v40 }
0x1318   :  { %v6291_v46 = vpop.eup %6290 }
0x1319   :  { %v3615_v55 = vmul.f32 %v6291_v46, %v3614_v1  ;;  %v3623_v17 = vrot.slane %v6291_v46, 1 }
0x131b   :  { %v3619_v61 = vadd.f32 %v3617_v57, %v3615_v55 }
0x131d   :  { %6292 = vtanh.f32 %v3619_v61 }
0x1327   :  { %v6293_v8 = vpop.eup %6292 }
0x1328   :  { %v3621_v12 = vsub.f32 %v3444_v42, %v6293_v8 }
0x132a   :  { %v3625_v15 = vmul.f32 %v3623_v17, %v3621_v12 }
0x132c   :  { %v7271_v16 = vadd.f32 %v6293_v8, %v3625_v15 }
0x132e   :  { %3627 = vst [vmem:[#allocation3 + $0x8] sm:$0x1] %v7271_v16  ;;  %3695 = vmatmul.mubr.f32.vlgmr.msra.gmra.mrb[38].mxu0 %v7271_v16  ;;  %4990 = vmatmul.mubr.f32.vlgmr.msra.gmra.mrb[38].mxu1 %v7271_v16 }
0x132f   :  { %5024 = vmatprep.mubr.f32.mxu0 %v3810_v22  ;;  %6150 = vmatpush3.bf16.msra.mxu0 %v6147_v47 }
0x1330   :  { %6152 = vmatprep.subr.bf16.mxu0 %v6151_v4 }
0x1333   :  { %6154 = vmatpush3.bf16.msra.mxu0 %v6151_v4 }
0x1334   :  { %6156 = vmatprep.subr.bf16.mxu0 %v6155_v43 }
0x1337   :  { %6158 = vmatpush3.bf16.msra.mxu0 %v6155_v43 }
0x1338   :  { %6160 = vmatprep.subr.bf16.mxu0 %v6159_v38 }
0x133b   :  { %6162 = vmatpush3.bf16.msra.mxu0 %v6159_v38 }
0x133c   :  { %6164 = vmatprep.subr.bf16.mxu0 %v6163_v35 }
0x133f   :  { %6166 = vmatpush3.bf16.msra.mxu0 %v6163_v35 }
0x1340   :  { %6168 = vmatprep.subr.bf16.mxu0 %v6167_v44 }
0x1343   :  { %6170 = vmatpush3.bf16.msra.mxu0 %v6167_v44 }
0x1344   :  { %6172 = vmatprep.subr.bf16.mxu0 %v6171_v52 }
0x1347   :  { %6174 = vmatpush3.bf16.msra.mxu0 %v6171_v52 }
0x1348   :  { %6176 = vmatprep.subr.bf16.mxu0 %v6175_v58 }
0x134b   :  { %6178 = vmatpush3.bf16.msra.mxu0 %v6175_v58 }
0x1401   :  { %v3696_v62 = vpop.f32.mrb[38].mxu0  ;;  %v3767_v5 = vpop.f32.mrb[38].mxu1 }
0x1402   :  { %v3698_v2 = vpop.f32.mrb[39].mxu0  ;;  %v4991_v3 = vpop.f32.mrb[39].mxu1  ;;  %v3796_v21 = vadd.f32 %v3767_v5, %v7003_v33 }
0x1403   :  { %v3773_v45 = vcombine.low %v3696_v62, %v3698_v2 }
0x1405   :  { %v3780_v7 = vrot.slane %v3773_v45, %v6490_v25 }
0x1407   :  { %v3787_v13 = vrot.slane %v3780_v7, %v6490_v25 }
0x1409   :  { %v3789_v19 = vadd.f32 %v3787_v13, %v3629_v18 }
0x140b   :  { %v3932_v20 = vmul.f32 -1.442695, %v3789_v19 }
0x140d   :  { %6294 = vpow2.f32 %v3932_v20 }
0x1417   :  { %v6295_v9 = vpop.eup %6294 }
0x1418   :  { %v3793_v10 = vadd.f32 1.0, %v6295_v9 }
0x141a   :  { %6296 = vrcp.f32 %v3793_v10 }
0x1424   :  { %v6297_v42 = vpop.eup %6296 }
0x1425   :  { %v3797_v0 = vmul.f32 %v6297_v42, %v3796_v21  ;;  %v3805_v59 = vrot.slane %v6297_v42, 1 }
0x1427   :  { %v3801_v32 = vadd.f32 %v3799_v31, %v3797_v0 }
0x1429   :  { %6298 = vtanh.f32 %v3801_v32 }
0x1433   :  { %v6299_v41 = vpop.eup %6298 }
0x1434   :  { %v3803_v56 = vsub.f32 %v7271_v16, %v6299_v41 }
0x1436   :  { %v3807_v63 = vmul.f32 %v3805_v59, %v3803_v56 }
0x1438   :  { %v3808_v25 = vadd.f32 %v6299_v41, %v3807_v63 }
0x143a   :  { %3809 = vst [vmem:[#allocation3 + $0x9] sm:$0x1] %v3808_v25 }
0x1441   :  { %v3811_v26 = vld [vmem:[#allocation3 + $0x8] sm:$0x3] }
0x1442   :  { %5025 = vmatmul.mubr.f32.vlgmr.msra.gmra.mrb[40].mxu0 %v3811_v26 }
0x1515   :  { %v5026_v29 = vpop.f32.mrb[40].mxu0 }
0x1516   :  { %v3888_v33 = vadd.f32 %v5026_v29, %v3933_v27  ;;  %v3882_v39 = vpop.f32.mrb[41].mxu0 }
0x1517   :  { %v3883_v40 = vadd.f32 %v3933_v27, %v3882_v39 }
0x1518   :  { %3899 = vst [vmem:[%s7293_s3 + $0x8] sm:$0x3] %v3888_v33 }
0x1519   :  { %v3896_v1 = vsel %vm3894_vm1, 0.0, %v3883_v40 }
0x151a   :  { %3898 = vst [vmem:[%s7293_s3] sm:$0xff] %v3896_v1 }
0x151b   :  { %3904 = vsyncpa [#allocation5], 1 }

</bundles_post_ra>
